<compile_context>
chip_gen: v6e
topology: v6e:2x2x1
jax: 0.10.0
libtpu: 0.0.40
codegen_flags: <defaults>
</compile_context>

<pallas_src>
import numpy as np
import jax
import jax.numpy as jnp
from jax import lax
from jax.experimental import pallas as pl
from jax.experimental.pallas import tpu as pltpu

BATCH = 2
N_SAMPLES = 2048
MODEL_DIM = 16
FB_KERNEL = 64                         # filter-bank kernel size
WINDOW = 64                            # temporal pooling window (orig 512)
STEP = 32                              # temporal pooling step   (orig 256)
N_FRAMES = N_SAMPLES // STEP           # 64
N_POS_FREQS = 16
POS_CH = 2 * N_POS_FREQS + 1           # 33
REDUCE_IN = MODEL_DIM + POS_CH         # 49
DILATIONS = (1, 3, 9, 27, 1)
N_DIL = len(DILATIONS)
N_EVENTS = 8
EPS = 1e-8

GROUP = 8                              # im2col rows built per strided roll
N_GROUPS = FB_KERNEL // GROUP          # 8
# padded input length: >= N_SAMPLES + FB_KERNEL + 1 and a multiple of 128 lanes
XLEN = ((N_SAMPLES + FB_KERNEL + 1 + 127) // 128) * 128   # 2176


# --------------------------------------------------------------------------
# Fused kernel: filter-bank conv + abs + temporal pooling + ExampleNorm +
#               reduce(49->16) + DilatedStack + attend + softmax.
# Grid over batch ("parallel" -> one example per TensorCore on v7x).
# --------------------------------------------------------------------------
def summarizer_kernel(xker_ref, fb_ref, pmat_ref, posp_ref, wrf_ref, wcat_ref,
                      be_ref, wa_ref, ctx_ref, attn_ref, stack_ref):
    # ---------------- frontend: conv via grouped im2col + one MXU matmul -----
    # x is broadcast once over 8 sublanes; one strided roll per group gives
    # sublane r the left-shift (8g + 8 - r), i.e. tap (8g + 7 - r); fb columns
    # are pre-permuted on the host to match this ordering.
    xb = jnp.broadcast_to(xker_ref[0], (GROUP, XLEN))               # (8, 2176)
    for g in range(N_GROUPS):
        rolled = pltpu.roll(xb, XLEN - GROUP * g - GROUP, axis=1,
                            stride=1, stride_axis=0)
        stack_ref[pl.ds(GROUP * g, GROUP), :] = rolled[:, :N_SAMPLES]
    # cross-correlation (F.conv1d semantics): (16,64)@(64,2048) on the MXU
    acc = jnp.dot(fb_ref[...], stack_ref[...], preferred_element_type=jnp.float32)
    a = jnp.abs(acc)                                                # (16, 2048)

    # avg_pool1d(WINDOW, STEP, pad=WINDOW//2, count_include_pad)[..., :N_FRAMES]
    # as a matmul with a VMEM-resident pooling matrix (constant-index_map input).
    pooled = jnp.dot(a, pmat_ref[...], preferred_element_type=jnp.float32)  # (16,64)

    # TODO(synk): ExampleNorm reconstructed as per-example mean/std (unbiased).
    m = jnp.mean(pooled, keepdims=True)
    c = pooled - m
    var = jnp.sum(c * c, keepdims=True) / (MODEL_DIM * N_FRAMES - 1)
    feats = c * lax.rsqrt(var + EPS)                                # (16, 64)

    # ------------- reduce (1x1 conv 49->16); pos part precomputed on host ----
    h = jnp.dot(wrf_ref[...], feats, preferred_element_type=jnp.float32) + posp_ref[...]

    # ------------- DilatedStack ([1,3,9,27,1]) -------------------------------
    # TODO(synk): reconstructed as residual blocks
    #   (Conv1d k=3 dil=d pad=d -> Conv1d 1x1 -> +residual -> leaky_relu(0.2));
    #   the 1x1 conv is folded into the dilated-conv weights on the host and the
    #   three taps are fused into a single (16,48)@(48,64) matmul.
    col = lax.broadcasted_iota(jnp.int32, (MODEL_DIM, N_FRAMES), 1)  # hoisted once
    for i, d in enumerate(DILATIONS):
        # zero-padded shifts h[:, t -/+ d] via XLU roll + lane mask
        left = jnp.where(col >= d, pltpu.roll(h, d, axis=1), 0.0)
        right = jnp.where(col < N_FRAMES - d,
                          pltpu.roll(h, N_FRAMES - d, axis=1), 0.0)
        cat = jnp.concatenate([left, h, right], axis=0)              # (48, 64)
        y = (jnp.dot(wcat_ref[i], cat, preferred_element_type=jnp.float32)
             + be_ref[:, i:i + 1])
        y = y + h
        h = jnp.where(y > 0.0, y, 0.2 * y)                           # leaky_relu(0.2)

    ctx_ref[0] = h

    # ------------- attend Linear(16,1) + softmax over frames -----------------
    # (the scalar attend bias is omitted: softmax is shift-invariant, exact no-op)
    s = jnp.dot(wa_ref[...], h, preferred_element_type=jnp.float32)  # (1, N_FRAMES)
    s = s - jnp.max(s, axis=-1, keepdims=True)
    e = jnp.exp(s)
    attn_ref[0] = e / jnp.sum(e, axis=-1, keepdims=True)             # exact softmax


def summarizer_core(xker, fb_k, pmat, pos_proj, wr_feats, wcat, b_eff, wa):
    batch = xker.shape[0]
    return pl.pallas_call(
        summarizer_kernel,
        out_shape=(jax.ShapeDtypeStruct((batch, MODEL_DIM, N_FRAMES), jnp.float32),
                   jax.ShapeDtypeStruct((batch, 1, N_FRAMES), jnp.float32)),
        grid=(batch,),
        in_specs=[
            pl.BlockSpec((1, 1, XLEN), lambda b: (b, 0, 0)),                  # x (padded)
            pl.BlockSpec((MODEL_DIM, FB_KERNEL), lambda b: (0, 0)),           # fb (permuted)
            pl.BlockSpec((N_SAMPLES, N_FRAMES), lambda b: (0, 0)),            # pooling matrix
            pl.BlockSpec((MODEL_DIM, N_FRAMES), lambda b: (0, 0)),            # pos projection
            pl.BlockSpec((MODEL_DIM, MODEL_DIM), lambda b: (0, 0)),           # reduce (feats)
            pl.BlockSpec((N_DIL, MODEL_DIM, 3 * MODEL_DIM), lambda b: (0, 0, 0)),  # fused dil.
            pl.BlockSpec((MODEL_DIM, N_DIL), lambda b: (0, 0)),               # fused biases
            pl.BlockSpec((1, MODEL_DIM), lambda b: (0, 0)),                   # attend weight
        ],
        out_specs=(pl.BlockSpec((1, MODEL_DIM, N_FRAMES), lambda b: (b, 0, 0)),
                   pl.BlockSpec((1, 1, N_FRAMES), lambda b: (b, 0, 0))),
        scratch_shapes=[pltpu.VMEM((FB_KERNEL, N_SAMPLES), jnp.float32)],     # im2col stack
        compiler_params=pltpu.CompilerParams(dimension_semantics=("parallel",)),
    )(xker, fb_k, pmat, pos_proj, wr_feats, wcat, b_eff, wa)


# --------------------------------------------------------------------------
# Parameters, constants, full forward
# --------------------------------------------------------------------------
def init_params(key):
    ks = jax.random.split(key, 4)
    # synthetic deterministic "morlet-like" filter bank: windowed sinusoids, unit L2 norm
    t = np.arange(FB_KERNEL)
    win = np.hanning(FB_KERNEL)
    freqs = np.linspace(0.01, 0.45, MODEL_DIM)
    fb = win[None, :] * np.sin(2 * np.pi * freqs[:, None] * t[None, :])
    fb = fb / (np.linalg.norm(fb, axis=1, keepdims=True) + 1e-12)

    def u(k, shape):                   # weight_init = 0.1 -> uniform(-0.1, 0.1)
        return jax.random.uniform(k, shape, jnp.float32, -0.1, 0.1)

    return dict(
        fb_w=jnp.asarray(fb, jnp.float32),
        w_reduce=u(ks[0], (MODEL_DIM, REDUCE_IN)),
        wd=u(ks[1], (N_DIL, 3, MODEL_DIM, MODEL_DIM)),    # [block, tap, out, in]
        wp=u(ks[2], (N_DIL, MODEL_DIM, MODEL_DIM)),
        # col 0: reduce bias; cols 1..5: dilated-conv biases; cols 6..10: 1x1 biases
        biases=jnp.zeros((MODEL_DIM, 1 + 2 * N_DIL), jnp.float32),
        wa=u(ks[3], (1, MODEL_DIM)),
    )


def make_pos_encoding():
    # TODO(synk): pos_encoded reconstructed as [t, sin(2^i t), cos(2^i t)], t=linspace(-1,1)
    t = np.linspace(-1.0, 1.0, N_FRAMES)
    chans = [t]
    for i in range(N_POS_FREQS):
        chans.append(np.sin((2.0 ** i) * t))
        chans.append(np.cos((2.0 ** i) * t))
    return jnp.asarray(np.stack(chans, axis=0), jnp.float32)   # (33, N_FRAMES)


def make_pool_matrix():
    # avg_pool1d(WINDOW, STEP, padding=WINDOW//2, count_include_pad=True), first N_FRAMES
    srow = np.arange(N_SAMPLES)[:, None]
    fcol = np.arange(N_FRAMES)[None, :]
    start = fcol * STEP - (WINDOW // 2)
    pmat = ((srow >= start) & (srow < start + WINDOW)).astype(np.float32) / WINDOW
    return jnp.asarray(pmat)                                   # (2048, 64)


# filter-bank column permutation matching the strided-roll im2col row order
_FB_PERM = np.array([GROUP * (r // GROUP) + (GROUP - 1) - (r % GROUP)
                     for r in range(FB_KERNEL)])


@jax.jit
def summarizer_forward(params, x, pos, pmat):
    # x: (BATCH, 1, N_SAMPLES)
    x = x.reshape(-1, 1, N_SAMPLES)
    # conv pad 32 on each side, plus 1 extra on the left so no roll amount is 0,
    # plus right zeros up to the 128-lane-aligned XLEN.
    xker = jnp.pad(x, ((0, 0), (0, 0),
                       (FB_KERNEL // 2 + 1, XLEN - N_SAMPLES - FB_KERNEL // 2 - 1)))

    # -------- batch-invariant host-side folds (tiny; fused by XLA) ----------
    fb_k = params["fb_w"][:, _FB_PERM]                                   # (16, 64)
    wr = params["w_reduce"]
    pos_proj = wr[:, MODEL_DIM:] @ pos + params["biases"][:, 0:1]        # (16, 64)
    wr_feats = wr[:, :MODEL_DIM]                                         # (16, 16)
    wp, wd = params["wp"], params["wd"]
    # fold 1x1 conv into dilated conv (no activation in between -> exact)
    wd_eff = jnp.einsum('iab,itbc->itac', wp, wd)                        # (5,3,16,16)
    wcat = wd_eff.transpose(0, 2, 1, 3).reshape(N_DIL, MODEL_DIM, 3 * MODEL_DIM)
    b_dil = params["biases"][:, 1:1 + N_DIL]
    b_11 = params["biases"][:, 1 + N_DIL:1 + 2 * N_DIL]
    b_eff = jnp.einsum('iab,bi->ai', wp, b_dil) + b_11                   # (16, 5)

    ctx, attn = summarizer_core(xker, fb_k, pmat, pos_proj, wr_feats,
                                wcat, b_eff, params["wa"])               # (B,16,64),(B,1,64)
    attn2 = attn[:, 0, :]                                                # (B, 64)
    # sparsify_vectors(normalize=False): top-k frames by attention, gather & scale.
    # TODO(synk): top-k + gather + final ExampleNorm kept in plain JAX (no clean
    #             Pallas TPU top-k primitive); XLA fuses the tiny tail.
    values, indices = lax.top_k(attn2, N_EVENTS)                         # (B, 8)
    ctx_t = jnp.transpose(ctx, (0, 2, 1))                                # (B, 64, 16)
    gathered = jnp.take_along_axis(ctx_t, indices[:, :, None], axis=1)   # (B, 8, 16)
    g = gathered * values[:, :, None]
    m = jnp.mean(g, axis=(1, 2), keepdims=True)
    c = g - m
    var = jnp.sum(c * c, axis=(1, 2), keepdims=True) / (N_EVENTS * MODEL_DIM - 1)
    out = c / (jnp.sqrt(var) + EPS)
    return out, indices


if __name__ == "__main__":
    key = jax.random.PRNGKey(0)
    pkey, xkey = jax.random.split(key)
    params = init_params(pkey)
    pos = make_pos_encoding()
    pmat = make_pool_matrix()
    x = jax.random.normal(xkey, (BATCH, 1, N_SAMPLES), jnp.float32)

    out, indices = summarizer_forward(params, x, pos, pmat)
    jax.block_until_ready((out, indices))
    assert out.shape == (BATCH, N_EVENTS, MODEL_DIM)
    assert indices.shape == (BATCH, N_EVENTS)
    assert bool(jnp.all(jnp.isfinite(out)))
    print("KERNEL_OK")
</pallas_src>

<mosaic_0001>
module attributes {stable_mosaic.version = 11 : i64} {
  func.func @summarizer_kernel(%arg0: i32, %arg1: memref<1x1x2176xf32, #tpu.memory_space<vmem>>, %arg2: memref<16x64xf32, #tpu.memory_space<vmem>>, %arg3: memref<2048x64xf32, #tpu.memory_space<vmem>>, %arg4: memref<16x64xf32, #tpu.memory_space<vmem>>, %arg5: memref<16x16xf32, #tpu.memory_space<vmem>>, %arg6: memref<5x16x48xf32, #tpu.memory_space<vmem>>, %arg7: memref<16x5xf32, #tpu.memory_space<vmem>>, %arg8: memref<1x16xf32, #tpu.memory_space<vmem>>, %arg9: memref<1x16x64xf32, #tpu.memory_space<vmem>>, %arg10: memref<1x1x64xf32, #tpu.memory_space<vmem>>, %arg11: memref<64x2048xf32, #tpu.memory_space<vmem>>) attributes {dimension_semantics = [#tpu.dimension_semantics<parallel>], iteration_bounds = array<i64: 2>, scalar_prefetch = 0 : i64, scratch_operands = 1 : i64, tpu.core_type = #tpu.core_type<tc>, window_params = [{transform_indices = @transform_0, window_bounds = array<i64: 1, 1, 2176>}, {pipeline_mode = #tpu.pipeline_mode<synchronous>, transform_indices = @transform_1, window_bounds = array<i64: 16, 64>}, {pipeline_mode = #tpu.pipeline_mode<synchronous>, transform_indices = @transform_2, window_bounds = array<i64: 2048, 64>}, {pipeline_mode = #tpu.pipeline_mode<synchronous>, transform_indices = @transform_3, window_bounds = array<i64: 16, 64>}, {pipeline_mode = #tpu.pipeline_mode<synchronous>, transform_indices = @transform_4, window_bounds = array<i64: 16, 16>}, {pipeline_mode = #tpu.pipeline_mode<synchronous>, transform_indices = @transform_5, window_bounds = array<i64: 5, 16, 48>}, {pipeline_mode = #tpu.pipeline_mode<synchronous>, transform_indices = @transform_6, window_bounds = array<i64: 16, 5>}, {pipeline_mode = #tpu.pipeline_mode<synchronous>, transform_indices = @transform_7, window_bounds = array<i64: 1, 16>}, {transform_indices = @transform_8, window_bounds = array<i64: 1, 16, 64>}, {transform_indices = @transform_9, window_bounds = array<i64: 1, 1, 64>}]} {
    %c0 = arith.constant 0 : index
    %c0_0 = arith.constant 0 : index
    %c0_1 = arith.constant 0 : index
    %0 = vector.load %arg1[%c0, %c0_0, %c0_1] : memref<1x1x2176xf32, #tpu.memory_space<vmem>>, vector<1x1x2176xf32>
    %1 = vector.shape_cast %0 : vector<1x1x2176xf32> to vector<1x2176xf32>
    %2 = vector.shape_cast %1 : vector<1x2176xf32> to vector<1x2176xf32>
    %3 = vector.broadcast %2 : vector<1x2176xf32> to vector<8x2176xf32>
    %c2168_i32 = arith.constant 2168 : i32
    %4 = tpu.dynamic_rotate %3 by %c2168_i32 dim 1 {stride = 1 : si32, stride_dimension = 0 : si32} : vector<8x2176xf32>, i32 -> vector<8x2176xf32>
    %5 = vector.extract_strided_slice %4 {offsets = [0, 0], sizes = [8, 2048], strides = [1, 1]} : vector<8x2176xf32> to vector<8x2048xf32>
    %c0_2 = arith.constant 0 : index
    %c0_3 = arith.constant 0 : index
    %6 = vector.load %arg11[%c0_2, %c0_3] : memref<64x2048xf32, #tpu.memory_space<vmem>>, vector<8x2048xf32>
    tpu.vector_store %arg11[%c0_2, %c0_3], %5 {strides = array<i32>} : memref<64x2048xf32, #tpu.memory_space<vmem>>, vector<8x2048xf32>,
    %c2160_i32 = arith.constant 2160 : i32
    %7 = tpu.dynamic_rotate %3 by %c2160_i32 dim 1 {stride = 1 : si32, stride_dimension = 0 : si32} : vector<8x2176xf32>, i32 -> vector<8x2176xf32>
    %8 = vector.extract_strided_slice %7 {offsets = [0, 0], sizes = [8, 2048], strides = [1, 1]} : vector<8x2176xf32> to vector<8x2048xf32>
    %c8 = arith.constant 8 : index
    %c0_4 = arith.constant 0 : index
    %9 = vector.load %arg11[%c8, %c0_4] : memref<64x2048xf32, #tpu.memory_space<vmem>>, vector<8x2048xf32>
    tpu.vector_store %arg11[%c8, %c0_4], %8 {strides = array<i32>} : memref<64x2048xf32, #tpu.memory_space<vmem>>, vector<8x2048xf32>,
    %c2152_i32 = arith.constant 2152 : i32
    %10 = tpu.dynamic_rotate %3 by %c2152_i32 dim 1 {stride = 1 : si32, stride_dimension = 0 : si32} : vector<8x2176xf32>, i32 -> vector<8x2176xf32>
    %11 = vector.extract_strided_slice %10 {offsets = [0, 0], sizes = [8, 2048], strides = [1, 1]} : vector<8x2176xf32> to vector<8x2048xf32>
    %c16 = arith.constant 16 : index
    %c0_5 = arith.constant 0 : index
    %12 = vector.load %arg11[%c16, %c0_5] : memref<64x2048xf32, #tpu.memory_space<vmem>>, vector<8x2048xf32>
    tpu.vector_store %arg11[%c16, %c0_5], %11 {strides = array<i32>} : memref<64x2048xf32, #tpu.memory_space<vmem>>, vector<8x2048xf32>,
    %c2144_i32 = arith.constant 2144 : i32
    %13 = tpu.dynamic_rotate %3 by %c2144_i32 dim 1 {stride = 1 : si32, stride_dimension = 0 : si32} : vector<8x2176xf32>, i32 -> vector<8x2176xf32>
    %14 = vector.extract_strided_slice %13 {offsets = [0, 0], sizes = [8, 2048], strides = [1, 1]} : vector<8x2176xf32> to vector<8x2048xf32>
    %c24 = arith.constant 24 : index
    %c0_6 = arith.constant 0 : index
    %15 = vector.load %arg11[%c24, %c0_6] : memref<64x2048xf32, #tpu.memory_space<vmem>>, vector<8x2048xf32>
    tpu.vector_store %arg11[%c24, %c0_6], %14 {strides = array<i32>} : memref<64x2048xf32, #tpu.memory_space<vmem>>, vector<8x2048xf32>,
    %c2136_i32 = arith.constant 2136 : i32
    %16 = tpu.dynamic_rotate %3 by %c2136_i32 dim 1 {stride = 1 : si32, stride_dimension = 0 : si32} : vector<8x2176xf32>, i32 -> vector<8x2176xf32>
    %17 = vector.extract_strided_slice %16 {offsets = [0, 0], sizes = [8, 2048], strides = [1, 1]} : vector<8x2176xf32> to vector<8x2048xf32>
    %c32 = arith.constant 32 : index
    %c0_7 = arith.constant 0 : index
    %18 = vector.load %arg11[%c32, %c0_7] : memref<64x2048xf32, #tpu.memory_space<vmem>>, vector<8x2048xf32>
    tpu.vector_store %arg11[%c32, %c0_7], %17 {strides = array<i32>} : memref<64x2048xf32, #tpu.memory_space<vmem>>, vector<8x2048xf32>,
    %c2128_i32 = arith.constant 2128 : i32
    %19 = tpu.dynamic_rotate %3 by %c2128_i32 dim 1 {stride = 1 : si32, stride_dimension = 0 : si32} : vector<8x2176xf32>, i32 -> vector<8x2176xf32>
    %20 = vector.extract_strided_slice %19 {offsets = [0, 0], sizes = [8, 2048], strides = [1, 1]} : vector<8x2176xf32> to vector<8x2048xf32>
    %c40 = arith.constant 40 : index
    %c0_8 = arith.constant 0 : index
    %21 = vector.load %arg11[%c40, %c0_8] : memref<64x2048xf32, #tpu.memory_space<vmem>>, vector<8x2048xf32>
    tpu.vector_store %arg11[%c40, %c0_8], %20 {strides = array<i32>} : memref<64x2048xf32, #tpu.memory_space<vmem>>, vector<8x2048xf32>,
    %c2120_i32 = arith.constant 2120 : i32
    %22 = tpu.dynamic_rotate %3 by %c2120_i32 dim 1 {stride = 1 : si32, stride_dimension = 0 : si32} : vector<8x2176xf32>, i32 -> vector<8x2176xf32>
    %23 = vector.extract_strided_slice %22 {offsets = [0, 0], sizes = [8, 2048], strides = [1, 1]} : vector<8x2176xf32> to vector<8x2048xf32>
    %c48 = arith.constant 48 : index
    %c0_9 = arith.constant 0 : index
    %24 = vector.load %arg11[%c48, %c0_9] : memref<64x2048xf32, #tpu.memory_space<vmem>>, vector<8x2048xf32>
    tpu.vector_store %arg11[%c48, %c0_9], %23 {strides = array<i32>} : memref<64x2048xf32, #tpu.memory_space<vmem>>, vector<8x2048xf32>,
    %c2112_i32 = arith.constant 2112 : i32
    %25 = tpu.dynamic_rotate %3 by %c2112_i32 dim 1 {stride = 1 : si32, stride_dimension = 0 : si32} : vector<8x2176xf32>, i32 -> vector<8x2176xf32>
    %26 = vector.extract_strided_slice %25 {offsets = [0, 0], sizes = [8, 2048], strides = [1, 1]} : vector<8x2176xf32> to vector<8x2048xf32>
    %c56 = arith.constant 56 : index
    %c0_10 = arith.constant 0 : index
    %27 = vector.load %arg11[%c56, %c0_10] : memref<64x2048xf32, #tpu.memory_space<vmem>>, vector<8x2048xf32>
    tpu.vector_store %arg11[%c56, %c0_10], %26 {strides = array<i32>} : memref<64x2048xf32, #tpu.memory_space<vmem>>, vector<8x2048xf32>,
    %c0_11 = arith.constant 0 : index
    %c0_12 = arith.constant 0 : index
    %28 = vector.load %arg2[%c0_11, %c0_12] : memref<16x64xf32, #tpu.memory_space<vmem>>, vector<16x64xf32>
    %c0_13 = arith.constant 0 : index
    %c0_14 = arith.constant 0 : index
    %29 = vector.load %arg11[%c0_13, %c0_14] : memref<64x2048xf32, #tpu.memory_space<vmem>>, vector<64x2048xf32>
    %cst = arith.constant dense<0.000000e+00> : vector<16x2048xf32>
    %30 = tpu.matmul %28, %29, %cst {dimension_numbers = #tpu.dot_dimension_numbers<[1], [0], [0], [1], [0, 0, 1, 1], [], []>} : vector<16x64xf32>, vector<64x2048xf32>, vector<16x2048xf32> -> vector<16x2048xf32>
    %31 = math.absf %30 : vector<16x2048xf32>
    %c0_15 = arith.constant 0 : index
    %c0_16 = arith.constant 0 : index
    %32 = vector.load %arg3[%c0_15, %c0_16] : memref<2048x64xf32, #tpu.memory_space<vmem>>, vector<2048x64xf32>
    %cst_17 = arith.constant dense<0.000000e+00> : vector<16x64xf32>
    %33 = tpu.matmul %31, %32, %cst_17 {dimension_numbers = #tpu.dot_dimension_numbers<[1], [0], [0], [1], [0, 0, 1, 1], [], []>} : vector<16x2048xf32>, vector<2048x64xf32>, vector<16x64xf32> -> vector<16x64xf32>
    %34 = vector.shape_cast %33 : vector<16x64xf32> to vector<1x16x64xf32>
    %cst_18 = arith.constant dense<0.000000e+00> : vector<1xf32>
    %35 = vector.multi_reduction <add>, %34, %cst_18 [1, 2] : vector<1x16x64xf32> to vector<1xf32>
    %36 = vector.shape_cast %35 : vector<1xf32> to vector<1x1x1xf32>
    %37 = vector.extract %36[0, 0, 0] : f32 from vector<1x1x1xf32>
    %38 = vector.broadcast %37 : f32 to vector<1x1xf32>
    %cst_19 = arith.constant 1.024000e+03 : f32
    %39 = vector.broadcast %cst_19 : f32 to vector<1x1xf32>
    %40 = arith.divf %38, %39 : vector<1x1xf32>
    %41 = vector.broadcast %40 : vector<1x1xf32> to vector<16x64xf32>
    %42 = arith.subf %33, %41 : vector<16x64xf32>
    %43 = arith.mulf %42, %42 : vector<16x64xf32>
    %44 = vector.shape_cast %43 : vector<16x64xf32> to vector<1x16x64xf32>
    %cst_20 = arith.constant dense<0.000000e+00> : vector<1xf32>
    %45 = vector.multi_reduction <add>, %44, %cst_20 [1, 2] : vector<1x16x64xf32> to vector<1xf32>
    %46 = vector.shape_cast %45 : vector<1xf32> to vector<1x1x1xf32>
    %47 = vector.extract %46[0, 0, 0] : f32 from vector<1x1x1xf32>
    %48 = vector.broadcast %47 : f32 to vector<1x1xf32>
    %cst_21 = arith.constant 1.023000e+03 : f32
    %49 = vector.broadcast %cst_21 : f32 to vector<1x1xf32>
    %50 = arith.divf %48, %49 : vector<1x1xf32>
    %cst_22 = arith.constant 9.99999993E-9 : f32
    %51 = vector.broadcast %cst_22 : f32 to vector<1x1xf32>
    %52 = arith.addf %50, %51 : vector<1x1xf32>
    %53 = math.rsqrt %52 : vector<1x1xf32>
    %54 = vector.broadcast %53 : vector<1x1xf32> to vector<16x64xf32>
    %55 = arith.mulf %42, %54 : vector<16x64xf32>
    %c0_23 = arith.constant 0 : index
    %c0_24 = arith.constant 0 : index
    %56 = vector.load %arg5[%c0_23, %c0_24] : memref<16x16xf32, #tpu.memory_space<vmem>>, vector<16x16xf32>
    %cst_25 = arith.constant dense<0.000000e+00> : vector<16x64xf32>
    %57 = tpu.matmul %56, %55, %cst_25 {dimension_numbers = #tpu.dot_dimension_numbers<[1], [0], [0], [1], [0, 0, 1, 1], [], []>} : vector<16x16xf32>, vector<16x64xf32>, vector<16x64xf32> -> vector<16x64xf32>
    %c0_26 = arith.constant 0 : index
    %c0_27 = arith.constant 0 : index
    %58 = vector.load %arg4[%c0_26, %c0_27] : memref<16x64xf32, #tpu.memory_space<vmem>>, vector<16x64xf32>
    %59 = arith.addf %57, %58 : vector<16x64xf32>
    %60 = tpu.iota {dimensions = array<i32: 1>} : vector<16x64xi32>
    %c1_i32 = arith.constant 1 : i32
    %61 = vector.broadcast %c1_i32 : i32 to vector<16x64xi32>
    %62 = arith.cmpi sge, %60, %61 : vector<16x64xi32>
    %c1_i32_28 = arith.constant 1 : i32
    %63 = tpu.dynamic_rotate %59 by %c1_i32_28 dim 1 : vector<16x64xf32>, i32 -> vector<16x64xf32>
    %cst_29 = arith.constant 0.000000e+00 : f32
    %64 = vector.broadcast %cst_29 : f32 to vector<16x64xf32>
    %65 = arith.select %62, %63, %64 : vector<16x64xi1>, vector<16x64xf32>
    %c63_i32 = arith.constant 63 : i32
    %66 = vector.broadcast %c63_i32 : i32 to vector<16x64xi32>
    %67 = arith.cmpi slt, %60, %66 : vector<16x64xi32>
    %c63_i32_30 = arith.constant 63 : i32
    %68 = tpu.dynamic_rotate %59 by %c63_i32_30 dim 1 : vector<16x64xf32>, i32 -> vector<16x64xf32>
    %cst_31 = arith.constant 0.000000e+00 : f32
    %69 = vector.broadcast %cst_31 : f32 to vector<16x64xf32>
    %70 = arith.select %67, %68, %69 : vector<16x64xi1>, vector<16x64xf32>
    %71 = tpu.concatenate %65, %59, %70 in 0 : vector<16x64xf32>, vector<16x64xf32>, vector<16x64xf32> -> vector<48x64xf32>
    %c0_32 = arith.constant 0 : index
    %c0_33 = arith.constant 0 : index
    %c0_34 = arith.constant 0 : index
    %72 = vector.load %arg6[%c0_32, %c0_33, %c0_34] : memref<5x16x48xf32, #tpu.memory_space<vmem>>, vector<1x16x48xf32>
    %73 = vector.shape_cast %72 : vector<1x16x48xf32> to vector<16x48xf32>
    %cst_35 = arith.constant dense<0.000000e+00> : vector<16x64xf32>
    %74 = tpu.matmul %73, %71, %cst_35 {dimension_numbers = #tpu.dot_dimension_numbers<[1], [0], [0], [1], [0, 0, 1, 1], [], []>} : vector<16x48xf32>, vector<48x64xf32>, vector<16x64xf32> -> vector<16x64xf32>
    %c0_36 = arith.constant 0 : index
    %c0_37 = arith.constant 0 : index
    %75 = vector.load %arg7[%c0_36, %c0_37] : memref<16x5xf32, #tpu.memory_space<vmem>>, vector<16x1xf32>
    %76 = vector.broadcast %75 : vector<16x1xf32> to vector<16x64xf32>
    %77 = arith.addf %74, %76 : vector<16x64xf32>
    %78 = arith.addf %77, %59 : vector<16x64xf32>
    %cst_38 = arith.constant 0.000000e+00 : f32
    %79 = vector.broadcast %cst_38 : f32 to vector<16x64xf32>
    %80 = arith.cmpf ogt, %78, %79 : vector<16x64xf32>
    %cst_39 = arith.constant 2.000000e-01 : f32
    %81 = vector.broadcast %cst_39 : f32 to vector<16x64xf32>
    %82 = arith.mulf %81, %78 : vector<16x64xf32>
    %83 = arith.select %80, %78, %82 : vector<16x64xi1>, vector<16x64xf32>
    %c3_i32 = arith.constant 3 : i32
    %84 = vector.broadcast %c3_i32 : i32 to vector<16x64xi32>
    %85 = arith.cmpi sge, %60, %84 : vector<16x64xi32>
    %c3_i32_40 = arith.constant 3 : i32
    %86 = tpu.dynamic_rotate %83 by %c3_i32_40 dim 1 : vector<16x64xf32>, i32 -> vector<16x64xf32>
    %cst_41 = arith.constant 0.000000e+00 : f32
    %87 = vector.broadcast %cst_41 : f32 to vector<16x64xf32>
    %88 = arith.select %85, %86, %87 : vector<16x64xi1>, vector<16x64xf32>
    %c61_i32 = arith.constant 61 : i32
    %89 = vector.broadcast %c61_i32 : i32 to vector<16x64xi32>
    %90 = arith.cmpi slt, %60, %89 : vector<16x64xi32>
    %c61_i32_42 = arith.constant 61 : i32
    %91 = tpu.dynamic_rotate %83 by %c61_i32_42 dim 1 : vector<16x64xf32>, i32 -> vector<16x64xf32>
    %cst_43 = arith.constant 0.000000e+00 : f32
    %92 = vector.broadcast %cst_43 : f32 to vector<16x64xf32>
    %93 = arith.select %90, %91, %92 : vector<16x64xi1>, vector<16x64xf32>
    %94 = tpu.concatenate %88, %83, %93 in 0 : vector<16x64xf32>, vector<16x64xf32>, vector<16x64xf32> -> vector<48x64xf32>
    %c1 = arith.constant 1 : index
    %c0_44 = arith.constant 0 : index
    %c0_45 = arith.constant 0 : index
    %95 = vector.load %arg6[%c1, %c0_44, %c0_45] : memref<5x16x48xf32, #tpu.memory_space<vmem>>, vector<1x16x48xf32>
    %96 = vector.shape_cast %95 : vector<1x16x48xf32> to vector<16x48xf32>
    %cst_46 = arith.constant dense<0.000000e+00> : vector<16x64xf32>
    %97 = tpu.matmul %96, %94, %cst_46 {dimension_numbers = #tpu.dot_dimension_numbers<[1], [0], [0], [1], [0, 0, 1, 1], [], []>} : vector<16x48xf32>, vector<48x64xf32>, vector<16x64xf32> -> vector<16x64xf32>
    %c0_47 = arith.constant 0 : index
    %c1_48 = arith.constant 1 : index
    %98 = vector.load %arg7[%c0_47, %c1_48] : memref<16x5xf32, #tpu.memory_space<vmem>>, vector<16x1xf32>
    %99 = vector.broadcast %98 : vector<16x1xf32> to vector<16x64xf32>
    %100 = arith.addf %97, %99 : vector<16x64xf32>
    %101 = arith.addf %100, %83 : vector<16x64xf32>
    %cst_49 = arith.constant 0.000000e+00 : f32
    %102 = vector.broadcast %cst_49 : f32 to vector<16x64xf32>
    %103 = arith.cmpf ogt, %101, %102 : vector<16x64xf32>
    %cst_50 = arith.constant 2.000000e-01 : f32
    %104 = vector.broadcast %cst_50 : f32 to vector<16x64xf32>
    %105 = arith.mulf %104, %101 : vector<16x64xf32>
    %106 = arith.select %103, %101, %105 : vector<16x64xi1>, vector<16x64xf32>
    %c9_i32 = arith.constant 9 : i32
    %107 = vector.broadcast %c9_i32 : i32 to vector<16x64xi32>
    %108 = arith.cmpi sge, %60, %107 : vector<16x64xi32>
    %c9_i32_51 = arith.constant 9 : i32
    %109 = tpu.dynamic_rotate %106 by %c9_i32_51 dim 1 : vector<16x64xf32>, i32 -> vector<16x64xf32>
    %cst_52 = arith.constant 0.000000e+00 : f32
    %110 = vector.broadcast %cst_52 : f32 to vector<16x64xf32>
    %111 = arith.select %108, %109, %110 : vector<16x64xi1>, vector<16x64xf32>
    %c55_i32 = arith.constant 55 : i32
    %112 = vector.broadcast %c55_i32 : i32 to vector<16x64xi32>
    %113 = arith.cmpi slt, %60, %112 : vector<16x64xi32>
    %c55_i32_53 = arith.constant 55 : i32
    %114 = tpu.dynamic_rotate %106 by %c55_i32_53 dim 1 : vector<16x64xf32>, i32 -> vector<16x64xf32>
    %cst_54 = arith.constant 0.000000e+00 : f32
    %115 = vector.broadcast %cst_54 : f32 to vector<16x64xf32>
    %116 = arith.select %113, %114, %115 : vector<16x64xi1>, vector<16x64xf32>
    %117 = tpu.concatenate %111, %106, %116 in 0 : vector<16x64xf32>, vector<16x64xf32>, vector<16x64xf32> -> vector<48x64xf32>
    %c2 = arith.constant 2 : index
    %c0_55 = arith.constant 0 : index
    %c0_56 = arith.constant 0 : index
    %118 = vector.load %arg6[%c2, %c0_55, %c0_56] : memref<5x16x48xf32, #tpu.memory_space<vmem>>, vector<1x16x48xf32>
    %119 = vector.shape_cast %118 : vector<1x16x48xf32> to vector<16x48xf32>
    %cst_57 = arith.constant dense<0.000000e+00> : vector<16x64xf32>
    %120 = tpu.matmul %119, %117, %cst_57 {dimension_numbers = #tpu.dot_dimension_numbers<[1], [0], [0], [1], [0, 0, 1, 1], [], []>} : vector<16x48xf32>, vector<48x64xf32>, vector<16x64xf32> -> vector<16x64xf32>
    %c0_58 = arith.constant 0 : index
    %c2_59 = arith.constant 2 : index
    %121 = vector.load %arg7[%c0_58, %c2_59] : memref<16x5xf32, #tpu.memory_space<vmem>>, vector<16x1xf32>
    %122 = vector.broadcast %121 : vector<16x1xf32> to vector<16x64xf32>
    %123 = arith.addf %120, %122 : vector<16x64xf32>
    %124 = arith.addf %123, %106 : vector<16x64xf32>
    %cst_60 = arith.constant 0.000000e+00 : f32
    %125 = vector.broadcast %cst_60 : f32 to vector<16x64xf32>
    %126 = arith.cmpf ogt, %124, %125 : vector<16x64xf32>
    %cst_61 = arith.constant 2.000000e-01 : f32
    %127 = vector.broadcast %cst_61 : f32 to vector<16x64xf32>
    %128 = arith.mulf %127, %124 : vector<16x64xf32>
    %129 = arith.select %126, %124, %128 : vector<16x64xi1>, vector<16x64xf32>
    %c27_i32 = arith.constant 27 : i32
    %130 = vector.broadcast %c27_i32 : i32 to vector<16x64xi32>
    %131 = arith.cmpi sge, %60, %130 : vector<16x64xi32>
    %c27_i32_62 = arith.constant 27 : i32
    %132 = tpu.dynamic_rotate %129 by %c27_i32_62 dim 1 : vector<16x64xf32>, i32 -> vector<16x64xf32>
    %cst_63 = arith.constant 0.000000e+00 : f32
    %133 = vector.broadcast %cst_63 : f32 to vector<16x64xf32>
    %134 = arith.select %131, %132, %133 : vector<16x64xi1>, vector<16x64xf32>
    %c37_i32 = arith.constant 37 : i32
    %135 = vector.broadcast %c37_i32 : i32 to vector<16x64xi32>
    %136 = arith.cmpi slt, %60, %135 : vector<16x64xi32>
    %c37_i32_64 = arith.constant 37 : i32
    %137 = tpu.dynamic_rotate %129 by %c37_i32_64 dim 1 : vector<16x64xf32>, i32 -> vector<16x64xf32>
    %cst_65 = arith.constant 0.000000e+00 : f32
    %138 = vector.broadcast %cst_65 : f32 to vector<16x64xf32>
    %139 = arith.select %136, %137, %138 : vector<16x64xi1>, vector<16x64xf32>
    %140 = tpu.concatenate %134, %129, %139 in 0 : vector<16x64xf32>, vector<16x64xf32>, vector<16x64xf32> -> vector<48x64xf32>
    %c3 = arith.constant 3 : index
    %c0_66 = arith.constant 0 : index
    %c0_67 = arith.constant 0 : index
    %141 = vector.load %arg6[%c3, %c0_66, %c0_67] : memref<5x16x48xf32, #tpu.memory_space<vmem>>, vector<1x16x48xf32>
    %142 = vector.shape_cast %141 : vector<1x16x48xf32> to vector<16x48xf32>
    %cst_68 = arith.constant dense<0.000000e+00> : vector<16x64xf32>
    %143 = tpu.matmul %142, %140, %cst_68 {dimension_numbers = #tpu.dot_dimension_numbers<[1], [0], [0], [1], [0, 0, 1, 1], [], []>} : vector<16x48xf32>, vector<48x64xf32>, vector<16x64xf32> -> vector<16x64xf32>
    %c0_69 = arith.constant 0 : index
    %c3_70 = arith.constant 3 : index
    %144 = vector.load %arg7[%c0_69, %c3_70] : memref<16x5xf32, #tpu.memory_space<vmem>>, vector<16x1xf32>
    %145 = vector.broadcast %144 : vector<16x1xf32> to vector<16x64xf32>
    %146 = arith.addf %143, %145 : vector<16x64xf32>
    %147 = arith.addf %146, %129 : vector<16x64xf32>
    %cst_71 = arith.constant 0.000000e+00 : f32
    %148 = vector.broadcast %cst_71 : f32 to vector<16x64xf32>
    %149 = arith.cmpf ogt, %147, %148 : vector<16x64xf32>
    %cst_72 = arith.constant 2.000000e-01 : f32
    %150 = vector.broadcast %cst_72 : f32 to vector<16x64xf32>
    %151 = arith.mulf %150, %147 : vector<16x64xf32>
    %152 = arith.select %149, %147, %151 : vector<16x64xi1>, vector<16x64xf32>
    %c1_i32_73 = arith.constant 1 : i32
    %153 = vector.broadcast %c1_i32_73 : i32 to vector<16x64xi32>
    %154 = arith.cmpi sge, %60, %153 : vector<16x64xi32>
    %c1_i32_74 = arith.constant 1 : i32
    %155 = tpu.dynamic_rotate %152 by %c1_i32_74 dim 1 : vector<16x64xf32>, i32 -> vector<16x64xf32>
    %cst_75 = arith.constant 0.000000e+00 : f32
    %156 = vector.broadcast %cst_75 : f32 to vector<16x64xf32>
    %157 = arith.select %154, %155, %156 : vector<16x64xi1>, vector<16x64xf32>
    %c63_i32_76 = arith.constant 63 : i32
    %158 = vector.broadcast %c63_i32_76 : i32 to vector<16x64xi32>
    %159 = arith.cmpi slt, %60, %158 : vector<16x64xi32>
    %c63_i32_77 = arith.constant 63 : i32
    %160 = tpu.dynamic_rotate %152 by %c63_i32_77 dim 1 : vector<16x64xf32>, i32 -> vector<16x64xf32>
    %cst_78 = arith.constant 0.000000e+00 : f32
    %161 = vector.broadcast %cst_78 : f32 to vector<16x64xf32>
    %162 = arith.select %159, %160, %161 : vector<16x64xi1>, vector<16x64xf32>
    %163 = tpu.concatenate %157, %152, %162 in 0 : vector<16x64xf32>, vector<16x64xf32>, vector<16x64xf32> -> vector<48x64xf32>
    %c4 = arith.constant 4 : index
    %c0_79 = arith.constant 0 : index
    %c0_80 = arith.constant 0 : index
    %164 = vector.load %arg6[%c4, %c0_79, %c0_80] : memref<5x16x48xf32, #tpu.memory_space<vmem>>, vector<1x16x48xf32>
    %165 = vector.shape_cast %164 : vector<1x16x48xf32> to vector<16x48xf32>
    %cst_81 = arith.constant dense<0.000000e+00> : vector<16x64xf32>
    %166 = tpu.matmul %165, %163, %cst_81 {dimension_numbers = #tpu.dot_dimension_numbers<[1], [0], [0], [1], [0, 0, 1, 1], [], []>} : vector<16x48xf32>, vector<48x64xf32>, vector<16x64xf32> -> vector<16x64xf32>
    %c0_82 = arith.constant 0 : index
    %c4_83 = arith.constant 4 : index
    %167 = vector.load %arg7[%c0_82, %c4_83] : memref<16x5xf32, #tpu.memory_space<vmem>>, vector<16x1xf32>
    %168 = vector.broadcast %167 : vector<16x1xf32> to vector<16x64xf32>
    %169 = arith.addf %166, %168 : vector<16x64xf32>
    %170 = arith.addf %169, %152 : vector<16x64xf32>
    %cst_84 = arith.constant 0.000000e+00 : f32
    %171 = vector.broadcast %cst_84 : f32 to vector<16x64xf32>
    %172 = arith.cmpf ogt, %170, %171 : vector<16x64xf32>
    %cst_85 = arith.constant 2.000000e-01 : f32
    %173 = vector.broadcast %cst_85 : f32 to vector<16x64xf32>
    %174 = arith.mulf %173, %170 : vector<16x64xf32>
    %175 = arith.select %172, %170, %174 : vector<16x64xi1>, vector<16x64xf32>
    %c0_86 = arith.constant 0 : index
    %c0_87 = arith.constant 0 : index
    %c0_88 = arith.constant 0 : index
    %176 = vector.load %arg9[%c0_86, %c0_87, %c0_88] : memref<1x16x64xf32, #tpu.memory_space<vmem>>, vector<1x16x64xf32>
    %177 = vector.shape_cast %176 : vector<1x16x64xf32> to vector<16x64xf32>
    %178 = vector.shape_cast %175 : vector<16x64xf32> to vector<1x16x64xf32>
    tpu.vector_store %arg9[%c0_86, %c0_87, %c0_88], %178 {strides = array<i32>} : memref<1x16x64xf32, #tpu.memory_space<vmem>>, vector<1x16x64xf32>,
    %c0_89 = arith.constant 0 : index
    %c0_90 = arith.constant 0 : index
    %179 = vector.load %arg8[%c0_89, %c0_90] : memref<1x16xf32, #tpu.memory_space<vmem>>, vector<1x16xf32>
    %cst_91 = arith.constant dense<0.000000e+00> : vector<1x64xf32>
    %180 = tpu.matmul %179, %175, %cst_91 {dimension_numbers = #tpu.dot_dimension_numbers<[1], [0], [0], [1], [0, 0, 1, 1], [], []>} : vector<1x16xf32>, vector<16x64xf32>, vector<1x64xf32> -> vector<1x64xf32>
    %cst_92 = arith.constant dense<0xFF800000> : vector<1xf32>
    %181 = vector.multi_reduction <maximumf>, %180, %cst_92 [1] : vector<1x64xf32> to vector<1xf32>
    %182 = vector.shape_cast %181 : vector<1xf32> to vector<1x1xf32>
    %183 = vector.broadcast %182 : vector<1x1xf32> to vector<1x64xf32>
    %184 = arith.subf %180, %183 : vector<1x64xf32>
    %185 = math.exp %184 : vector<1x64xf32>
    %cst_93 = arith.constant dense<0.000000e+00> : vector<1xf32>
    %186 = vector.multi_reduction <add>, %185, %cst_93 [1] : vector<1x64xf32> to vector<1xf32>
    %187 = vector.shape_cast %186 : vector<1xf32> to vector<1x1xf32>
    %188 = vector.broadcast %187 : vector<1x1xf32> to vector<1x64xf32>
    %189 = arith.divf %185, %188 : vector<1x64xf32>
    %c0_94 = arith.constant 0 : index
    %c0_95 = arith.constant 0 : index
    %c0_96 = arith.constant 0 : index
    %190 = vector.load %arg10[%c0_94, %c0_95, %c0_96] : memref<1x1x64xf32, #tpu.memory_space<vmem>>, vector<1x1x64xf32>
    %191 = vector.shape_cast %190 : vector<1x1x64xf32> to vector<1x64xf32>
    %192 = vector.shape_cast %189 : vector<1x64xf32> to vector<1x1x64xf32>
    tpu.vector_store %arg10[%c0_94, %c0_95, %c0_96], %192 {strides = array<i32>} : memref<1x1x64xf32, #tpu.memory_space<vmem>>, vector<1x1x64xf32>,
    return
  }
  func.func @transform_0(%arg0: i32) -> (i32, i32, i32) {
    %c0_i32 = arith.constant 0 : i32
    %c0_i32_0 = arith.constant 0 : i32
    %c0_i32_1 = arith.constant 0 : i32
    return %arg0, %c0_i32, %c0_i32_0 : i32, i32, i32
  }
  func.func @transform_1(%arg0: i32) -> (i32, i32) {
    %c0_i32 = arith.constant 0 : i32
    %c0_i32_0 = arith.constant 0 : i32
    %c0_i32_1 = arith.constant 0 : i32
    return %c0_i32, %c0_i32_0 : i32, i32
  }
  func.func @transform_2(%arg0: i32) -> (i32, i32) {
    %c0_i32 = arith.constant 0 : i32
    %c0_i32_0 = arith.constant 0 : i32
    %c0_i32_1 = arith.constant 0 : i32
    return %c0_i32, %c0_i32_0 : i32, i32
  }
  func.func @transform_3(%arg0: i32) -> (i32, i32) {
    %c0_i32 = arith.constant 0 : i32
    %c0_i32_0 = arith.constant 0 : i32
    %c0_i32_1 = arith.constant 0 : i32
    return %c0_i32, %c0_i32_0 : i32, i32
  }
  func.func @transform_4(%arg0: i32) -> (i32, i32) {
    %c0_i32 = arith.constant 0 : i32
    %c0_i32_0 = arith.constant 0 : i32
    %c0_i32_1 = arith.constant 0 : i32
    return %c0_i32, %c0_i32_0 : i32, i32
  }
  func.func @transform_5(%arg0: i32) -> (i32, i32, i32) {
    %c0_i32 = arith.constant 0 : i32
    %c0_i32_0 = arith.constant 0 : i32
    %c0_i32_1 = arith.constant 0 : i32
    %c0_i32_2 = arith.constant 0 : i32
    return %c0_i32, %c0_i32_0, %c0_i32_1 : i32, i32, i32
  }
  func.func @transform_6(%arg0: i32) -> (i32, i32) {
    %c0_i32 = arith.constant 0 : i32
    %c0_i32_0 = arith.constant 0 : i32
    %c0_i32_1 = arith.constant 0 : i32
    return %c0_i32, %c0_i32_0 : i32, i32
  }
  func.func @transform_7(%arg0: i32) -> (i32, i32) {
    %c0_i32 = arith.constant 0 : i32
    %c0_i32_0 = arith.constant 0 : i32
    %c0_i32_1 = arith.constant 0 : i32
    return %c0_i32, %c0_i32_0 : i32, i32
  }
  func.func @transform_8(%arg0: i32) -> (i32, i32, i32) {
    %c0_i32 = arith.constant 0 : i32
    %c0_i32_0 = arith.constant 0 : i32
    %c0_i32_1 = arith.constant 0 : i32
    return %arg0, %c0_i32, %c0_i32_0 : i32, i32, i32
  }
  func.func @transform_9(%arg0: i32) -> (i32, i32, i32) {
    %c0_i32 = arith.constant 0 : i32
    %c0_i32_0 = arith.constant 0 : i32
    %c0_i32_1 = arith.constant 0 : i32
    return %arg0, %c0_i32, %c0_i32_0 : i32, i32, i32
  }
}

</mosaic_0001>

<bundles_post_ra>
// kernel: summarizer_forward.1
= control target key start
LH: loop header
LB: loop body
LE: loop exit
PB: predicated region body
PF: predicated region fallthrough
CT: control target
= control target key end

     0   :  { %s4490_s30 = smov 0   ;;  %s6236_s0 = inlined_call_operand.vmem [shape: f32[2,1,2176], index: 0, kind: input, shape index: {}]   ;;  %s6237_s1 = inlined_call_operand.vmem [shape: f32[16,64], index: 1, kind: input, shape index: {}]   ;;  %s6238_s2 = inlined_call_operand.vmem [shape: f32[2048,64], index: 2, kind: input, shape index: {}]   ;;  %s6239_s3 = inlined_call_operand.vmem [shape: f32[16,64], index: 3, kind: input, shape index: {}]   ;;  %s6240_s4 = inlined_call_operand.vmem [shape: f32[16,16], index: 4, kind: input, shape index: {}]   ;;  %s6241_s5 = inlined_call_operand.vmem [shape: f32[5,16,48], index: 5, kind: input, shape index: {}]   ;;  %s6242_s6 = inlined_call_operand.vmem [shape: f32[16,5], index: 6, kind: input, shape index: {}]   ;;  %s6243_s7 = inlined_call_operand.vmem [shape: f32[1,16], index: 7, kind: input, shape index: {}]   ;;  %s6244_s8 = inlined_call_operand.vmem [shape: f32[2,16,64], index: 8, kind: output, shape index: {0}]   ;;  %s6245_s9 = inlined_call_operand.vmem [shape: f32[2,1,64], index: 9, kind: output, shape index: {1}]  }
   0x1 LB: > { %s3847_s10 = sadd.s32 4294967295, %s4414_s30   ;;  %p3851_p0 = scmp.ge.s32.totalorder %s4414_s30, 1  ;;  %s4414_s30 = sphi %s4490_s30, %s20_s30  }
   0x2   : > { %p289_p1 = scmp.lt.s32.totalorder %s4414_s30, 3 }
   0x4   : > { %p290_p2 = pnand %p3851_p0, %p289_p1 }
   0x5   : > { %p327_p3 = scmp.lt.s32.totalorder (!%p290_p2), %s3847_s10, 1  ;;  %s4416_s15 = smov (!%p290_p2), 320  }
   0x6   : > { %293 = sbr.rel (%p290_p2) target bundleno = 4748 (0x128c), region = 52  ;;  %s4417_s16 = smov (!%p290_p2), 328  }
   0x7   : > { %s4418_s17 = smov (!%p290_p2), 336   ;;  %s4419_s18 = smov (!%p290_p2), 344  }
   0x8   : > { %s4420_s19 = smov (!%p290_p2), 352   ;;  %s4421_s20 = smov (!%p290_p2), 360  }
   0x9   : > { %s4422_s21 = smov (!%p290_p2), 368   ;;  %s4423_s22 = smov (!%p290_p2), 376  }
   0xa   : > { %s4431_s12 = smov (!%p290_p2), 67   ;;  %s4437_s27 = smov (!%p290_p2), 91  }
   0xb   : > { %v345_v0 = vlaneseq  ;;  %s6263_s10 = smov (!%p327_p3, %s3847_s10), 1  ;;  %v4424_v13 = vmov 0.0   ;;  %vm1380_vm8 = vcmask 523264   ;;  %vm2933_vm9 = vcmask 130048  }
   0xc   : > { %s4355_s11 = smul.u32 17, %s6263_s10  ;;  %1451 = vmatprep.mubr.f32.mxu0 %v4424_v13  ;;  %1528 = vmatprep.mubr.f32.mxu1 %v4424_v13  ;;  %vm3016_vm10 = vcmask 1048064   ;;  %vm3062_vm11 = vcmask 392192   ;;  %s338_s23 = scalar_lea.vmem %s6245_s9, %s6263_s10 }
   0xd   : > { %v4501_v1 = vshrl.u32 %v345_v0, 7  ;;  %v4630_v22 = vand.u32 127, %v345_v0 }
   0xe   : > { %s4509_s14 = scalar_lea.vmem %s6236_s0, %s4355_s11  ;;  %s4429_s11 = smov 125  }
   0xf   : > { %v351_v2 = vsub.s32 1, %v4501_v1  ;;  %v347_v3 = vsub.s32 0, %v4501_v1  ;;  %v355_v4 = vsub.s32 2, %v4501_v1  ;;  %v4513_v5 = vld [vmem:[%s4509_s14] sm:$0xff]  ;;  %v359_v9 = vsub.s32 3, %v4501_v1  ;;  %v4589_v19 = vld [vmem:[%s4509_s14 + $0x8] sm:$0xff] }
  0x10   : > { %v363_v11 = vsub.s32 4, %v4501_v1  ;;  %v367_v14 = vsub.s32 5, %v4501_v1  ;;  %v371_v15 = vsub.s32 6, %v4501_v1  ;;  %v375_v18 = vsub.s32 7, %v4501_v1 }
  0x11   : > { %v352_v6 = vrot.slane %v4513_v5, %v351_v2  ;;  %v348_v7 = vrot.slane %v4513_v5, %v347_v3  ;;  %v356_v8 = vrot.slane %v4513_v5, %v355_v4  ;;  %v360_v10 = vrot.slane %v4513_v5, %v359_v9 }
  0x12   : > { %v364_v12 = vrot.slane %v4513_v5, %v363_v11  ;;  %v4579_v16 = vrot.slane %v4513_v5, %v367_v14  ;;  %v372_v17 = vrot.slane %v4513_v5, %v371_v15  ;;  %v4597_v20 = vrot.slane %v4513_v5, %v375_v18 }
  0x13   : > { %1154 = vrot.lane.b32.xlu0 %v352_v6, %s4416_s15  ;;  %1150 = vrot.lane.b32.xlu1 %v348_v7, %s4416_s15  ;;  %v4602_v21 = vrot.slane %v4589_v19, %v347_v3  ;;  %v1216_v23 = vadd.s32 64, %v4501_v1  ;;  %v1114_v26 = vadd.s32 72, %v4501_v1  ;;  %v1012_v36 = vadd.s32 80, %v4501_v1 }
  0x14   : > { %v910_v50 = vadd.s32 88, %v4501_v1  ;;  %v4703_v54 = vrot.slane %v4589_v19, %v351_v2  ;;  %v4715_v56 = vrot.slane %v4589_v19, %v355_v4  ;;  %v808_v60 = vadd.s32 96, %v4501_v1 }
  0x15   : > { %vm4638_vm0 = vcmp.lt.s32.totalorder %v4630_v22, %v1216_v23  ;;  %vm4649_vm1 = vcmp.lt.s32.totalorder %v4630_v22, %v1114_v26  ;;  %vm4671_vm2 = vcmp.lt.s32.totalorder %v4630_v22, %v1012_v36  ;;  %v4736_v2 = vrot.slane %v4589_v19, %v359_v9  ;;  %v2050_v23 = vld [vmem:[%s6238_s2 + $0x78] sm:$0xff] }
  0x16   : > { %vm4706_vm3 = vcmp.lt.s32.totalorder %v4630_v22, %v910_v50  ;;  %vm4739_vm4 = vcmp.lt.s32.totalorder %v4630_v22, %v808_v60  ;;  %v4750_v5 = vrot.slane %v4589_v19, %v363_v11  ;;  %v2097_v50 = vld [vmem:[%s6238_s2 + $0x1f0] sm:$0xff]  ;;  %vm3039_vm12 = vcmp.lt.s32.totalorder %v4630_v22, 63 }
  0x17   : > { %1158 = vrot.lane.b32.xlu0 %v356_v8, %s4416_s15  ;;  %1052 = vrot.lane.b32.xlu1 %v352_v6, %s4417_s16  ;;  %vm3015_vm13 = vcmp.ge.s32.totalorder %v4630_v22, 1 }
  0x1b   : > { %1056 = vrot.lane.b32.xlu0 %v356_v8, %s4417_s16  ;;  %1162 = vrot.lane.b32.xlu1 %v360_v10, %s4416_s15 }
  0x1f   : > { %1166 = vrot.lane.b32.xlu0 %v364_v12, %s4416_s15  ;;  %1048 = vrot.lane.b32.xlu1 %v348_v7, %s4417_s16 }
  0x23   : > { %950 = vrot.lane.b32.xlu0 %v352_v6, %s4418_s17  ;;  %954 = vrot.lane.b32.xlu1 %v356_v8, %s4418_s17 }
  0x27   : > { %1060 = vrot.lane.b32.xlu0 %v360_v10, %s4417_s16  ;;  %1064 = vrot.lane.b32.xlu1 %v364_v12, %s4417_s16 }
  0x2b   : > { %946 = vrot.lane.b32.xlu0 %v348_v7, %s4418_s17  ;;  %848 = vrot.lane.b32.xlu1 %v352_v6, %s4419_s18 }
  0x2f   : > { %852 = vrot.lane.b32.xlu0 %v356_v8, %s4419_s18  ;;  %958 = vrot.lane.b32.xlu1 %v360_v10, %s4418_s17 }
  0x33   : > { %962 = vrot.lane.b32.xlu0 %v364_v12, %s4418_s17  ;;  %844 = vrot.lane.b32.xlu1 %v348_v7, %s4419_s18 }
  0x37   : > { %746 = vrot.lane.b32.xlu0 %v352_v6, %s4420_s19  ;;  %750 = vrot.lane.b32.xlu1 %v356_v8, %s4420_s19 }
  0x3b   : > { %856 = vrot.lane.b32.xlu0 %v360_v10, %s4419_s18  ;;  %860 = vrot.lane.b32.xlu1 %v364_v12, %s4419_s18 }
  0x3f   : > { %742 = vrot.lane.b32.xlu0 %v348_v7, %s4420_s19  ;;  %644 = vrot.lane.b32.xlu1 %v352_v6, %s4421_s20 }
  0x43   : > { %648 = vrot.lane.b32.xlu0 %v356_v8, %s4421_s20  ;;  %754 = vrot.lane.b32.xlu1 %v360_v10, %s4420_s19 }
  0x47   : > { %758 = vrot.lane.b32.xlu0 %v364_v12, %s4420_s19  ;;  %640 = vrot.lane.b32.xlu1 %v348_v7, %s4421_s20 }
  0x4b   : > { %542 = vrot.lane.b32.xlu0 %v352_v6, %s4422_s21  ;;  %546 = vrot.lane.b32.xlu1 %v356_v8, %s4422_s21 }
  0x4f   : > { %652 = vrot.lane.b32.xlu0 %v360_v10, %s4421_s20  ;;  %656 = vrot.lane.b32.xlu1 %v364_v12, %s4421_s20 }
  0x53   : > { %538 = vrot.lane.b32.xlu0 %v348_v7, %s4422_s21  ;;  %436 = vrot.lane.b32.xlu1 %v352_v6, %s4423_s22 }
  0x57   : > { %440 = vrot.lane.b32.xlu0 %v356_v8, %s4423_s22  ;;  %550 = vrot.lane.b32.xlu1 %v360_v10, %s4422_s21 }
  0x5b   : > { %554 = vrot.lane.b32.xlu0 %v364_v12, %s4422_s21  ;;  %432 = vrot.lane.b32.xlu1 %v348_v7, %s4423_s22 }
  0x5f   : > { %444 = vrot.lane.b32.xlu0 %v360_v10, %s4423_s22  ;;  %448 = vrot.lane.b32.xlu1 %v364_v12, %s4423_s22 }
  0x63   : > { %1170 = vrot.lane.b32.xlu0 %v4579_v16, %s4416_s15  ;;  %1174 = vrot.lane.b32.xlu1 %v372_v17, %s4416_s15 }
  0x67   : > { %1068 = vrot.lane.b32.xlu0 %v4579_v16, %s4417_s16  ;;  %1072 = vrot.lane.b32.xlu1 %v372_v17, %s4417_s16 }
  0x6b   : > { %1178 = vrot.lane.b32.xlu0 %v4597_v20, %s4416_s15  ;;  %1182 = vrot.lane.b32.xlu1 %v4602_v21, %s4416_s15 }
  0x6f   : > { %966 = vrot.lane.b32.xlu0 %v4579_v16, %s4418_s17  ;;  %970 = vrot.lane.b32.xlu1 %v372_v17, %s4418_s17 }
  0x73   : > { %1076 = vrot.lane.b32.xlu0 %v4597_v20, %s4417_s16  ;;  %1080 = vrot.lane.b32.xlu1 %v4602_v21, %s4417_s16 }
  0x77   : > { %864 = vrot.lane.b32.xlu0 %v4579_v16, %s4419_s18  ;;  %868 = vrot.lane.b32.xlu1 %v372_v17, %s4419_s18 }
  0x7b   : > { %974 = vrot.lane.b32.xlu0 %v4597_v20, %s4418_s17  ;;  %978 = vrot.lane.b32.xlu1 %v4602_v21, %s4418_s17 }
  0x7f   : > { %762 = vrot.lane.b32.xlu0 %v4579_v16, %s4420_s19  ;;  %766 = vrot.lane.b32.xlu1 %v372_v17, %s4420_s19 }
  0x83   : > { %872 = vrot.lane.b32.xlu0 %v4597_v20, %s4419_s18  ;;  %876 = vrot.lane.b32.xlu1 %v4602_v21, %s4419_s18 }
  0x85   : > { %v1155_v24 = vpop.permute.xlu0 %1154  ;;  %v1151_v25 = vpop.permute.xlu1 %1150 }
  0x86   : > { %v1233_v31 = vsel %vm4638_vm0, %v1151_v25, %v1155_v24 }
  0x87   : > { %660 = vrot.lane.b32.xlu0 %v4579_v16, %s4421_s20  ;;  %664 = vrot.lane.b32.xlu1 %v372_v17, %s4421_s20 }
  0x89   : > { %v1159_v28 = vpop.permute.xlu0 %1158  ;;  %v1053_v29 = vpop.permute.xlu1 %1052 }
  0x8a   : > { %v1232_v30 = vsel %vm4638_vm0, %v1155_v24, %v1159_v28 }
  0x8b   : > { %1403 = vmatprep.subr.mxu0 %v1232_v30  ;;  %770 = vrot.lane.b32.xlu0 %v4597_v20, %s4420_s19 }
  0x8c   : > { %774 = vrot.lane.b32.xlu1 %v4602_v21, %s4420_s19  ;;  %1404 = vmatpush1.msra.mxu0 %v1233_v31 }
  0x8d   : > { %v1057_v33 = vpop.permute.xlu0 %1056  ;;  %v1163_v34 = vpop.permute.xlu1 %1162 }
  0x8e   : > { %v1130_v35 = vsel %vm4649_vm1, %v1053_v29, %v1057_v33  ;;  %v1231_v42 = vsel %vm4638_vm0, %v1159_v28, %v1163_v34  ;;  %v604_v28 = vadd.s32 112, %v4501_v1 }
  0x8f   : > { %558 = vrot.lane.b32.xlu0 %v4579_v16, %s4422_s21  ;;  %1405 = vmatprep.subr.mxu0 %v1130_v35 }
  0x90   : > { %562 = vrot.lane.b32.xlu1 %v372_v17, %s4422_s21  ;;  %vm4798_vm6 = vcmp.lt.s32.totalorder %v4630_v22, %v604_v28 }
  0x91   : > { %v4661_v37 = vpop.permute.xlu0 %1166  ;;  %v1049_v38 = vpop.permute.xlu1 %1048 }
  0x92   : > { %v1131_v39 = vsel %vm4649_vm1, %v1049_v38, %v1053_v29  ;;  %v1230_v40 = vsel %vm4638_vm0, %v1163_v34, %v4661_v37  ;;  %v2063_v34 = vld [vmem:[%s6238_s2 + $0xe0] sm:$0xff] }
  0x93   : > { %668 = vrot.lane.b32.xlu0 %v4597_v20, %s4421_s20  ;;  %1406 = vmatpush1.msra.mxu0 %v1131_v39 }
  0x94   : > { %672 = vrot.lane.b32.xlu1 %v4602_v21, %s4421_s20  ;;  %1480 = vmatprep.subr.mxu1 %v1230_v40 }
  0x95   : > { %1481 = vmatpush1.msra.mxu1 %v1231_v42  ;;  %v951_v43 = vpop.permute.xlu0 %950  ;;  %v955_v44 = vpop.permute.xlu1 %954 }
  0x96   : > { %v1028_v45 = vsel %vm4671_vm2, %v951_v43, %v955_v44 }
  0x97   : > { %452 = vrot.lane.b32.xlu0 %v4579_v16, %s4423_s22  ;;  %1407 = vmatprep.subr.mxu0 %v1028_v45  ;;  %v706_v16 = vadd.s32 104, %v4501_v1  ;;  %v500_v45 = vadd.s32 120, %v4501_v1 }
  0x98   : > { %456 = vrot.lane.b32.xlu1 %v372_v17, %s4423_s22 }
  0x99   : > { %v1061_v46 = vpop.permute.xlu0 %1060  ;;  %v4684_v47 = vpop.permute.xlu1 %1064  ;;  %vm4775_vm5 = vcmp.lt.s32.totalorder %v4630_v22, %v706_v16  ;;  %vm4829_vm7 = vcmp.lt.s32.totalorder %v4630_v22, %v500_v45 }
  0x9a   : > { %v1128_v48 = vsel %vm4649_vm1, %v1061_v46, %v4684_v47  ;;  %v1129_v49 = vsel %vm4649_vm1, %v1057_v33, %v1061_v46 }
  0x9b   : > { %566 = vrot.lane.b32.xlu0 %v4597_v20, %s4422_s21  ;;  %1482 = vmatprep.subr.mxu1 %v1128_v48 }
  0x9c   : > { %570 = vrot.lane.b32.xlu1 %v4602_v21, %s4422_s21  ;;  %1483 = vmatpush1.msra.mxu1 %v1129_v49 }
  0x9d   : > { %v947_v51 = vpop.permute.xlu0 %946  ;;  %v849_v52 = vpop.permute.xlu1 %848 }
  0x9e   : > { %v1029_v53 = vsel %vm4671_vm2, %v947_v51, %v951_v43 }
  0x9f   : > { %460 = vrot.lane.b32.xlu0 %v4597_v20, %s4423_s22  ;;  %1408 = vmatpush1.msra.mxu0 %v1029_v53 }
  0xa0   : > { %464 = vrot.lane.b32.xlu1 %v4602_v21, %s4423_s22 }
  0xa1   : > { %v853_v57 = vpop.permute.xlu0 %852  ;;  %v959_v58 = vpop.permute.xlu1 %958 }
  0xa2   : > { %v926_v59 = vsel %vm4706_vm3, %v849_v52, %v853_v57  ;;  %v1027_v4 = vsel %vm4671_vm2, %v955_v44, %v959_v58 }
  0xa3   : > { %1186 = vrot.lane.b32.xlu0 %v4703_v54, %s4416_s15  ;;  %1409 = vmatprep.subr.mxu0 %v926_v59 }
  0xa4   : > { %1190 = vrot.lane.b32.xlu1 %v4715_v56, %s4416_s15 }
  0xa5   : > { %v4724_v61 = vpop.permute.xlu0 %962  ;;  %v845_v62 = vpop.permute.xlu1 %844 }
  0xa6   : > { %v927_v63 = vsel %vm4706_vm3, %v845_v62, %v849_v52  ;;  %v1026_v0 = vsel %vm4671_vm2, %v959_v58, %v4724_v61  ;;  %v4851_v62 = vld [vmem:[%s6237_s1] sm:$0xff] }
  0xa7   : > { %1084 = vrot.lane.b32.xlu0 %v4703_v54, %s4417_s16  ;;  %1410 = vmatpush1.msra.mxu0 %v927_v63 }
  0xa8   : > { %1088 = vrot.lane.b32.xlu1 %v4715_v56, %s4417_s16  ;;  %1484 = vmatprep.subr.mxu1 %v1026_v0 }
  0xa9   : > { %1485 = vmatpush1.msra.mxu1 %v1027_v4  ;;  %v747_v6 = vpop.permute.xlu0 %746  ;;  %v751_v7 = vpop.permute.xlu1 %750 }
  0xaa   : > { %v824_v8 = vsel %vm4739_vm4, %v747_v6, %v751_v7 }
  0xab   : > { %1194 = vrot.lane.b32.xlu0 %v4736_v2, %s4416_s15  ;;  %1411 = vmatprep.subr.mxu0 %v824_v8  ;;  %v4872_v8 = vld [vmem:[%s6237_s1 + $0x8] sm:$0xff] }
  0xac   : > { %1198 = vrot.lane.b32.xlu1 %v4750_v5, %s4416_s15 }
  0xad   : > { %v857_v9 = vpop.permute.xlu0 %856  ;;  %v4758_v10 = vpop.permute.xlu1 %860 }
  0xae   : > { %v924_v11 = vsel %vm4706_vm3, %v857_v9, %v4758_v10  ;;  %v925_v12 = vsel %vm4706_vm3, %v853_v57, %v857_v9 }
  0xaf   : > { %982 = vrot.lane.b32.xlu0 %v4703_v54, %s4418_s17  ;;  %1486 = vmatprep.subr.mxu1 %v924_v11 }
  0xb0   : > { %986 = vrot.lane.b32.xlu1 %v4715_v56, %s4418_s17  ;;  %1487 = vmatpush1.msra.mxu1 %v925_v12 }
  0xb1   : > { %v743_v17 = vpop.permute.xlu0 %742  ;;  %v645_v20 = vpop.permute.xlu1 %644 }
  0xb2   : > { %v825_v21 = vsel %vm4739_vm4, %v743_v17, %v747_v6 }
  0xb3   : > { %1092 = vrot.lane.b32.xlu0 %v4736_v2, %s4417_s16  ;;  %1412 = vmatpush1.msra.mxu0 %v825_v21 }
  0xb4   : > { %1096 = vrot.lane.b32.xlu1 %v4750_v5, %s4417_s16 }
  0xb5   : > { %v649_v24 = vpop.permute.xlu0 %648  ;;  %v755_v25 = vpop.permute.xlu1 %754 }
  0xb6   : > { %v722_v26 = vsel %vm4775_vm5, %v645_v20, %v649_v24  ;;  %v823_v35 = vsel %vm4739_vm4, %v751_v7, %v755_v25 }
  0xb7   : > { %880 = vrot.lane.b32.xlu0 %v4703_v54, %s4419_s18  ;;  %1413 = vmatprep.subr.mxu0 %v722_v26  ;;  %v4924_v26 = vrot.slane %v4589_v19, %v371_v15 }
  0xb8   : > { %884 = vrot.lane.b32.xlu1 %v4715_v56, %s4419_s18 }
  0xb9   : > { %v4788_v29 = vpop.permute.xlu0 %758  ;;  %v641_v30 = vpop.permute.xlu1 %640 }
  0xba   : > { %v723_v31 = vsel %vm4775_vm5, %v641_v30, %v645_v20  ;;  %v822_v33 = vsel %vm4739_vm4, %v755_v25, %v4788_v29  ;;  %v4917_v25 = vrot.slane %v4589_v19, %v367_v14 }
  0xbb   : > { %990 = vrot.lane.b32.xlu0 %v4736_v2, %s4418_s17  ;;  %1414 = vmatpush1.msra.mxu0 %v723_v31 }
  0xbc   : > { %994 = vrot.lane.b32.xlu1 %v4750_v5, %s4418_s17  ;;  %1488 = vmatprep.subr.mxu1 %v822_v33 }
  0xbd   : > { %1489 = vmatpush1.msra.mxu1 %v823_v35  ;;  %v543_v36 = vpop.permute.xlu0 %542  ;;  %v547_v38 = vpop.permute.xlu1 %546 }
  0xbe   : > { %v620_v39 = vsel %vm4798_vm6, %v543_v36, %v547_v38 }
  0xbf   : > { %778 = vrot.lane.b32.xlu0 %v4703_v54, %s4420_s19  ;;  %1415 = vmatprep.subr.mxu0 %v620_v39 }
  0xc0   : > { %782 = vrot.lane.b32.xlu1 %v4715_v56, %s4420_s19 }
  0xc1   : > { %v653_v40 = vpop.permute.xlu0 %652  ;;  %v4812_v42 = vpop.permute.xlu1 %656 }
  0xc2   : > { %v720_v43 = vsel %vm4775_vm5, %v653_v40, %v4812_v42  ;;  %v721_v44 = vsel %vm4775_vm5, %v649_v24, %v653_v40 }
  0xc3   : > { %888 = vrot.lane.b32.xlu0 %v4736_v2, %s4419_s18  ;;  %1490 = vmatprep.subr.mxu1 %v720_v43 }
  0xc4   : > { %892 = vrot.lane.b32.xlu1 %v4750_v5, %s4419_s18  ;;  %1491 = vmatpush1.msra.mxu1 %v721_v44 }
  0xc5   : > { %v539_v46 = vpop.permute.xlu0 %538  ;;  %v437_v48 = vpop.permute.xlu1 %436 }
  0xc6   : > { %v621_v49 = vsel %vm4798_vm6, %v539_v46, %v543_v36 }
  0xc7   : > { %676 = vrot.lane.b32.xlu0 %v4703_v54, %s4421_s20  ;;  %1416 = vmatpush1.msra.mxu0 %v621_v49 }
  0xc8   : > { %680 = vrot.lane.b32.xlu1 %v4715_v56, %s4421_s20 }
  0xc9   : > { %v441_v51 = vpop.permute.xlu0 %440  ;;  %v551_v52 = vpop.permute.xlu1 %550 }
  0xca   : > { %v518_v53 = vsel %vm4829_vm7, %v437_v48, %v441_v51  ;;  %v619_v63 = vsel %vm4798_vm6, %v547_v38, %v551_v52  ;;  %v4952_v38 = vld [vmem:[%s4509_s14 + $0x10] ss:$0 sm:$0xff] }
  0xcb   : > { %786 = vrot.lane.b32.xlu0 %v4736_v2, %s4420_s19  ;;  %1417 = vmatprep.subr.mxu0 %v518_v53 }
  0xcc   : > { %790 = vrot.lane.b32.xlu1 %v4750_v5, %s4420_s19 }
  0xcd   : > { %v4841_v57 = vpop.permute.xlu0 %554  ;;  %v433_v58 = vpop.permute.xlu1 %432 }
  0xce   : > { %v519_v59 = vsel %vm4829_vm7, %v433_v58, %v437_v48  ;;  %v618_v60 = vsel %vm4798_vm6, %v551_v52, %v4841_v57 }
  0xcf   : > { %574 = vrot.lane.b32.xlu0 %v4703_v54, %s4422_s21  ;;  %1418 = vmatpush1.msra.mxu0 %v519_v59 }
  0xd0   : > { %578 = vrot.lane.b32.xlu1 %v4715_v56, %s4422_s21  ;;  %1492 = vmatprep.subr.mxu1 %v618_v60 }
  0xd1   : > { %1493 = vmatpush1.msra.mxu1 %v619_v63  ;;  %v445_v0 = vpop.permute.xlu0 %444  ;;  %v4859_v4 = vpop.permute.xlu1 %448  ;;  %3855 = vmatmul.mubr.msk.f32.vlgmr.msra.gmra.mxu0 %vm1380_vm8, %v4851_v62 }
  0xd2   : > { %v516_v6 = vsel %vm4829_vm7, %v445_v0, %v4859_v4  ;;  %v517_v7 = vsel %vm4829_vm7, %v441_v51, %v445_v0  ;;  %1457 = vmatprep.mubr.f32.mxu0 %v4424_v13 }
  0xd3   : > { %684 = vrot.lane.b32.xlu0 %v4736_v2, %s4421_s20  ;;  %1494 = vmatprep.subr.mxu1 %v516_v6 }
  0xd4   : > { %688 = vrot.lane.b32.xlu1 %v4750_v5, %s4421_s20  ;;  %1495 = vmatpush1.msra.mxu1 %v517_v7 }
  0xd5   : > { %v1171_v9 = vpop.permute.xlu0 %1170  ;;  %v1175_v11 = vpop.permute.xlu1 %1174  ;;  %3857 = vmatmul.mubr.msk.f32.vlgmr.msra.gmra.mxu1 %vm1380_vm8, %v4851_v62  ;;  %3856 = vmatmul.mubr.msk.f32.gmra.mxu0 %vm1380_vm8, %v4872_v8 }
  0xd6   : > { %v1228_v12 = vsel %vm4638_vm0, %v1171_v9, %v1175_v11  ;;  %v1229_v16 = vsel %vm4638_vm0, %v4661_v37, %v1171_v9  ;;  %1605 = vmatprep.mubr.f32.mxu0 %v4424_v13  ;;  %1534 = vmatprep.mubr.f32.mxu1 %v4424_v13 }
  0xd7   : > { %468 = vrot.lane.b32.xlu0 %v4703_v54, %s4423_s22  ;;  %1557 = vmatprep.subr.mxu0 %v1228_v12 }
  0xd8   : > { %472 = vrot.lane.b32.xlu1 %v4715_v56, %s4423_s22  ;;  %1558 = vmatpush1.msra.mxu0 %v1229_v16 }
  0xd9   : > { %v1069_v17 = vpop.permute.xlu0 %1068  ;;  %v1073_v20 = vpop.permute.xlu1 %1072  ;;  %3858 = vmatmul.mubr.msk.f32.gmra.mxu1 %vm1380_vm8, %v4872_v8 }
  0xda   : > { %v1126_v37 = vsel %vm4649_vm1, %v1069_v17, %v1073_v20  ;;  %v1127_v21 = vsel %vm4649_vm1, %v4684_v47, %v1069_v17  ;;  %1682 = vmatprep.mubr.f32.mxu1 %v4424_v13 }
  0xdb   : > { %582 = vrot.lane.b32.xlu0 %v4736_v2, %s4422_s21  ;;  %1559 = vmatprep.subr.mxu0 %v1126_v37 }
  0xdc   : > { %586 = vrot.lane.b32.xlu1 %v4750_v5, %s4422_s21  ;;  %1560 = vmatpush1.msra.mxu0 %v1127_v21 }
  0xdd   : > { %v1179_v54 = vpop.permute.xlu0 %1178  ;;  %v4905_v56 = vpop.permute.xlu1 %1182 }
  0xde   : > { %v1226_v24 = vsel %vm4638_vm0, %v1179_v54, %v4905_v56  ;;  %v1227_v47 = vsel %vm4638_vm0, %v1175_v11, %v1179_v54 }
  0xdf   : > { %476 = vrot.lane.b32.xlu0 %v4736_v2, %s4423_s22  ;;  %1634 = vmatprep.subr.mxu1 %v1226_v24 }
  0xe0   : > { %480 = vrot.lane.b32.xlu1 %v4750_v5, %s4423_s22  ;;  %1635 = vmatpush1.msra.mxu1 %v1227_v47 }
  0xe1   : > { %v967_v28 = vpop.permute.xlu0 %966  ;;  %v971_v30 = vpop.permute.xlu1 %970 }
  0xe2   : > { %v1024_v2 = vsel %vm4671_vm2, %v967_v28, %v971_v30  ;;  %v1025_v31 = vsel %vm4671_vm2, %v4724_v61, %v967_v28  ;;  %v4947_v61 = vrot.slane %v4589_v19, %v375_v18 }
  0xe3   : > { %1202 = vrot.lane.b32.xlu0 %v4917_v25, %s4416_s15  ;;  %1561 = vmatprep.subr.mxu0 %v1024_v2 }
  0xe4   : > { %1206 = vrot.lane.b32.xlu1 %v4924_v26, %s4416_s15  ;;  %1562 = vmatpush1.msra.mxu0 %v1025_v31 }
  0xe5   : > { %v1077_v14 = vpop.permute.xlu0 %1076  ;;  %v4935_v15 = vpop.permute.xlu1 %1080 }
  0xe6   : > { %v1124_v5 = vsel %vm4649_vm1, %v1077_v14, %v4935_v15  ;;  %v1125_v33 = vsel %vm4649_vm1, %v1073_v20, %v1077_v14 }
  0xe7   : > { %1100 = vrot.lane.b32.xlu0 %v4917_v25, %s4417_s16  ;;  %1636 = vmatprep.subr.mxu1 %v1124_v5 }
  0xe8   : > { %1104 = vrot.lane.b32.xlu1 %v4924_v26, %s4417_s16  ;;  %1637 = vmatpush1.msra.mxu1 %v1125_v33 }
  0xe9   : > { %v865_v35 = vpop.permute.xlu0 %864  ;;  %v869_v36 = vpop.permute.xlu1 %868 }
  0xea   : > { %v922_v39 = vsel %vm4706_vm3, %v865_v35, %v869_v36  ;;  %v923_v40 = vsel %vm4706_vm3, %v4758_v10, %v865_v35 }
  0xeb   : > { %1210 = vrot.lane.b32.xlu0 %v4947_v61, %s4416_s15  ;;  %1563 = vmatprep.subr.mxu0 %v922_v39 }
  0xec   : > { %1214 = vrot.lane.b32.xlu1 %v4952_v38, %s4416_s15  ;;  %1564 = vmatpush1.msra.mxu0 %v923_v40 }
  0xed   : > { %v975_v1 = vpop.permute.xlu0 %974  ;;  %v4963_v18 = vpop.permute.xlu1 %978 }
  0xee   : > { %v1022_v19 = vsel %vm4671_vm2, %v975_v1, %v4963_v18  ;;  %v1023_v43 = vsel %vm4671_vm2, %v971_v30, %v975_v1 }
  0xef   : > { %998 = vrot.lane.b32.xlu0 %v4917_v25, %s4418_s17  ;;  %1638 = vmatprep.subr.mxu1 %v1022_v19 }
  0xf0   : > { %1002 = vrot.lane.b32.xlu1 %v4924_v26, %s4418_s17  ;;  %1639 = vmatpush1.msra.mxu1 %v1023_v43 }
  0xf1   : > { %v763_v10 = vpop.permute.xlu0 %762  ;;  %v767_v44 = vpop.permute.xlu1 %766 }
  0xf2   : > { %v820_v45 = vsel %vm4739_vm4, %v763_v10, %v767_v44  ;;  %v821_v46 = vsel %vm4739_vm4, %v4788_v29, %v763_v10 }
  0xf3   : > { %1108 = vrot.lane.b32.xlu0 %v4947_v61, %s4417_s16  ;;  %1565 = vmatprep.subr.mxu0 %v820_v45 }
  0xf4   : > { %1112 = vrot.lane.b32.xlu1 %v4952_v38, %s4417_s16  ;;  %1566 = vmatpush1.msra.mxu0 %v821_v46 }
  0xf5   : > { %v873_v48 = vpop.permute.xlu0 %872  ;;  %v4983_v49 = vpop.permute.xlu1 %876 }
  0xf6   : > { %v920_v51 = vsel %vm4706_vm3, %v873_v48, %v4983_v49  ;;  %v921_v52 = vsel %vm4706_vm3, %v869_v36, %v873_v48 }
  0xf7   : > { %896 = vrot.lane.b32.xlu0 %v4917_v25, %s4419_s18  ;;  %1640 = vmatprep.subr.mxu1 %v920_v51 }
  0xf8   : > { %900 = vrot.lane.b32.xlu1 %v4924_v26, %s4419_s18  ;;  %1641 = vmatpush1.msra.mxu1 %v921_v52 }
  0xf9   : > { %v661_v29 = vpop.permute.xlu0 %660  ;;  %v665_v53 = vpop.permute.xlu1 %664 }
  0xfa   : > { %v718_v58 = vsel %vm4775_vm5, %v661_v29, %v665_v53  ;;  %v719_v59 = vsel %vm4775_vm5, %v4812_v42, %v661_v29 }
  0xfb   : > { %1006 = vrot.lane.b32.xlu0 %v4947_v61, %s4418_s17  ;;  %1567 = vmatprep.subr.mxu0 %v718_v58 }
  0xfc   : > { %1010 = vrot.lane.b32.xlu1 %v4952_v38, %s4418_s17  ;;  %1568 = vmatpush1.msra.mxu0 %v719_v59  ;;  %s4425_s17 = smov 64  }
  0xfd   : > { %v771_v60 = vpop.permute.xlu0 %770 }
  0xfe   : > { %v5003_v63 = vpop.permute.xlu1 %774  ;;  %v819_v0 = vsel %vm4739_vm4, %v767_v44, %v771_v60 }
  0xff   : > { %794 = vrot.lane.b32.xlu0 %v4917_v25, %s4420_s19  ;;  %v818_v42 = vsel %vm4739_vm4, %v771_v60, %v5003_v63 }
 0x100   : > { %798 = vrot.lane.b32.xlu1 %v4924_v26, %s4420_s19  ;;  %1642 = vmatprep.subr.mxu1 %v818_v42 }
 0x101   : > { %1643 = vmatpush1.msra.mxu1 %v819_v0  ;;  %v559_v6 = vpop.permute.xlu0 %558 }
 0x102   : > { %v563_v7 = vpop.permute.xlu1 %562  ;;  %v617_v9 = vsel %vm4798_vm6, %v4841_v57, %v559_v6 }
 0x103   : > { %904 = vrot.lane.b32.xlu0 %v4947_v61, %s4419_s18  ;;  %v616_v11 = vsel %vm4798_vm6, %v559_v6, %v563_v7 }
 0x104   : > { %908 = vrot.lane.b32.xlu1 %v4952_v38, %s4419_s18  ;;  %1569 = vmatprep.subr.mxu0 %v616_v11  ;;  %s4432_s18 = smov 119  }
 0x105   : > { %1570 = vmatpush1.msra.mxu0 %v617_v9  ;;  %v669_v12 = vpop.permute.xlu0 %668 }
 0x106   : > { %v5023_v16 = vpop.permute.xlu1 %672  ;;  %v717_v17 = vsel %vm4775_vm5, %v665_v53, %v669_v12 }
 0x107   : > { %692 = vrot.lane.b32.xlu0 %v4917_v25, %s4421_s20  ;;  %v716_v57 = vsel %vm4775_vm5, %v669_v12, %v5023_v16 }
 0x108   : > { %696 = vrot.lane.b32.xlu1 %v4924_v26, %s4421_s20  ;;  %1644 = vmatprep.subr.mxu1 %v716_v57 }
 0x109   : > { %1645 = vmatpush1.msra.mxu1 %v717_v17  ;;  %v453_v20 = vpop.permute.xlu0 %452 }
 0x10a   : > { %v457_v37 = vpop.permute.xlu1 %456  ;;  %v515_v21 = vsel %vm4829_vm7, %v4859_v4, %v453_v20 }
 0x10b   : > { %802 = vrot.lane.b32.xlu0 %v4947_v61, %s4420_s19  ;;  %v514_v54 = vsel %vm4829_vm7, %v453_v20, %v457_v37 }
 0x10c   : > { %806 = vrot.lane.b32.xlu1 %v4952_v38, %s4420_s19  ;;  %1571 = vmatprep.subr.mxu0 %v514_v54  ;;  %s4434_s19 = smov 73  }
 0x10d   : > { %1572 = vmatpush1.msra.mxu0 %v515_v21  ;;  %v567_v24 = vpop.permute.xlu0 %566 }
 0x10e   : > { %v5043_v47 = vpop.permute.xlu1 %570  ;;  %v615_v28 = vsel %vm4798_vm6, %v563_v7, %v567_v24  ;;  %3859 = vmatmul.mubr.msk.f32.vlgmr.msra.gmra.mxu0 %vm1380_vm8, %v4851_v62 }
 0x10f   : > { %590 = vrot.lane.b32.xlu0 %v4917_v25, %s4422_s21  ;;  %v614_v4 = vsel %vm4798_vm6, %v567_v24, %v5043_v47  ;;  %1611 = vmatprep.mubr.f32.mxu0 %v4424_v13 }
 0x110   : > { %594 = vrot.lane.b32.xlu1 %v4924_v26, %s4422_s21  ;;  %1646 = vmatprep.subr.mxu1 %v614_v4 }
 0x111   : > { %1647 = vmatpush1.msra.mxu1 %v615_v28  ;;  %v461_v30 = vpop.permute.xlu0 %460 }
 0x112   : > { %v5057_v2 = vpop.permute.xlu1 %464  ;;  %v513_v31 = vsel %vm4829_vm7, %v457_v37, %v461_v30  ;;  %3860 = vmatmul.mubr.msk.f32.gmra.mxu0 %vm1380_vm8, %v4872_v8 }
 0x113   : > { %700 = vrot.lane.b32.xlu0 %v4947_v61, %s4421_s20  ;;  %v512_v14 = vsel %vm4829_vm7, %v461_v30, %v5057_v2  ;;  %1759 = vmatprep.mubr.f32.mxu0 %v4424_v13 }
 0x114   : > { %704 = vrot.lane.b32.xlu1 %v4952_v38, %s4421_s20  ;;  %1648 = vmatprep.subr.mxu1 %v512_v14  ;;  %s4426_s20 = smov 127  }
 0x115   : > { %1649 = vmatpush1.msra.mxu1 %v513_v31  ;;  %v1187_v5 = vpop.permute.xlu0 %1186 }
 0x116   : > { %v1191_v33 = vpop.permute.xlu1 %1190  ;;  %v1225_v35 = vsel %vm4638_vm0, %v4905_v56, %v1187_v5  ;;  %3861 = vmatmul.mubr.msk.f32.vlgmr.msra.gmra.mxu1 %vm1380_vm8, %v4851_v62 }
 0x117   : > { %484 = vrot.lane.b32.xlu0 %v4917_v25, %s4423_s22  ;;  %v1224_v36 = vsel %vm4638_vm0, %v1187_v5, %v1191_v33  ;;  %1688 = vmatprep.mubr.f32.mxu1 %v4424_v13 }
 0x118   : > { %488 = vrot.lane.b32.xlu1 %v4924_v26, %s4423_s22  ;;  %1711 = vmatprep.subr.mxu0 %v1224_v36 }
 0x119   : > { %1712 = vmatpush1.msra.mxu0 %v1225_v35  ;;  %v1085_v39 = vpop.permute.xlu0 %1084 }
 0x11a   : > { %v1089_v40 = vpop.permute.xlu1 %1088  ;;  %v1123_v56 = vsel %vm4649_vm1, %v4935_v15, %v1085_v39  ;;  %3862 = vmatmul.mubr.msk.f32.gmra.mxu1 %vm1380_vm8, %v4872_v8 }
 0x11b   : > { %598 = vrot.lane.b32.xlu0 %v4947_v61, %s4422_s21  ;;  %v1122_v25 = vsel %vm4649_vm1, %v1085_v39, %v1089_v40  ;;  %1836 = vmatprep.mubr.f32.mxu1 %v4424_v13 }
 0x11c   : > { %602 = vrot.lane.b32.xlu1 %v4952_v38, %s4422_s21  ;;  %1713 = vmatprep.subr.mxu0 %v1122_v25  ;;  %s4428_s21 = smov 65  }
 0x11d   : > { %1714 = vmatpush1.msra.mxu0 %v1123_v56  ;;  %v1195_v26 = vpop.permute.xlu0 %1194 }
 0x11e   : > { %v5095_v1 = vpop.permute.xlu1 %1198  ;;  %v1223_v15 = vsel %vm4638_vm0, %v1191_v33, %v1195_v26 }
 0x11f   : > { %492 = vrot.lane.b32.xlu0 %v4947_v61, %s4423_s22  ;;  %v1222_v19 = vsel %vm4638_vm0, %v1195_v26, %v5095_v1 }
 0x120   : > { %496 = vrot.lane.b32.xlu1 %v4952_v38, %s4423_s22  ;;  %1788 = vmatprep.subr.mxu1 %v1222_v19 }
 0x121   : > { %1789 = vmatpush1.msra.mxu1 %v1223_v15  ;;  %v983_v43 = vpop.permute.xlu0 %982 }
 0x122   : > { %v987_v10 = vpop.permute.xlu1 %986  ;;  %v1021_v44 = vsel %vm4671_vm2, %v4963_v18, %v983_v43 }
 0x123   : > { %v1020_v45 = vsel %vm4671_vm2, %v983_v43, %v987_v10 }
 0x124   : > { %1715 = vmatprep.subr.mxu0 %v1020_v45 }
 0x125   : > { %1716 = vmatpush1.msra.mxu0 %v1021_v44  ;;  %v1093_v61 = vpop.permute.xlu0 %1092 }
 0x126   : > { %v5111_v46 = vpop.permute.xlu1 %1096  ;;  %v1121_v48 = vsel %vm4649_vm1, %v1089_v40, %v1093_v61 }
 0x127   : > { %v1120_v38 = vsel %vm4649_vm1, %v1093_v61, %v5111_v46 }
 0x128   : > { %1790 = vmatprep.subr.mxu1 %v1120_v38 }
 0x129   : > { %1791 = vmatpush1.msra.mxu1 %v1121_v48  ;;  %v881_v51 = vpop.permute.xlu0 %880 }
 0x12a   : > { %v885_v52 = vpop.permute.xlu1 %884  ;;  %v919_v18 = vsel %vm4706_vm3, %v4983_v49, %v881_v51 }
 0x12b   : > { %v918_v29 = vsel %vm4706_vm3, %v881_v51, %v885_v52 }
 0x12c   : > { %1717 = vmatprep.subr.mxu0 %v918_v29 }
 0x12d   : > { %1718 = vmatpush1.msra.mxu0 %v919_v18  ;;  %v991_v53 = vpop.permute.xlu0 %990 }
 0x12e   : > { %v5123_v58 = vpop.permute.xlu1 %994  ;;  %v1019_v59 = vsel %vm4671_vm2, %v987_v10, %v991_v53 }
 0x12f   : > { %v1018_v60 = vsel %vm4671_vm2, %v991_v53, %v5123_v58 }
 0x130   : > { %1792 = vmatprep.subr.mxu1 %v1018_v60 }
 0x131   : > { %1793 = vmatpush1.msra.mxu1 %v1019_v59  ;;  %v779_v0 = vpop.permute.xlu0 %778 }
 0x132   : > { %v783_v42 = vpop.permute.xlu1 %782  ;;  %v817_v49 = vsel %vm4739_vm4, %v5003_v63, %v779_v0 }
 0x133   : > { %v816_v6 = vsel %vm4739_vm4, %v779_v0, %v783_v42 }
 0x134   : > { %1719 = vmatprep.subr.mxu0 %v816_v6 }
 0x135   : > { %1720 = vmatpush1.msra.mxu0 %v817_v49  ;;  %v889_v7 = vpop.permute.xlu0 %888 }
 0x136   : > { %v917_v9 = vsel %vm4706_vm3, %v885_v52, %v889_v7  ;;  %v5137_v11 = vpop.permute.xlu1 %892 }
 0x137   : > { %v916_v12 = vsel %vm4706_vm3, %v889_v7, %v5137_v11 }
 0x138   : > { %1794 = vmatprep.subr.mxu1 %v916_v12 }
 0x139   : > { %1795 = vmatpush1.msra.mxu1 %v917_v9  ;;  %v677_v17 = vpop.permute.xlu0 %676 }
 0x13a   : > { %v715_v63 = vsel %vm4775_vm5, %v5023_v16, %v677_v17  ;;  %v681_v57 = vpop.permute.xlu1 %680 }
 0x13b   : > { %v714_v20 = vsel %vm4775_vm5, %v677_v17, %v681_v57 }
 0x13c   : > { %1721 = vmatprep.subr.mxu0 %v714_v20 }
 0x13d   : > { %1722 = vmatpush1.msra.mxu0 %v715_v63  ;;  %v787_v37 = vpop.permute.xlu0 %786 }
 0x13e   : > { %v815_v21 = vsel %vm4739_vm4, %v783_v42, %v787_v37  ;;  %v5149_v54 = vpop.permute.xlu1 %790 }
 0x13f   : > { %v814_v24 = vsel %vm4739_vm4, %v787_v37, %v5149_v54 }
 0x140   : > { %1796 = vmatprep.subr.mxu1 %v814_v24 }
 0x141   : > { %1797 = vmatpush1.msra.mxu1 %v815_v21  ;;  %v575_v28 = vpop.permute.xlu0 %574 }
 0x142   : > { %v613_v16 = vsel %vm4798_vm6, %v5043_v47, %v575_v28  ;;  %v579_v4 = vpop.permute.xlu1 %578 }
 0x143   : > { %v612_v30 = vsel %vm4798_vm6, %v575_v28, %v579_v4 }
 0x144   : > { %1723 = vmatprep.subr.mxu0 %v612_v30 }
 0x145   : > { %1724 = vmatpush1.msra.mxu0 %v613_v16  ;;  %v685_v31 = vpop.permute.xlu0 %684 }
 0x146   : > { %v713_v14 = vsel %vm4775_vm5, %v681_v57, %v685_v31  ;;  %v5161_v5 = vpop.permute.xlu1 %688 }
 0x147   : > { %v712_v33 = vsel %vm4775_vm5, %v685_v31, %v5161_v5 }
 0x148   : > { %1798 = vmatprep.subr.mxu1 %v712_v33 }
 0x149   : > { %1799 = vmatpush1.msra.mxu1 %v713_v14  ;;  %v469_v35 = vpop.permute.xlu0 %468 }
 0x14a   : > { %v511_v47 = vsel %vm4829_vm7, %v5057_v2, %v469_v35  ;;  %v473_v36 = vpop.permute.xlu1 %472 }
 0x14b   : > { %v510_v39 = vsel %vm4829_vm7, %v469_v35, %v473_v36 }
 0x14c   : > { %1725 = vmatprep.subr.mxu0 %v510_v39 }
 0x14d   : > { %1726 = vmatpush1.msra.mxu0 %v511_v47  ;;  %v583_v40 = vpop.permute.xlu0 %582 }
 0x14e   : > { %v611_v56 = vsel %vm4798_vm6, %v579_v4, %v583_v40  ;;  %3863 = vmatmul.mubr.msk.f32.vlgmr.msra.gmra.mxu0 %vm1380_vm8, %v4851_v62  ;;  %v5175_v25 = vpop.permute.xlu1 %586 }
 0x14f   : > { %v610_v26 = vsel %vm4798_vm6, %v583_v40, %v5175_v25  ;;  %1765 = vmatprep.mubr.f32.mxu0 %v4424_v13 }
 0x150   : > { %1800 = vmatprep.subr.mxu1 %v610_v26 }
 0x151   : > { %1801 = vmatpush1.msra.mxu1 %v611_v56  ;;  %v477_v2 = vpop.permute.xlu0 %476 }
 0x152   : > { %v509_v15 = vsel %vm4829_vm7, %v473_v36, %v477_v2  ;;  %3864 = vmatmul.mubr.msk.f32.gmra.mxu0 %vm1380_vm8, %v4872_v8  ;;  %v5185_v19 = vpop.permute.xlu1 %480 }
 0x153   : > { %v508_v43 = vsel %vm4829_vm7, %v477_v2, %v5185_v19  ;;  %1913 = vmatprep.mubr.f32.mxu0 %v4424_v13 }
 0x154   : > { %1802 = vmatprep.subr.mxu1 %v508_v43 }
 0x155   : > { %1803 = vmatpush1.msra.mxu1 %v509_v15  ;;  %v1203_v10 = vpop.permute.xlu0 %1202 }
 0x156   : > { %v1221_v44 = vsel %vm4638_vm0, %v5095_v1, %v1203_v10  ;;  %3865 = vmatmul.mubr.msk.f32.vlgmr.msra.gmra.mxu1 %vm1380_vm8, %v4851_v62  ;;  %v1207_v45 = vpop.permute.xlu1 %1206 }
 0x157   : > { %v1220_v61 = vsel %vm4638_vm0, %v1203_v10, %v1207_v45  ;;  %1842 = vmatprep.mubr.f32.mxu1 %v4424_v13  ;;  %v2066_v10 = vld [vmem:[%s6238_s2 + $0xf8] sm:$0xff] }
 0x158   : > { %1865 = vmatprep.subr.mxu0 %v1220_v61 }
 0x159   : > { %1866 = vmatpush1.msra.mxu0 %v1221_v44  ;;  %v1101_v48 = vpop.permute.xlu0 %1100 }
 0x15a   : > { %v1119_v38 = vsel %vm4649_vm1, %v5111_v46, %v1101_v48  ;;  %3866 = vmatmul.mubr.msk.f32.gmra.mxu1 %vm1380_vm8, %v4872_v8  ;;  %v1105_v1 = vpop.permute.xlu1 %1104 }
 0x15b   : > { %v1118_v51 = vsel %vm4649_vm1, %v1101_v48, %v1105_v1  ;;  %1990 = vmatprep.mubr.f32.mxu1 %v4424_v13  ;;  %v2049_v48 = vld [vmem:[%s6238_s2 + $0x70] sm:$0xff] }
 0x15c   : > { %1867 = vmatprep.subr.mxu0 %v1118_v51  ;;  %v2048_v51 = vld [vmem:[%s6238_s2 + $0x68] sm:$0xff] }
 0x15d   : > { %1868 = vmatpush1.msra.mxu0 %v1119_v38  ;;  %v1211_v52 = vpop.permute.xlu0 %1210 }
 0x15e   : > { %v1219_v18 = vsel %vm4638_vm0, %v1207_v45, %v1211_v52  ;;  %v1215_v29 = vpop.permute.xlu1 %1214  ;;  %v2065_v45 = vld [vmem:[%s6238_s2 + $0xf0] sm:$0xff] }
 0x15f   : > { %v1218_v53 = vsel %vm4638_vm0, %v1211_v52, %v1215_v29  ;;  %vm3175_vm0 = vcmp.lt.s32.totalorder %v4630_v22, 61 }
 0x160   : > { %1942 = vmatprep.subr.mxu1 %v1218_v53  ;;  %v2047_v53 = vld [vmem:[%s6238_s2 + $0x60] sm:$0xff] }
 0x161   : > { %1943 = vmatpush1.msra.mxu1 %v1219_v18  ;;  %v999_v46 = vpop.permute.xlu0 %998 }
 0x162   : > { %v1017_v59 = vsel %vm4671_vm2, %v5123_v58, %v999_v46  ;;  %v1003_v60 = vpop.permute.xlu1 %1002 }
 0x163   : > { %v1016_v0 = vsel %vm4671_vm2, %v999_v46, %v1003_v60 }
 0x164   : > { %1869 = vmatprep.subr.mxu0 %v1016_v0  ;;  %v2062_v0 = vld [vmem:[%s6238_s2 + $0xd8] sm:$0xff] }
 0x165   : > { %1870 = vmatpush1.msra.mxu0 %v1017_v59  ;;  %v1109_v42 = vpop.permute.xlu0 %1108  ;;  %v2098_v59 = vld [vmem:[%s6238_s2 + $0x1f8] sm:$0xff] }
 0x166   : > { %v1117_v49 = vsel %vm4649_vm1, %v1105_v1, %v1109_v42  ;;  %v1113_v6 = vpop.permute.xlu1 %1112  ;;  %v2064_v1 = vld [vmem:[%s6238_s2 + $0xe8] sm:$0xff] }
 0x167   : > { %v1116_v27 = vsel %vm4649_vm1, %v1109_v42, %v1113_v6  ;;  %v2046_v42 = vld [vmem:[%s6238_s2 + $0x58] sm:$0xff]  ;;  %v2061_v6 = vld [vmem:[%s6238_s2 + $0xd0] sm:$0xff]  ;;  %vm3152_vm1 = vcmp.ge.s32.totalorder %v4630_v22, 3 }
 0x168   : > { %1944 = vmatprep.subr.mxu1 %v1116_v27  ;;  %v2045_v27 = vld [vmem:[%s6238_s2 + $0x50] sm:$0xff] }
 0x169   : > { %1945 = vmatpush1.msra.mxu1 %v1117_v49  ;;  %v897_v7 = vpop.permute.xlu0 %896  ;;  %v2081_v49 = vld [vmem:[%s6238_s2 + $0x170] sm:$0xff] }
 0x16a   : > { %v915_v58 = vsel %vm4706_vm3, %v5137_v11, %v897_v7  ;;  %v901_v9 = vpop.permute.xlu1 %900 }
 0x16b   : > { %v914_v12 = vsel %vm4706_vm3, %v897_v7, %v901_v9  ;;  %v2080_v7 = vld [vmem:[%s6238_s2 + $0x168] sm:$0xff] }
 0x16c   : > { %1871 = vmatprep.subr.mxu0 %v914_v12  ;;  %v2044_v12 = vld [vmem:[%s6238_s2 + $0x48] sm:$0xff] }
 0x16d   : > { %1872 = vmatpush1.msra.mxu0 %v915_v58  ;;  %v1007_v17 = vpop.permute.xlu0 %1006  ;;  %v2060_v58 = vld [vmem:[%s6238_s2 + $0xc8] sm:$0xff] }
 0x16e   : > { %v1015_v63 = vsel %vm4671_vm2, %v1003_v60, %v1007_v17  ;;  %v1011_v57 = vpop.permute.xlu1 %1010  ;;  %v2082_v60 = vld [vmem:[%s6238_s2 + $0x178] sm:$0xff] }
 0x16f   : > { %v1014_v32 = vsel %vm4671_vm2, %v1007_v17, %v1011_v57  ;;  %v2079_v17 = vld [vmem:[%s6238_s2 + $0x160] sm:$0xff] }
 0x170   : > { %1946 = vmatprep.subr.mxu1 %v1014_v32  ;;  %v2043_v57 = vld [vmem:[%s6238_s2 + $0x40] sm:$0xff]  ;;  %v2078_v32 = vld [vmem:[%s6238_s2 + $0x158] sm:$0xff] }
 0x171   : > { %1947 = vmatpush1.msra.mxu1 %v1015_v63  ;;  %v795_v20 = vpop.permute.xlu0 %794  ;;  %v2059_v63 = vld [vmem:[%s6238_s2 + $0xc0] sm:$0xff] }
 0x172   : > { %v813_v11 = vsel %vm4739_vm4, %v5149_v54, %v795_v20  ;;  %v799_v37 = vpop.permute.xlu1 %798 }
 0x173   : > { %v812_v21 = vsel %vm4739_vm4, %v795_v20, %v799_v37  ;;  %v2058_v20 = vld [vmem:[%s6238_s2 + $0xb8] sm:$0xff] }
 0x174   : > { %1873 = vmatprep.subr.mxu0 %v812_v21  ;;  %v2077_v21 = vld [vmem:[%s6238_s2 + $0x150] sm:$0xff] }
 0x175   : > { %1874 = vmatpush1.msra.mxu0 %v813_v11  ;;  %v905_v24 = vpop.permute.xlu0 %904  ;;  %v2093_v11 = vld [vmem:[%s6238_s2 + $0x1d0] sm:$0xff] }
 0x176   : > { %v913_v28 = vsel %vm4706_vm3, %v901_v9, %v905_v24  ;;  %v909_v16 = vpop.permute.xlu1 %908  ;;  %v2095_v9 = vld [vmem:[%s6238_s2 + $0x1e0] sm:$0xff] }
 0x177   : > { %v912_v41 = vsel %vm4706_vm3, %v905_v24, %v909_v16  ;;  %v2057_v24 = vld [vmem:[%s6238_s2 + $0xb0] sm:$0xff] }
 0x178   : > { %1948 = vmatprep.subr.mxu1 %v912_v41  ;;  %v2041_v16 = vld [vmem:[%s6238_s2 + $0x30] sm:$0xff]  ;;  %v2076_v41 = vld [vmem:[%s6238_s2 + $0x148] sm:$0xff] }
 0x179   : > { %1949 = vmatpush1.msra.mxu1 %v913_v28  ;;  %v693_v4 = vpop.permute.xlu0 %692  ;;  %v2092_v28 = vld [vmem:[%s6238_s2 + $0x1c8] sm:$0xff] }
 0x17a   : > { %v711_v54 = vsel %vm4775_vm5, %v5161_v5, %v693_v4  ;;  %v697_v30 = vpop.permute.xlu1 %696 }
 0x17b   : > { %v710_v31 = vsel %vm4775_vm5, %v693_v4, %v697_v30  ;;  %v2056_v4 = vld [vmem:[%s6238_s2 + $0xa8] sm:$0xff] }
 0x17c   : > { %1875 = vmatprep.subr.mxu0 %v710_v31  ;;  %v2075_v31 = vld [vmem:[%s6238_s2 + $0x140] sm:$0xff] }
 0x17d   : > { %1876 = vmatpush1.msra.mxu0 %v711_v54  ;;  %v803_v14 = vpop.permute.xlu0 %802  ;;  %v2091_v54 = vld [vmem:[%s6238_s2 + $0x1c0] sm:$0xff] }
 0x17e   : > { %v811_v33 = vsel %vm4739_vm4, %v799_v37, %v803_v14  ;;  %v807_v35 = vpop.permute.xlu1 %806  ;;  %v2042_v37 = vld [vmem:[%s6238_s2 + $0x38] sm:$0xff] }
 0x17f   : > { %v810_v55 = vsel %vm4739_vm4, %v803_v14, %v807_v35  ;;  %v2055_v14 = vld [vmem:[%s6238_s2 + $0xa0] sm:$0xff]  ;;  %vm3307_vm4 = vcmp.lt.s32.totalorder %v4630_v22, 55 }
 0x180   : > { %1950 = vmatprep.subr.mxu1 %v810_v55  ;;  %v2039_v35 = vld [vmem:[%s6238_s2 + $0x20] sm:$0xff]  ;;  %v2074_v55 = vld [vmem:[%s6238_s2 + $0x138] sm:$0xff] }
 0x181   : > { %1951 = vmatpush1.msra.mxu1 %v811_v33  ;;  %v591_v47 = vpop.permute.xlu0 %590  ;;  %v2090_v33 = vld [vmem:[%s6238_s2 + $0x1b8] sm:$0xff] }
 0x182   : > { %v609_v5 = vsel %vm4798_vm6, %v5175_v25, %v591_v47  ;;  %v595_v36 = vpop.permute.xlu1 %594 }
 0x183   : > { %v608_v39 = vsel %vm4798_vm6, %v591_v47, %v595_v36  ;;  %v2054_v47 = vld [vmem:[%s6238_s2 + $0x98] sm:$0xff] }
 0x184   : > { %1877 = vmatprep.subr.mxu0 %v608_v39  ;;  %v2038_v39 = vld [vmem:[%s6238_s2 + $0x18] sm:$0xff] }
 0x185   : > { %1878 = vmatpush1.msra.mxu0 %v609_v5  ;;  %v701_v40 = vpop.permute.xlu0 %700 }
 0x186   : > { %v709_v56 = vsel %vm4775_vm5, %v697_v30, %v701_v40  ;;  %v705_v26 = vpop.permute.xlu1 %704  ;;  %v2040_v30 = vld [vmem:[%s6238_s2 + $0x28] sm:$0xff] }
 0x187   : > { %v708_v3 = vsel %vm4775_vm5, %v701_v40, %v705_v26  ;;  %v2073_v40 = vld [vmem:[%s6238_s2 + $0x130] sm:$0xff]  ;;  %v2088_v26 = vld [vmem:[%s6238_s2 + $0x1a8] sm:$0xff]  ;;  %vm3284_vm5 = vcmp.ge.s32.totalorder %v4630_v22, 9 }
 0x188   : > { %1952 = vmatprep.subr.mxu1 %v708_v3  ;;  %v2037_v3 = vld [vmem:[%s6238_s2 + $0x10] sm:$0xff] }
 0x189   : > { %1953 = vmatpush1.msra.mxu1 %v709_v56  ;;  %v485_v2 = vpop.permute.xlu0 %484  ;;  %v2053_v56 = vld [vmem:[%s6238_s2 + $0x90] sm:$0xff] }
 0x18a   : > { %v507_v25 = vsel %vm4829_vm7, %v5185_v19, %v485_v2  ;;  %v489_v15 = vpop.permute.xlu1 %488 }
 0x18b   : > { %v506_v43 = vsel %vm4829_vm7, %v485_v2, %v489_v15  ;;  %v2072_v2 = vld [vmem:[%s6238_s2 + $0x128] sm:$0xff] }
 0x18c   : > { %1879 = vmatprep.subr.mxu0 %v506_v43  ;;  %v2087_v43 = vld [vmem:[%s6238_s2 + $0x1a0] sm:$0xff] }
 0x18d   : > { %1880 = vmatpush1.msra.mxu0 %v507_v25  ;;  %v599_v44 = vpop.permute.xlu0 %598  ;;  %v2052_v25 = vld [vmem:[%s6238_s2 + $0x88] sm:$0xff] }
 0x18e   : > { %v607_v19 = vsel %vm4798_vm6, %v595_v36, %v599_v44  ;;  %3867 = vmatmul.mubr.msk.f32.vlgmr.msra.gmra.mxu0 %vm1380_vm8, %v4851_v62  ;;  %v603_v61 = vpop.permute.xlu1 %602  ;;  %3915 = vmatprep.subr.mxu0 %v2066_v10  ;;  %v2089_v36 = vld [vmem:[%s6238_s2 + $0x1b0] sm:$0xff]  ;;  %v2036_v10 = vld [vmem:[%s6238_s2 + $0x8] sm:$0xff] }
 0x18f   : > { %v606_v38 = vsel %vm4798_vm6, %v599_v44, %v603_v61  ;;  %1919 = vmatprep.mubr.f32.mxu0 %v4424_v13  ;;  %3916 = vmatpush3.msra.mxu0 %v2050_v23  ;;  %v2071_v23 = vld [vmem:[%s6238_s2 + $0x120] sm:$0xff] }
 0x190   : > { %1954 = vmatprep.subr.mxu1 %v606_v38  ;;  %3917 = vmatprep.subr.mxu0 %v2065_v45  ;;  %v2051_v44 = vld [vmem:[%s6238_s2 + $0x80] sm:$0xff]  ;;  %v2070_v38 = vld [vmem:[%s6238_s2 + $0x118] sm:$0xff] }
 0x191   : > { %1955 = vmatpush1.msra.mxu1 %v607_v19  ;;  %v493_v52 = vpop.permute.xlu0 %492  ;;  %3918 = vmatpush3.msra.mxu0 %v2049_v48  ;;  %v1453_v5 = vpop.f32.mrf.mxu0  ;;  %v2086_v19 = vld [vmem:[%s6238_s2 + $0x198] sm:$0xff]  ;;  %v2035_v61 = vld [vmem:[%s6238_s2] sm:$0xff] }
 0x192   : > { %v505_v18 = vsel %vm4829_vm7, %v489_v15, %v493_v52  ;;  %3868 = vmatmul.mubr.msk.f32.gmra.mxu0 %vm1380_vm8, %v4872_v8  ;;  %v497_v29 = vpop.permute.xlu1 %496  ;;  %3919 = vmatprep.subr.mxu0 %v2064_v1  ;;  %v2003_v1 = vand.u32 2147483647, %v1453_v5  ;;  %v2140_v5 = vld [vmem:[%s6238_s2 + $0x348] sm:$0xff] }
 0x193   : > { %v504_v46 = vsel %vm4829_vm7, %v493_v52, %v497_v29  ;;  %3920 = vmatpush3.msra.mxu0 %v2048_v51  ;;  %v1455_v15 = vpop.f32.mrf.mxu0  ;;  %v2085_v51 = vld [vmem:[%s6238_s2 + $0x190] sm:$0xff]  ;;  %v2130_v52 = vld [vmem:[%s6238_s2 + $0x2f8] sm:$0xff]  ;;  %v2084_v29 = vld [vmem:[%s6238_s2 + $0x188] sm:$0xff] }
 0x194   : > { %1956 = vmatprep.subr.mxu1 %v504_v46  ;;  %3921 = vmatprep.subr.mxu0 %v2063_v34  ;;  %v2004_v45 = vand.u32 2147483647, %v1455_v15  ;;  %v2069_v34 = vld [vmem:[%s6238_s2 + $0x110] sm:$0xff]  ;;  %v2138_v15 = vld [vmem:[%s6238_s2 + $0x338] sm:$0xff] }
 0x195   : > { %1957 = vmatpush1.msra.mxu1 %v505_v18  ;;  %3922 = vmatpush3.msra.mxu0 %v2047_v53  ;;  %v1530_v48 = vpop.f32.mrf.mxu1  ;;  %v2114_v18 = vld [vmem:[%s6238_s2 + $0x278] sm:$0xff]  ;;  %v2129_v46 = vld [vmem:[%s6238_s2 + $0x2f0] sm:$0xff] }
 0x196   : > { %3869 = vmatmul.mubr.msk.f32.vlgmr.msra.gmra.mxu1 %vm1380_vm8, %v4851_v62  ;;  %3953 = vmatprep.subr.mxu1 %v2098_v59  ;;  %v2096_v62 = vld [vmem:[%s6238_s2 + $0x1e8] sm:$0xff] }
 0x197   : > { %1996 = vmatprep.mubr.f32.mxu1 %v4424_v13  ;;  %3954 = vmatpush3.msra.mxu1 %v2082_v60  ;;  %v1532_v53 = vpop.f32.mrf.mxu1  ;;  %v2068_v59 = vld [vmem:[%s6238_s2 + $0x108] sm:$0xff]  ;;  %v2113_v60 = vld [vmem:[%s6238_s2 + $0x270] sm:$0xff] }
 0x198   : > { %3923 = vmatprep.subr.mxu0 %v2062_v0  ;;  %3955 = vmatprep.subr.mxu1 %v2097_v50  ;;  %v2083_v0 = vld [vmem:[%s6238_s2 + $0x180] sm:$0xff]  ;;  %v2006_v50 = vand.u32 2147483647, %v1532_v53 }
 0x199   : > { %3924 = vmatpush3.msra.mxu0 %v2046_v42  ;;  %3956 = vmatpush3.msra.mxu1 %v2081_v49  ;;  %v2128_v42 = vld [vmem:[%s6238_s2 + $0x2e8] sm:$0xff]  ;;  %v2067_v49 = vld [vmem:[%s6238_s2 + $0x100] sm:$0xff] }
 0x19a   : > { %3870 = vmatmul.mubr.msk.f32.gmra.mxu1 %vm1380_vm8, %v4872_v8  ;;  %3925 = vmatprep.subr.mxu0 %v2061_v6  ;;  %v2094_v8 = vld [vmem:[%s6238_s2 + $0x1d8] sm:$0xff]  ;;  %v2112_v6 = vld [vmem:[%s6238_s2 + $0x268] sm:$0xff] }
 0x19b   : > { %3957 = vmatprep.subr.mxu1 %v2096_v62  ;;  %3926 = vmatpush3.msra.mxu0 %v2045_v27  ;;  %v2005_v62 = vand.u32 2147483647, %v1530_v48  ;;  %v2127_v27 = vld [vmem:[%s6238_s2 + $0x2e0] sm:$0xff]  ;;  %v2152_v48 = vld [vmem:[%s6238_s2 + $0x3a8] sm:$0xff] }
 0x19c   : > { %3958 = vmatpush3.msra.mxu1 %v2080_v7  ;;  %3927 = vmatprep.subr.mxu0 %v2060_v58  ;;  %v2162_v7 = vld [vmem:[%s6238_s2 + $0x3f8] sm:$0xff]  ;;  %v2111_v58 = vld [vmem:[%s6238_s2 + $0x260] sm:$0xff] }
 0x19d   : > { %3959 = vmatprep.subr.mxu1 %v2095_v9  ;;  %3928 = vmatpush3.msra.mxu0 %v2044_v12  ;;  %v2146_v9 = vld [vmem:[%s6238_s2 + $0x378] sm:$0xff] }
 0x19e   : > { %3960 = vmatpush3.msra.mxu1 %v2079_v17  ;;  %3929 = vmatprep.subr.mxu0 %v2059_v63  ;;  %v2126_v12 = vld [vmem:[%s6238_s2 + $0x2d8] sm:$0xff]  ;;  %v2161_v17 = vld [vmem:[%s6238_s2 + $0x3f0] sm:$0xff] }
 0x19f   : > { %3961 = vmatprep.subr.mxu1 %v2094_v8  ;;  %3930 = vmatpush3.msra.mxu0 %v2043_v57  ;;  %v2110_v63 = vld [vmem:[%s6238_s2 + $0x258] sm:$0xff]  ;;  %v2145_v8 = vld [vmem:[%s6238_s2 + $0x370] sm:$0xff] }
 0x1a0   : > { %3962 = vmatpush3.msra.mxu1 %v2078_v32  ;;  %3931 = vmatprep.subr.mxu0 %v2058_v20  ;;  %v2125_v57 = vld [vmem:[%s6238_s2 + $0x2d0] sm:$0xff]  ;;  %v2160_v32 = vld [vmem:[%s6238_s2 + $0x3e8] sm:$0xff] }
 0x1a1   : > { %3963 = vmatprep.subr.mxu1 %v2093_v11  ;;  %3932 = vmatpush3.msra.mxu0 %v2042_v37  ;;  %v2109_v20 = vld [vmem:[%s6238_s2 + $0x250] sm:$0xff]  ;;  %v2144_v11 = vld [vmem:[%s6238_s2 + $0x368] sm:$0xff] }
 0x1a2   : > { %3964 = vmatpush3.msra.mxu1 %v2077_v21  ;;  %3933 = vmatprep.subr.mxu0 %v2057_v24  ;;  %v2124_v37 = vld [vmem:[%s6238_s2 + $0x2c8] sm:$0xff]  ;;  %v2159_v21 = vld [vmem:[%s6238_s2 + $0x3e0] sm:$0xff] }
 0x1a3   : > { %3965 = vmatprep.subr.mxu1 %v2092_v28  ;;  %3934 = vmatpush3.msra.mxu0 %v2041_v16  ;;  %v2108_v24 = vld [vmem:[%s6238_s2 + $0x248] sm:$0xff]  ;;  %v2143_v28 = vld [vmem:[%s6238_s2 + $0x360] sm:$0xff] }
 0x1a4   : > { %3966 = vmatpush3.msra.mxu1 %v2076_v41  ;;  %3935 = vmatprep.subr.mxu0 %v2056_v4  ;;  %v2123_v16 = vld [vmem:[%s6238_s2 + $0x2c0] sm:$0xff]  ;;  %v2158_v41 = vld [vmem:[%s6238_s2 + $0x3d8] sm:$0xff] }
 0x1a5   : > { %3967 = vmatprep.subr.mxu1 %v2091_v54  ;;  %3936 = vmatpush3.msra.mxu0 %v2040_v30  ;;  %v2107_v4 = vld [vmem:[%s6238_s2 + $0x240] sm:$0xff]  ;;  %v2142_v54 = vld [vmem:[%s6238_s2 + $0x358] sm:$0xff] }
 0x1a6   : > { %3968 = vmatpush3.msra.mxu1 %v2075_v31  ;;  %3937 = vmatprep.subr.mxu0 %v2055_v14  ;;  %v2122_v30 = vld [vmem:[%s6238_s2 + $0x2b8] sm:$0xff]  ;;  %v2157_v31 = vld [vmem:[%s6238_s2 + $0x3d0] sm:$0xff] }
 0x1a7   : > { %3969 = vmatprep.subr.mxu1 %v2090_v33  ;;  %3938 = vmatpush3.msra.mxu0 %v2039_v35  ;;  %v2106_v14 = vld [vmem:[%s6238_s2 + $0x238] sm:$0xff]  ;;  %v2141_v33 = vld [vmem:[%s6238_s2 + $0x350] sm:$0xff] }
 0x1a8   : > { %3970 = vmatpush3.msra.mxu1 %v2074_v55  ;;  %3939 = vmatprep.subr.mxu0 %v2054_v47  ;;  %v2121_v35 = vld [vmem:[%s6238_s2 + $0x2b0] sm:$0xff]  ;;  %v2156_v55 = vld [vmem:[%s6238_s2 + $0x3c8] sm:$0xff] }
 0x1a9   : > { %3971 = vmatprep.subr.mxu1 %v2089_v36  ;;  %3940 = vmatpush3.msra.mxu0 %v2038_v39  ;;  %v2105_v47 = vld [vmem:[%s6238_s2 + $0x230] sm:$0xff]  ;;  %v2120_v36 = vld [vmem:[%s6238_s2 + $0x2a8] sm:$0xff]  ;;  %v1459_v39 = vpop.f32.mrf.mxu0 }
 0x1aa   : > { %3972 = vmatpush3.msra.mxu1 %v2073_v40  ;;  %3941 = vmatprep.subr.mxu0 %v2053_v56  ;;  %v2155_v40 = vld [vmem:[%s6238_s2 + $0x3c0] sm:$0xff]  ;;  %v2104_v56 = vld [vmem:[%s6238_s2 + $0x228] sm:$0xff] }
 0x1ab   : > { %3973 = vmatprep.subr.mxu1 %v2088_v26  ;;  %3942 = vmatpush3.msra.mxu0 %v2037_v3  ;;  %v2139_v26 = vld [vmem:[%s6238_s2 + $0x340] sm:$0xff] }
 0x1ac   : > { %3974 = vmatpush3.msra.mxu1 %v2072_v2  ;;  %3943 = vmatprep.subr.mxu0 %v2052_v25  ;;  %v2119_v3 = vld [vmem:[%s6238_s2 + $0x2a0] sm:$0xff]  ;;  %v2154_v2 = vld [vmem:[%s6238_s2 + $0x3b8] sm:$0xff] }
 0x1ad   : > { %3975 = vmatprep.subr.mxu1 %v2087_v43  ;;  %3944 = vmatpush3.msra.mxu0 %v2036_v10  ;;  %v2103_v25 = vld [vmem:[%s6238_s2 + $0x220] sm:$0xff]  ;;  %v2118_v43 = vld [vmem:[%s6238_s2 + $0x298] sm:$0xff]  ;;  %v1461_v10 = vpop.f32.mrf.mxu0 }
 0x1ae   : > { %3976 = vmatpush3.msra.mxu1 %v2071_v23  ;;  %3945 = vmatprep.subr.mxu0 %v2051_v44  ;;  %v2153_v23 = vld [vmem:[%s6238_s2 + $0x3b0] sm:$0xff]  ;;  %v2102_v44 = vld [vmem:[%s6238_s2 + $0x218] sm:$0xff] }
 0x1af   : > { %3977 = vmatprep.subr.mxu1 %v2086_v19  ;;  %3946 = vmatpush3.msra.mxu0 %v2035_v61  ;;  %v2117_v19 = vld [vmem:[%s6238_s2 + $0x290] sm:$0xff]  ;;  %v2020_v61 = vand.u32 2147483647, %v1461_v10  ;;  %v2206_v10 = vld [vmem:[%s6238_s2 + $0x558] sm:$0xff] }
 0x1b0   : > { %3978 = vmatpush3.msra.mxu1 %v2070_v38  ;;  %2355 = vmatprep.mubr.f32.mxu0 %v2004_v45  ;;  %v2137_v45 = vld [vmem:[%s6238_s2 + $0x330] sm:$0xff] }
 0x1b1   : > { %3979 = vmatprep.subr.mxu1 %v2085_v51  ;;  %3991 = vmatprep.subr.mxu0 %v2130_v52  ;;  %v2101_v38 = vld [vmem:[%s6238_s2 + $0x210] sm:$0xff]  ;;  %v2136_v51 = vld [vmem:[%s6238_s2 + $0x328] sm:$0xff]  ;;  %v2019_v52 = vand.u32 2147483647, %v1459_v39 }
 0x1b2   : > { %2356 = vmatmul.mubr.f32.vlgmr.msra.gmra.mxu0 %v2003_v1  ;;  %3980 = vmatpush3.msra.mxu1 %v2069_v34  ;;  %v1536_v1 = vpop.f32.mrf.mxu1  ;;  %v2116_v34 = vld [vmem:[%s6238_s2 + $0x288] sm:$0xff] }
 0x1b3   : > { %3992 = vmatpush3.msra.mxu0 %v2114_v18  ;;  %3981 = vmatprep.subr.mxu1 %v2084_v29  ;;  %v2151_v18 = vld [vmem:[%s6238_s2 + $0x3a0] sm:$0xff]  ;;  %v2188_v39 = vld [vmem:[%s6238_s2 + $0x4c8] sm:$0xff] }
 0x1b4   : > { %3993 = vmatprep.subr.mxu0 %v2129_v46  ;;  %3982 = vmatpush3.msra.mxu1 %v2068_v59  ;;  %v2135_v29 = vld [vmem:[%s6238_s2 + $0x320] sm:$0xff]  ;;  %v2100_v46 = vld [vmem:[%s6238_s2 + $0x208] sm:$0xff]  ;;  %v1538_v59 = vpop.f32.mrf.mxu1 }
 0x1b5   : > { %3994 = vmatpush3.msra.mxu0 %v2113_v60  ;;  %3983 = vmatprep.subr.mxu1 %v2083_v0  ;;  %v2150_v60 = vld [vmem:[%s6238_s2 + $0x398] sm:$0xff]  ;;  %v2115_v0 = vld [vmem:[%s6238_s2 + $0x280] sm:$0xff] }
 0x1b6   : > { %3995 = vmatprep.subr.mxu0 %v2128_v42  ;;  %3984 = vmatpush3.msra.mxu1 %v2067_v49  ;;  %v2099_v49 = vld [vmem:[%s6238_s2 + $0x200] sm:$0xff] }
 0x1b7   : > { %3996 = vmatpush3.msra.mxu0 %v2112_v6  ;;  %2430 = vmatprep.mubr.f32.mxu1 %v2006_v50  ;;  %v2134_v50 = vld [vmem:[%s6238_s2 + $0x318] sm:$0xff]  ;;  %v2149_v6 = vld [vmem:[%s6238_s2 + $0x390] sm:$0xff] }
 0x1b8   : > { %3997 = vmatprep.subr.mxu0 %v2127_v27  ;;  %4029 = vmatprep.subr.mxu1 %v2162_v7 }
 0x1b9   : > { %2431 = vmatmul.mubr.f32.vlgmr.msra.gmra.mxu1 %v2005_v62  ;;  %3998 = vmatpush3.msra.mxu0 %v2111_v58  ;;  %v2194_v62 = vld [vmem:[%s6238_s2 + $0x4f8] sm:$0xff]  ;;  %v2022_v58 = vand.u32 2147483647, %v1538_v59 }
 0x1ba   : > { %4030 = vmatpush3.msra.mxu1 %v2146_v9  ;;  %3999 = vmatprep.subr.mxu0 %v2126_v12  ;;  %v2021_v9 = vand.u32 2147483647, %v1536_v1  ;;  %v2133_v12 = vld [vmem:[%s6238_s2 + $0x310] sm:$0xff]  ;;  %v2184_v1 = vld [vmem:[%s6238_s2 + $0x4a8] sm:$0xff]  ;;  %v2218_v59 = vld [vmem:[%s6238_s2 + $0x5b8] sm:$0xff] }
 0x1bb   : > { %4031 = vmatprep.subr.mxu1 %v2161_v17  ;;  %4000 = vmatpush3.msra.mxu0 %v2110_v63  ;;  %v2178_v17 = vld [vmem:[%s6238_s2 + $0x478] sm:$0xff]  ;;  %v2148_v63 = vld [vmem:[%s6238_s2 + $0x388] sm:$0xff] }
 0x1bc   : > { %4032 = vmatpush3.msra.mxu1 %v2145_v8  ;;  %4001 = vmatprep.subr.mxu0 %v2125_v57  ;;  %v2193_v8 = vld [vmem:[%s6238_s2 + $0x4f0] sm:$0xff]  ;;  %v2132_v57 = vld [vmem:[%s6238_s2 + $0x308] sm:$0xff] }
 0x1bd   : > { %4033 = vmatprep.subr.mxu1 %v2160_v32  ;;  %4002 = vmatpush3.msra.mxu0 %v2109_v20  ;;  %v2177_v20 = vld [vmem:[%s6238_s2 + $0x470] sm:$0xff] }
 0x1be   : > { %4034 = vmatpush3.msra.mxu1 %v2144_v11  ;;  %4003 = vmatprep.subr.mxu0 %v2124_v37  ;;  %v2147_v11 = vld [vmem:[%s6238_s2 + $0x380] sm:$0xff]  ;;  %v2192_v37 = vld [vmem:[%s6238_s2 + $0x4e8] sm:$0xff] }
 0x1bf   : > { %4035 = vmatprep.subr.mxu1 %v2159_v21  ;;  %4004 = vmatpush3.msra.mxu0 %v2108_v24  ;;  %v2131_v21 = vld [vmem:[%s6238_s2 + $0x300] sm:$0xff] }
 0x1c0   : > { %4036 = vmatpush3.msra.mxu1 %v2143_v28  ;;  %4005 = vmatprep.subr.mxu0 %v2123_v16  ;;  %v2176_v16 = vld [vmem:[%s6238_s2 + $0x468] sm:$0xff] }
 0x1c1   : > { %4037 = vmatprep.subr.mxu1 %v2158_v41  ;;  %4006 = vmatpush3.msra.mxu0 %v2107_v4  ;;  %v2191_v4 = vld [vmem:[%s6238_s2 + $0x4e0] sm:$0xff] }
 0x1c2   : > { %4038 = vmatpush3.msra.mxu1 %v2142_v54  ;;  %4007 = vmatprep.subr.mxu0 %v2122_v30  ;;  %v2175_v54 = vld [vmem:[%s6238_s2 + $0x460] sm:$0xff]  ;;  %v2226_v30 = vld [vmem:[%s6238_s2 + $0x5f8] sm:$0xff] }
 0x1c3   : > { %4039 = vmatprep.subr.mxu1 %v2157_v31  ;;  %4008 = vmatpush3.msra.mxu0 %v2106_v14  ;;  %v2190_v31 = vld [vmem:[%s6238_s2 + $0x4d8] sm:$0xff] }
 0x1c4   : > { %4040 = vmatpush3.msra.mxu1 %v2141_v33  ;;  %4009 = vmatprep.subr.mxu0 %v2121_v35  ;;  %v2210_v14 = vld [vmem:[%s6238_s2 + $0x578] sm:$0xff]  ;;  %v2225_v35 = vld [vmem:[%s6238_s2 + $0x5f0] sm:$0xff] }
 0x1c5   : > { %4041 = vmatprep.subr.mxu1 %v2156_v55  ;;  %4010 = vmatpush3.msra.mxu0 %v2105_v47  ;;  %v2174_v33 = vld [vmem:[%s6238_s2 + $0x458] sm:$0xff]  ;;  %v2189_v55 = vld [vmem:[%s6238_s2 + $0x4d0] sm:$0xff] }
 0x1c6   : > { %4042 = vmatpush3.msra.mxu1 %v2140_v5  ;;  %4011 = vmatprep.subr.mxu0 %v2120_v36  ;;  %v2209_v47 = vld [vmem:[%s6238_s2 + $0x570] sm:$0xff]  ;;  %v2224_v36 = vld [vmem:[%s6238_s2 + $0x5e8] sm:$0xff] }
 0x1c7   : > { %4043 = vmatprep.subr.mxu1 %v2155_v40  ;;  %4012 = vmatpush3.msra.mxu0 %v2104_v56  ;;  %v2173_v5 = vld [vmem:[%s6238_s2 + $0x450] sm:$0xff]  ;;  %v2208_v40 = vld [vmem:[%s6238_s2 + $0x568] sm:$0xff] }
 0x1c8   : > { %4044 = vmatpush3.msra.mxu1 %v2139_v26  ;;  %4013 = vmatprep.subr.mxu0 %v2119_v3  ;;  %v2172_v56 = vld [vmem:[%s6238_s2 + $0x448] sm:$0xff]  ;;  %v2223_v26 = vld [vmem:[%s6238_s2 + $0x5e0] sm:$0xff] }
 0x1c9   : > { %4045 = vmatprep.subr.mxu1 %v2154_v2  ;;  %4014 = vmatpush3.msra.mxu0 %v2103_v25  ;;  %v2187_v3 = vld [vmem:[%s6238_s2 + $0x4c0] sm:$0xff] }
 0x1ca   : > { %4046 = vmatpush3.msra.mxu1 %v2138_v15  ;;  %4015 = vmatprep.subr.mxu0 %v2118_v43  ;;  %v2207_v2 = vld [vmem:[%s6238_s2 + $0x560] sm:$0xff]  ;;  %v2222_v15 = vld [vmem:[%s6238_s2 + $0x5d8] sm:$0xff] }
 0x1cb   : > { %4047 = vmatprep.subr.mxu1 %v2153_v23  ;;  %4016 = vmatpush3.msra.mxu0 %v2102_v44  ;;  %v2171_v25 = vld [vmem:[%s6238_s2 + $0x440] sm:$0xff]  ;;  %v2186_v43 = vld [vmem:[%s6238_s2 + $0x4b8] sm:$0xff]  ;;  %v2221_v44 = vld [vmem:[%s6238_s2 + $0x5d0] sm:$0xff] }
 0x1cc   : > { %4048 = vmatpush3.msra.mxu1 %v2137_v45  ;;  %4017 = vmatprep.subr.mxu0 %v2117_v19  ;;  %v2170_v23 = vld [vmem:[%s6238_s2 + $0x438] sm:$0xff]  ;;  %v2185_v45 = vld [vmem:[%s6238_s2 + $0x4b0] sm:$0xff] }
 0x1cd   : > { %4049 = vmatprep.subr.mxu1 %v2152_v48  ;;  %4018 = vmatpush3.msra.mxu0 %v2101_v38  ;;  %v2205_v19 = vld [vmem:[%s6238_s2 + $0x550] sm:$0xff]  ;;  %v2220_v38 = vld [vmem:[%s6238_s2 + $0x5c8] sm:$0xff] }
 0x1ce   : > { %v1607_v53 = vpop.f32.mrf.mxu0  ;;  %4050 = vmatpush3.msra.mxu1 %v2136_v51  ;;  %2360 = vmatprep.mubr.f32.mxu0 %v2020_v61  ;;  %v2169_v48 = vld [vmem:[%s6238_s2 + $0x430] sm:$0xff]  ;;  %v2204_v51 = vld [vmem:[%s6238_s2 + $0x548] sm:$0xff] }
 0x1cf   : > { %4019 = vmatprep.subr.mxu0 %v2116_v34  ;;  %4051 = vmatprep.subr.mxu1 %v2151_v18  ;;  %v2007_v27 = vand.u32 2147483647, %v1607_v53  ;;  %v2219_v34 = vld [vmem:[%s6238_s2 + $0x5c0] sm:$0xff] }
 0x1d0   : > { %v1609_v42 = vpop.f32.mrf.mxu0  ;;  %2361 = vmatmul.mubr.f32.gmra.mxu0 %v2019_v52  ;;  %4052 = vmatpush3.msra.mxu1 %v2135_v29  ;;  %v2168_v52 = vld [vmem:[%s6238_s2 + $0x428] sm:$0xff]  ;;  %v2183_v18 = vld [vmem:[%s6238_s2 + $0x4a0] sm:$0xff] }
 0x1d1   : > { %v2008_v7 = vand.u32 2147483647, %v1609_v42  ;;  %4020 = vmatpush3.msra.mxu0 %v2100_v46  ;;  %4053 = vmatprep.subr.mxu1 %v2150_v60  ;;  %v2203_v29 = vld [vmem:[%s6238_s2 + $0x540] sm:$0xff]  ;;  %v2182_v60 = vld [vmem:[%s6238_s2 + $0x498] sm:$0xff] }
 0x1d2   : > { %4021 = vmatprep.subr.mxu0 %v2115_v0  ;;  %4054 = vmatpush3.msra.mxu1 %v2134_v50  ;;  %v1613_v61 = vpop.f32.mrf.mxu0  ;;  %v2167_v46 = vld [vmem:[%s6238_s2 + $0x420] sm:$0xff]  ;;  %v2202_v0 = vld [vmem:[%s6238_s2 + $0x538] sm:$0xff] }
 0x1d3   : > { %4022 = vmatpush3.msra.mxu0 %v2099_v49  ;;  %2505 = vmatprep.mubr.f32.mxu0 %v2008_v7  ;;  %v2166_v49 = vld [vmem:[%s6238_s2 + $0x418] sm:$0xff]  ;;  %v2165_v7 = vld [vmem:[%s6238_s2 + $0x410] sm:$0xff] }
 0x1d4   : > { %4055 = vmatprep.subr.mxu1 %v2149_v6  ;;  %4067 = vmatprep.subr.mxu0 %v2194_v62  ;;  %v1615_v53 = vpop.f32.mrf.mxu0  ;;  %v2217_v6 = vld [vmem:[%s6238_s2 + $0x5b0] sm:$0xff] }
 0x1d5   : > { %2435 = vmatprep.mubr.f32.mxu1 %v2022_v58  ;;  %2506 = vmatmul.mubr.f32.vlgmr.msra.gmra.mxu0 %v2007_v27  ;;  %v2024_v42 = vand.u32 2147483647, %v1615_v53  ;;  %v2181_v62 = vld [vmem:[%s6238_s2 + $0x490] sm:$0xff]  ;;  %v2023_v27 = vand.u32 2147483647, %v1613_v61  ;;  %v2254_v61 = vld [vmem:[%s6238_s2 + $0x6d8] sm:$0xff] }
 0x1d6   : > { %v1684_v32 = vpop.f32.mrf.mxu1  ;;  %4056 = vmatpush3.msra.mxu1 %v2133_v12  ;;  %4068 = vmatpush3.msra.mxu0 %v2178_v17  ;;  %v2201_v58 = vld [vmem:[%s6238_s2 + $0x530] sm:$0xff]  ;;  %v2216_v17 = vld [vmem:[%s6238_s2 + $0x5a8] sm:$0xff] }
 0x1d7   : > { %2436 = vmatmul.mubr.f32.gmra.mxu1 %v2021_v9  ;;  %4057 = vmatprep.subr.mxu1 %v2148_v63  ;;  %v2009_v24 = vand.u32 2147483647, %v1684_v32  ;;  %v2180_v9 = vld [vmem:[%s6238_s2 + $0x488] sm:$0xff] }
 0x1d8   : > { %v1686_v28 = vpop.f32.mrf.mxu1  ;;  %4069 = vmatprep.subr.mxu0 %v2193_v8  ;;  %4058 = vmatpush3.msra.mxu1 %v2132_v57  ;;  %v2164_v63 = vld [vmem:[%s6238_s2 + $0x408] sm:$0xff]  ;;  %v2179_v57 = vld [vmem:[%s6238_s2 + $0x480] sm:$0xff] }
 0x1d9   : > { %v2010_v41 = vand.u32 2147483647, %v1686_v28  ;;  %4070 = vmatpush3.msra.mxu0 %v2177_v20  ;;  %4059 = vmatprep.subr.mxu1 %v2147_v11  ;;  %v2200_v8 = vld [vmem:[%s6238_s2 + $0x528] sm:$0xff]  ;;  %v2215_v20 = vld [vmem:[%s6238_s2 + $0x5a0] sm:$0xff]  ;;  %v2198_v28 = vld [vmem:[%s6238_s2 + $0x518] sm:$0xff] }
 0x1da   : > { %4071 = vmatprep.subr.mxu0 %v2192_v37  ;;  %4060 = vmatpush3.msra.mxu1 %v2131_v21  ;;  %v1690_v50 = vpop.f32.mrf.mxu1  ;;  %v2163_v11 = vld [vmem:[%s6238_s2 + $0x400] sm:$0xff] }
 0x1db   : > { %2580 = vmatprep.mubr.f32.mxu1 %v2010_v41  ;;  %4072 = vmatpush3.msra.mxu0 %v2176_v16  ;;  %v2025_v37 = vand.u32 2147483647, %v1690_v50  ;;  %v2199_v21 = vld [vmem:[%s6238_s2 + $0x520] sm:$0xff]  ;;  %v2258_v16 = vld [vmem:[%s6238_s2 + $0x6f8] sm:$0xff]  ;;  %v2213_v41 = vld [vmem:[%s6238_s2 + $0x590] sm:$0xff] }
 0x1dc   : > { %2581 = vmatmul.mubr.f32.vlgmr.msra.gmra.mxu1 %v2009_v24  ;;  %4073 = vmatprep.subr.mxu0 %v2191_v4  ;;  %v1692_v12 = vpop.f32.mrf.mxu1  ;;  %v2214_v24 = vld [vmem:[%s6238_s2 + $0x598] sm:$0xff]  ;;  %v2197_v4 = vld [vmem:[%s6238_s2 + $0x510] sm:$0xff]  ;;  %v2251_v50 = vld [vmem:[%s6238_s2 + $0x6c0] sm:$0xff] }
 0x1dd   : > { %4074 = vmatpush3.msra.mxu0 %v2175_v54  ;;  %4105 = vmatprep.subr.mxu1 %v2226_v30  ;;  %v2026_v32 = vand.u32 2147483647, %v1692_v12  ;;  %v2212_v54 = vld [vmem:[%s6238_s2 + $0x588] sm:$0xff]  ;;  %v2270_v12 = vld [vmem:[%s6238_s2 + $0x758] sm:$0xff] }
 0x1de   : > { %4075 = vmatprep.subr.mxu0 %v2190_v31  ;;  %4106 = vmatpush3.msra.mxu1 %v2210_v14  ;;  %v2196_v30 = vld [vmem:[%s6238_s2 + $0x508] sm:$0xff]  ;;  %v2211_v31 = vld [vmem:[%s6238_s2 + $0x580] sm:$0xff] }
 0x1df   : > { %4076 = vmatpush3.msra.mxu0 %v2174_v33  ;;  %4107 = vmatprep.subr.mxu1 %v2225_v35  ;;  %v2195_v14 = vld [vmem:[%s6238_s2 + $0x500] sm:$0xff]  ;;  %v2290_v33 = vld [vmem:[%s6238_s2 + $0x7f8] sm:$0xff] }
 0x1e0   : > { %4077 = vmatprep.subr.mxu0 %v2189_v55  ;;  %4108 = vmatpush3.msra.mxu1 %v2209_v47 }
 0x1e1   : > { %4078 = vmatpush3.msra.mxu0 %v2173_v5  ;;  %4109 = vmatprep.subr.mxu1 %v2224_v36 }
 0x1e2   : > { %4079 = vmatprep.subr.mxu0 %v2188_v39  ;;  %4110 = vmatpush3.msra.mxu1 %v2208_v40  ;;  %v2242_v39 = vld [vmem:[%s6238_s2 + $0x678] sm:$0xff]  ;;  %v2257_v40 = vld [vmem:[%s6238_s2 + $0x6f0] sm:$0xff] }
 0x1e3   : > { %4080 = vmatpush3.msra.mxu0 %v2172_v56  ;;  %4111 = vmatprep.subr.mxu1 %v2223_v26 }
 0x1e4   : > { %4081 = vmatprep.subr.mxu0 %v2187_v3  ;;  %4112 = vmatpush3.msra.mxu1 %v2207_v2  ;;  %v2241_v3 = vld [vmem:[%s6238_s2 + $0x670] sm:$0xff] }
 0x1e5   : > { %4082 = vmatpush3.msra.mxu0 %v2171_v25  ;;  %4113 = vmatprep.subr.mxu1 %v2222_v15  ;;  %v2256_v25 = vld [vmem:[%s6238_s2 + $0x6e8] sm:$0xff] }
 0x1e6   : > { %4083 = vmatprep.subr.mxu0 %v2186_v43  ;;  %4114 = vmatpush3.msra.mxu1 %v2206_v10  ;;  %v2240_v43 = vld [vmem:[%s6238_s2 + $0x668] sm:$0xff]  ;;  %v2255_v10 = vld [vmem:[%s6238_s2 + $0x6e0] sm:$0xff] }
 0x1e7   : > { %4084 = vmatpush3.msra.mxu0 %v2170_v23  ;;  %4115 = vmatprep.subr.mxu1 %v2221_v44 }
 0x1e8   : > { %4085 = vmatprep.subr.mxu0 %v2185_v45  ;;  %4116 = vmatpush3.msra.mxu1 %v2205_v19  ;;  %v2239_v45 = vld [vmem:[%s6238_s2 + $0x660] sm:$0xff] }
 0x1e9   : > { %4086 = vmatpush3.msra.mxu0 %v2169_v48  ;;  %4117 = vmatprep.subr.mxu1 %v2220_v38  ;;  %v2238_v38 = vld [vmem:[%s6238_s2 + $0x658] sm:$0xff] }
 0x1ea   : > { %4087 = vmatprep.subr.mxu0 %v2184_v1  ;;  %4118 = vmatpush3.msra.mxu1 %v2204_v51  ;;  %v2274_v1 = vld [vmem:[%s6238_s2 + $0x778] sm:$0xff]  ;;  %v2253_v51 = vld [vmem:[%s6238_s2 + $0x6d0] sm:$0xff] }
 0x1eb   : > { %4088 = vmatpush3.msra.mxu0 %v2168_v52  ;;  %4119 = vmatprep.subr.mxu1 %v2219_v34  ;;  %v2289_v52 = vld [vmem:[%s6238_s2 + $0x7f0] sm:$0xff] }
 0x1ec   : > { %4089 = vmatprep.subr.mxu0 %v2183_v18  ;;  %4120 = vmatpush3.msra.mxu1 %v2203_v29  ;;  %v2237_v29 = vld [vmem:[%s6238_s2 + $0x650] sm:$0xff] }
 0x1ed   : > { %4090 = vmatpush3.msra.mxu0 %v2167_v46  ;;  %4121 = vmatprep.subr.mxu1 %v2218_v59  ;;  %v2252_v46 = vld [vmem:[%s6238_s2 + $0x6c8] sm:$0xff]  ;;  %v2273_v59 = vld [vmem:[%s6238_s2 + $0x770] sm:$0xff] }
 0x1ee   : > { %4091 = vmatprep.subr.mxu0 %v2182_v60  ;;  %4122 = vmatpush3.msra.mxu1 %v2202_v0  ;;  %v2236_v60 = vld [vmem:[%s6238_s2 + $0x648] sm:$0xff] }
 0x1ef   : > { %4092 = vmatpush3.msra.mxu0 %v2166_v49  ;;  %4123 = vmatprep.subr.mxu1 %v2217_v6  ;;  %v2288_v0 = vld [vmem:[%s6238_s2 + $0x7e8] sm:$0xff]  ;;  %v2235_v49 = vld [vmem:[%s6238_s2 + $0x640] sm:$0xff] }
 0x1f0   : > { %4093 = vmatprep.subr.mxu0 %v2181_v62  ;;  %2510 = vmatprep.mubr.f32.mxu0 %v2024_v42  ;;  %v2272_v42 = vld [vmem:[%s6238_s2 + $0x768] sm:$0xff]  ;;  %v2287_v6 = vld [vmem:[%s6238_s2 + $0x7e0] sm:$0xff]  ;;  %v2250_v62 = vld [vmem:[%s6238_s2 + $0x6b8] sm:$0xff] }
 0x1f1   : > { %4094 = vmatpush3.msra.mxu0 %v2165_v7  ;;  %4124 = vmatpush3.msra.mxu1 %v2201_v58  ;;  %v2234_v7 = vld [vmem:[%s6238_s2 + $0x638] sm:$0xff] }
 0x1f2   : > { %2511 = vmatmul.mubr.f32.gmra.mxu0 %v2023_v27  ;;  %4095 = vmatprep.subr.mxu0 %v2180_v9  ;;  %v2271_v27 = vld [vmem:[%s6238_s2 + $0x760] sm:$0xff]  ;;  %v2286_v58 = vld [vmem:[%s6238_s2 + $0x7d8] sm:$0xff]  ;;  %v2249_v9 = vld [vmem:[%s6238_s2 + $0x6b0] sm:$0xff] }
 0x1f3   : > { %4125 = vmatprep.subr.mxu1 %v2216_v17  ;;  %4096 = vmatpush3.msra.mxu0 %v2164_v63  ;;  %v2233_v17 = vld [vmem:[%s6238_s2 + $0x630] sm:$0xff] }
 0x1f4   : > { %4126 = vmatpush3.msra.mxu1 %v2200_v8  ;;  %4097 = vmatprep.subr.mxu0 %v2179_v57  ;;  %v2285_v63 = vld [vmem:[%s6238_s2 + $0x7d0] sm:$0xff]  ;;  %v2248_v8 = vld [vmem:[%s6238_s2 + $0x6a8] sm:$0xff] }
 0x1f5   : > { %4127 = vmatprep.subr.mxu1 %v2215_v20  ;;  %4098 = vmatpush3.msra.mxu0 %v2163_v11  ;;  %v2269_v57 = vld [vmem:[%s6238_s2 + $0x750] sm:$0xff]  ;;  %v2284_v20 = vld [vmem:[%s6238_s2 + $0x7c8] sm:$0xff]  ;;  %v2247_v11 = vld [vmem:[%s6238_s2 + $0x6a0] sm:$0xff] }
 0x1f6   : > { %4128 = vmatpush3.msra.mxu1 %v2199_v21  ;;  %2585 = vmatprep.mubr.f32.mxu1 %v2026_v32  ;;  %v2232_v32 = vld [vmem:[%s6238_s2 + $0x628] sm:$0xff]  ;;  %v2231_v21 = vld [vmem:[%s6238_s2 + $0x620] sm:$0xff] }
 0x1f7   : > { %4129 = vmatprep.subr.mxu1 %v2214_v24  ;;  %2586 = vmatmul.mubr.f32.gmra.mxu1 %v2025_v37  ;;  %v2268_v37 = vld [vmem:[%s6238_s2 + $0x748] sm:$0xff]  ;;  %v2283_v24 = vld [vmem:[%s6238_s2 + $0x7c0] sm:$0xff] }
 0x1f8   : > { %4130 = vmatpush3.msra.mxu1 %v2198_v28  ;;  %4143 = vmatprep.subr.mxu0 %v2258_v16  ;;  %v2246_v28 = vld [vmem:[%s6238_s2 + $0x698] sm:$0xff]  ;;  %v2267_v16 = vld [vmem:[%s6238_s2 + $0x740] sm:$0xff] }
 0x1f9   : > { %4131 = vmatprep.subr.mxu1 %v2213_v41  ;;  %v2230_v41 = vld [vmem:[%s6238_s2 + $0x618] sm:$0xff] }
 0x1fa   : > { %4132 = vmatpush3.msra.mxu1 %v2197_v4  ;;  %v2282_v4 = vld [vmem:[%s6238_s2 + $0x7b8] sm:$0xff] }
 0x1fb   : > { %4133 = vmatprep.subr.mxu1 %v2212_v54  ;;  %v2245_v54 = vld [vmem:[%s6238_s2 + $0x690] sm:$0xff] }
 0x1fc   : > { %4134 = vmatpush3.msra.mxu1 %v2196_v30  ;;  %v2266_v30 = vld [vmem:[%s6238_s2 + $0x738] sm:$0xff] }
 0x1fd   : > { %4135 = vmatprep.subr.mxu1 %v2211_v31  ;;  %v2229_v31 = vld [vmem:[%s6238_s2 + $0x610] sm:$0xff] }
 0x1fe   : > { %4136 = vmatpush3.msra.mxu1 %v2195_v14  ;;  %v2281_v14 = vld [vmem:[%s6238_s2 + $0x7b0] sm:$0xff] }
 0x1ff   : > { %4181 = vmatprep.subr.mxu1 %v2290_v33  ;;  %v2244_v33 = vld [vmem:[%s6238_s2 + $0x688] sm:$0xff] }
 0x20e   : > { %v1761_v35 = vpop.f32.mrf.mxu0 }
 0x20f   : > { %v2011_v55 = vand.u32 2147483647, %v1761_v35  ;;  %v2265_v35 = vld [vmem:[%s6238_s2 + $0x730] sm:$0xff] }
 0x210   : > { %v1763_v47 = vpop.f32.mrf.mxu0 }
 0x211   : > { %v2012_v5 = vand.u32 2147483647, %v1763_v47  ;;  %v2280_v47 = vld [vmem:[%s6238_s2 + $0x7a8] sm:$0xff] }
 0x212   : > { %v1767_v36 = vpop.f32.mrf.mxu0 }
 0x213   : > { %2655 = vmatprep.mubr.f32.mxu0 %v2012_v5  ;;  %v2027_v56 = vand.u32 2147483647, %v1767_v36  ;;  %v2243_v5 = vld [vmem:[%s6238_s2 + $0x680] sm:$0xff]  ;;  %v2264_v36 = vld [vmem:[%s6238_s2 + $0x728] sm:$0xff] }
 0x214   : > { %v1769_v26 = vpop.f32.mrf.mxu0  ;;  %2656 = vmatmul.mubr.f32.vlgmr.msra.gmra.mxu0 %v2011_v55  ;;  %v2228_v55 = vld [vmem:[%s6238_s2 + $0x608] sm:$0xff] }
 0x215   : > { %v2028_v2 = vand.u32 2147483647, %v1769_v26  ;;  %4144 = vmatpush3.msra.mxu0 %v2242_v39  ;;  %v2227_v39 = vld [vmem:[%s6238_s2 + $0x600] sm:$0xff]  ;;  %v2278_v26 = vld [vmem:[%s6238_s2 + $0x798] sm:$0xff] }
 0x216   : > { %v1838_v15 = vpop.f32.mrf.mxu1  ;;  %4145 = vmatprep.subr.mxu0 %v2257_v40  ;;  %v2279_v40 = vld [vmem:[%s6238_s2 + $0x7a0] sm:$0xff] }
 0x217   : > { %2660 = vmatprep.mubr.f32.mxu0 %v2028_v2  ;;  %4146 = vmatpush3.msra.mxu0 %v2241_v3  ;;  %v2013_v23 = vand.u32 2147483647, %v1838_v15  ;;  %v2262_v3 = vld [vmem:[%s6238_s2 + $0x718] sm:$0xff]  ;;  %v2277_v2 = vld [vmem:[%s6238_s2 + $0x790] sm:$0xff]  ;;  %v2276_v15 = vld [vmem:[%s6238_s2 + $0x788] sm:$0xff] }
 0x218   : > { %v1840_v44 = vpop.f32.mrf.mxu1  ;;  %2661 = vmatmul.mubr.f32.gmra.mxu0 %v2027_v56  ;;  %4147 = vmatprep.subr.mxu0 %v2256_v25  ;;  %v2263_v56 = vld [vmem:[%s6238_s2 + $0x720] sm:$0xff]  ;;  %v2261_v25 = vld [vmem:[%s6238_s2 + $0x710] sm:$0xff] }
 0x219   : > { %v2014_v19 = vand.u32 2147483647, %v1840_v44  ;;  %4148 = vmatpush3.msra.mxu0 %v2240_v43  ;;  %v2260_v43 = vld [vmem:[%s6238_s2 + $0x708] sm:$0xff] }
 0x21a   : > { %v1844_v48 = vpop.f32.mrf.mxu1  ;;  %4149 = vmatprep.subr.mxu0 %v2255_v10  ;;  %v2275_v10 = vld [vmem:[%s6238_s2 + $0x780] sm:$0xff] }
 0x21b   : > { %2730 = vmatprep.mubr.f32.mxu1 %v2014_v19  ;;  %4150 = vmatpush3.msra.mxu0 %v2239_v45  ;;  %v2029_v34 = vand.u32 2147483647, %v1844_v48 }
 0x21c   : > { %v1846_v18 = vpop.f32.mrf.mxu1  ;;  %2731 = vmatmul.mubr.f32.vlgmr.msra.gmra.mxu1 %v2013_v23  ;;  %4151 = vmatprep.subr.mxu0 %v2254_v61  ;;  %v2259_v23 = vld [vmem:[%s6238_s2 + $0x700] sm:$0xff] }
 0x21d   : > { %v2030_v53 = vand.u32 2147483647, %v1846_v18  ;;  %4152 = vmatpush3.msra.mxu0 %v2238_v38  ;;  %4182 = vmatpush3.msra.mxu1 %v2274_v1 }
 0x21e   : > { %4153 = vmatprep.subr.mxu0 %v2253_v51  ;;  %4183 = vmatprep.subr.mxu1 %v2289_v52 }
 0x21f   : > { %2735 = vmatprep.mubr.f32.mxu1 %v2030_v53  ;;  %4154 = vmatpush3.msra.mxu0 %v2237_v29 }
 0x220   : > { %2736 = vmatmul.mubr.f32.gmra.mxu1 %v2029_v34  ;;  %4155 = vmatprep.subr.mxu0 %v2252_v46 }
 0x221   : > { %4184 = vmatpush3.msra.mxu1 %v2273_v59  ;;  %4156 = vmatpush3.msra.mxu0 %v2236_v60 }
 0x222   : > { %4185 = vmatprep.subr.mxu1 %v2288_v0  ;;  %4157 = vmatprep.subr.mxu0 %v2251_v50 }
 0x223   : > { %4186 = vmatpush3.msra.mxu1 %v2272_v42  ;;  %4158 = vmatpush3.msra.mxu0 %v2235_v49 }
 0x224   : > { %4187 = vmatprep.subr.mxu1 %v2287_v6  ;;  %4159 = vmatprep.subr.mxu0 %v2250_v62 }
 0x225   : > { %4188 = vmatpush3.msra.mxu1 %v2271_v27  ;;  %4160 = vmatpush3.msra.mxu0 %v2234_v7 }
 0x226   : > { %4189 = vmatprep.subr.mxu1 %v2286_v58  ;;  %4161 = vmatprep.subr.mxu0 %v2249_v9 }
 0x227   : > { %4190 = vmatpush3.msra.mxu1 %v2270_v12  ;;  %4162 = vmatpush3.msra.mxu0 %v2233_v17 }
 0x228   : > { %4191 = vmatprep.subr.mxu1 %v2285_v63  ;;  %4163 = vmatprep.subr.mxu0 %v2248_v8 }
 0x229   : > { %4192 = vmatpush3.msra.mxu1 %v2269_v57  ;;  %4164 = vmatpush3.msra.mxu0 %v2232_v32 }
 0x22a   : > { %4193 = vmatprep.subr.mxu1 %v2284_v20  ;;  %4165 = vmatprep.subr.mxu0 %v2247_v11 }
 0x22b   : > { %4194 = vmatpush3.msra.mxu1 %v2268_v37  ;;  %4166 = vmatpush3.msra.mxu0 %v2231_v21 }
 0x22c   : > { %4195 = vmatprep.subr.mxu1 %v2283_v24  ;;  %4167 = vmatprep.subr.mxu0 %v2246_v28 }
 0x22d   : > { %4196 = vmatpush3.msra.mxu1 %v2267_v16  ;;  %4168 = vmatpush3.msra.mxu0 %v2230_v41 }
 0x22e   : > { %4197 = vmatprep.subr.mxu1 %v2282_v4  ;;  %4169 = vmatprep.subr.mxu0 %v2245_v54 }
 0x22f   : > { %4198 = vmatpush3.msra.mxu1 %v2266_v30  ;;  %4170 = vmatpush3.msra.mxu0 %v2229_v31 }
 0x230   : > { %4199 = vmatprep.subr.mxu1 %v2281_v14  ;;  %4171 = vmatprep.subr.mxu0 %v2244_v33 }
 0x231   : > { %4200 = vmatpush3.msra.mxu1 %v2265_v35  ;;  %4172 = vmatpush3.msra.mxu0 %v2228_v55 }
 0x232   : > { %4201 = vmatprep.subr.mxu1 %v2280_v47  ;;  %4173 = vmatprep.subr.mxu0 %v2243_v5 }
 0x233   : > { %4202 = vmatpush3.msra.mxu1 %v2264_v36  ;;  %4174 = vmatpush3.msra.mxu0 %v2227_v39 }
 0x234   : > { %4203 = vmatprep.subr.mxu1 %v2279_v40 }
 0x235   : > { %4204 = vmatpush3.msra.mxu1 %v2263_v56 }
 0x236   : > { %4205 = vmatprep.subr.mxu1 %v2278_v26 }
 0x237   : > { %4206 = vmatpush3.msra.mxu1 %v2262_v3 }
 0x238   : > { %4207 = vmatprep.subr.mxu1 %v2277_v2 }
 0x239   : > { %4208 = vmatpush3.msra.mxu1 %v2261_v25 }
 0x23a   : > { %4209 = vmatprep.subr.mxu1 %v2276_v15 }
 0x23b   : > { %4210 = vmatpush3.msra.mxu1 %v2260_v43 }
 0x23c   : > { %4211 = vmatprep.subr.mxu1 %v2275_v10 }
 0x23d   : > { %4212 = vmatpush3.msra.mxu1 %v2259_v23 }
 0x24e   : > { %v1915_v44 = vpop.f32.mrf.mxu0 }
 0x24f   : > { %v2015_v45 = vand.u32 2147483647, %v1915_v44 }
 0x250   : > { %v1917_v19 = vpop.f32.mrf.mxu0 }
 0x251   : > { %v2016_v61 = vand.u32 2147483647, %v1917_v19 }
 0x252   : > { %v1921_v48 = vpop.f32.mrf.mxu0 }
 0x253   : > { %2805 = vmatprep.mubr.f32.mxu0 %v2016_v61  ;;  %v2031_v38 = vand.u32 2147483647, %v1921_v48 }
 0x254   : > { %v1923_v1 = vpop.f32.mrf.mxu0  ;;  %2806 = vmatmul.mubr.f32.vlgmr.msra.gmra.mxu0 %v2015_v45 }
 0x255   : > { %v2032_v51 = vand.u32 2147483647, %v1923_v1 }
 0x256   : > { %v1992_v52 = vpop.f32.mrf.mxu1 }
 0x257   : > { %2810 = vmatprep.mubr.f32.mxu0 %v2032_v51  ;;  %v2017_v29 = vand.u32 2147483647, %v1992_v52 }
 0x258   : > { %v1994_v34 = vpop.f32.mrf.mxu1  ;;  %2811 = vmatmul.mubr.f32.gmra.mxu0 %v2031_v38 }
 0x259   : > { %v2018_v18 = vand.u32 2147483647, %v1994_v34 }
 0x25a   : > { %v1998_v53 = vpop.f32.mrf.mxu1 }
 0x25b   : > { %2880 = vmatprep.mubr.f32.mxu1 %v2018_v18  ;;  %v2033_v60 = vand.u32 2147483647, %v1998_v53 }
 0x25c   : > { %v2000_v46 = vpop.f32.mrf.mxu1  ;;  %2881 = vmatmul.mubr.f32.vlgmr.msra.gmra.mxu1 %v2017_v29 }
 0x25d   : > { %v2034_v59 = vand.u32 2147483647, %v2000_v46 }
 0x25f   : > { %2885 = vmatprep.mubr.f32.mxu1 %v2034_v59 }
 0x260   : > { %2886 = vmatmul.mubr.f32.gmra.mxu1 %v2033_v60 }
 0x272   : > { %v3947_v0 = vpop.f32.mrf.mxu0 }
 0x274   : > { %v3948_v50 = vpop.f32.mrf.mxu0 }
 0x275   : > { %v3949_v24 = vadd.f32 %v3948_v50, %v3947_v0 }
 0x279   : > { %v3985_v49 = vpop.f32.mrf.mxu1 }
 0x27b   : > { %v3986_v62 = vpop.f32.mrf.mxu1 }
 0x27c   : > { %v3987_v28 = vadd.f32 %v3986_v62, %v3985_v49 }
 0x27e   : > { %v2433_v30 = vadd.f32 %v3987_v28, %v3949_v24 }
 0x290   : > { %v3950_v42 = vpop.f32.mrf.mxu0 }
 0x292   : > { %v3951_v6 = vpop.f32.mrf.mxu0 }
 0x293   : > { %v3952_v16 = vadd.f32 %v3951_v6, %v3950_v42 }
 0x295   : > { %v4023_v27 = vpop.f32.mrf.mxu0 }
 0x297   : > { %v3988_v7 = vpop.f32.mrf.mxu1  ;;  %v4024_v58 = vpop.f32.mrf.mxu0 }
 0x298   : > { %v4025_v14 = vadd.f32 %v4024_v58, %v4023_v27 }
 0x299   : > { %v3989_v9 = vpop.f32.mrf.mxu1 }
 0x29a   : > { %v3990_v41 = vadd.f32 %v3989_v9, %v3988_v7  ;;  %v2508_v5 = vadd.f32 %v4025_v14, %v2433_v30 }
 0x29c   : > { %v4061_v17 = vpop.f32.mrf.mxu1  ;;  %v2438_v31 = vadd.f32 %v3990_v41, %v3952_v16 }
 0x29e   : > { %v4062_v8 = vpop.f32.mrf.mxu1 }
 0x29f   : > { %v4063_v36 = vadd.f32 %v4062_v8, %v4061_v17 }
 0x2a1   : > { %v2583_v2 = vadd.f32 %v4063_v36, %v2508_v5  ;;  %v2930_v5 = vld [vmem:[%s6240_s4 + $0x8] sm:$0xff] }
 0x2a2   : > { %v2932_v36 = vld [vmem:[%s6239_s3 + $0x8] sm:$0xff] }
 0x2b2   : > { %v4026_v12 = vpop.f32.mrf.mxu0 }
 0x2b4   : > { %v4027_v63 = vpop.f32.mrf.mxu0 }
 0x2b5   : > { %v4028_v33 = vadd.f32 %v4027_v63, %v4026_v12 }
 0x2b7   : > { %v4064_v32 = vpop.f32.mrf.mxu1  ;;  %v2513_v39 = vadd.f32 %v4028_v33, %v2438_v31 }
 0x2b9   : > { %v4065_v11 = vpop.f32.mrf.mxu1 }
 0x2ba   : > { %v4066_v40 = vadd.f32 %v4065_v11, %v4064_v32 }
 0x2bc   : > { %v2588_v25 = vadd.f32 %v4066_v40, %v2513_v39  ;;  %v2931_v40 = vld [vmem:[%s6239_s3] sm:$0xff] }
 0x2d4   : > { %v4099_v57 = vpop.f32.mrf.mxu0 }
 0x2d6   : > { %v4100_v20 = vpop.f32.mrf.mxu0 }
 0x2d7   : > { %v4101_v26 = vadd.f32 %v4100_v20, %v4099_v57 }
 0x2d8   : > { %v4102_v37 = vpop.f32.mrf.mxu0 }
 0x2d9   : > { %v2658_v44 = vadd.f32 %v4101_v26, %v2583_v2 }
 0x2da   : > { %v4103_v4 = vpop.f32.mrf.mxu0 }
 0x2db   : > { %v4104_v15 = vadd.f32 %v4103_v4, %v4102_v37 }
 0x2dc   : > { %v4137_v21 = vpop.f32.mrf.mxu1 }
 0x2dd   : > { %v2663_v48 = vadd.f32 %v4104_v15, %v2588_v25 }
 0x2de   : > { %v4138_v54 = vpop.f32.mrf.mxu1 }
 0x2df   : > { %v4139_v43 = vadd.f32 %v4138_v54, %v4137_v21  ;;  %v2929_v21 = vld [vmem:[%s6240_s4] sm:$0xff] }
 0x2e0   : > { %v4140_v55 = vpop.f32.mrf.mxu1  ;;  %4270 = vmatprep.mubr.msk.f32.mxu0 %vm2933_vm9, %v2929_v21 }
 0x2e1   : > { %v2733_v38 = vadd.f32 %v4139_v43, %v2658_v44 }
 0x2e2   : > { %v4141_v3 = vpop.f32.mrf.mxu1 }
 0x2e3   : > { %v4142_v45 = vadd.f32 %v4141_v3, %v4140_v55 }
 0x2e5   : > { %v2738_v34 = vadd.f32 %v4142_v45, %v2663_v48  ;;  %v6083_v48 = vld [vmem:[%s6242_s6 + $0x8] sm:$0xff] }
 0x314   : > { %v4175_v35 = vpop.f32.mrf.mxu0 }
 0x316   : > { %v4176_v47 = vpop.f32.mrf.mxu0 }
 0x317   : > { %v4177_v19 = vadd.f32 %v4176_v47, %v4175_v35 }
 0x318   : > { %v4178_v56 = vpop.f32.mrf.mxu0 }
 0x319   : > { %v2808_v18 = vadd.f32 %v4177_v19, %v2733_v38  ;;  %v4427_v19 = vmov 0   ;;  %v6089_v38 = vld [vmem:[%s6242_s6] sm:$0xff] }
 0x31a   : > { %v4179_v10 = vpop.f32.mrf.mxu0  ;;  %4393 = vset.pattern.permute.xlu1 %v4427_v19  ;;  %4392 = vset.pattern.permute.xlu0 %v4427_v19  ;;  %v3888_v19 = vld [vmem:[%s6241_s5 + $0x28] sm:$0xff] }
 0x31b   : > { %v4180_v1 = vadd.f32 %v4179_v10, %v4178_v56  ;;  %v3048_v10 = vld [vmem:[%s6241_s5] sm:$0xff] }
 0x31c   : > { %v4213_v23 = vpop.f32.mrf.mxu1  ;;  %4285 = vmatprep.mubr.msk.f32.mxu1 %vm3062_vm11, %v3048_v10 }
 0x31d   : > { %v2813_v53 = vadd.f32 %v4180_v1, %v2738_v34 }
 0x31e   : > { %v4214_v61 = vpop.f32.mrf.mxu1 }
 0x31f   : > { %v4215_v51 = vadd.f32 %v4214_v61, %v4213_v23 }
 0x320   : > { %v4216_v52 = vpop.f32.mrf.mxu1 }
 0x321   : > { %v2883_v46 = vadd.f32 %v4215_v51, %v2808_v18  ;;  %v3049_v18 = vld [vmem:[%s6241_s5 + $0x8] sm:$0xff] }
 0x322   : > { %v4217_v29 = vpop.f32.mrf.mxu1 }
 0x323   : > { %v4218_v59 = vadd.f32 %v4217_v29, %v4216_v52  ;;  %v2891_v0 = vsel %vm1380_vm8, %v2883_v46, 0.0 }
 0x325   : > { %v2888_v60 = vadd.f32 %v4218_v59, %v2813_v53 }
 0x327   : > { %v2892_v50 = vsel %vm1380_vm8, %v2888_v60, 0.0 }
 0x328   : > { %v2893_v42 = vadd.f32 %v2892_v50, %v2891_v0 }
 0x32a   : > { %2894 = vadd.xlane.f32.xlu0 %v2893_v42 }
 0x3b3   : > { %v2895_v49 = vpop.xlane.xlu0 %2894 }
 0x3b4   : > { %v2896_v6 = vrot.slane %v2895_v49, 4 }
 0x3b6   : > { %v2897_v62 = vadd.f32 %v2896_v6, %v2895_v49 }
 0x3b8   : > { %v2898_v27 = vrot.slane %v2897_v62, 2 }
 0x3ba   : > { %v2899_v7 = vadd.f32 %v2898_v27, %v2897_v62 }
 0x3bc   : > { %v2900_v58 = vrot.slane %v2899_v7, 1 }
 0x3be   : > { %v2901_v9 = vadd.f32 %v2900_v58, %v2899_v7 }
 0x3c0   : > { %4356 = vpush %v2901_v9 }
 0x3f1   : > { %s4357_s26 = spop %4356 }
 0x3f2   : > { %v2903_v12 = vstv %s4357_s26  ;;  %s4435_s26 = smov 101  }
 0x3f3   : > { %v2905_v17 = vmul.f32 0.0009765625, %v2903_v12 }
 0x3f5   : > { %v2906_v63 = vsub.f32 %v2883_v46, %v2905_v17  ;;  %v2907_v8 = vsub.f32 %v2888_v60, %v2905_v17  ;;  %v3879_v17 = vld [vmem:[%s6241_s5 + $0x10] sm:$0xff] }
 0x3f7   : > { %v2908_v57 = vmul.f32 %v2906_v63, %v2906_v63  ;;  %v2909_v32 = vmul.f32 %v2907_v8, %v2907_v8 }
 0x3f9   : > { %v2910_v20 = vsel %vm1380_vm8, %v2908_v57, 0.0  ;;  %v2911_v11 = vsel %vm1380_vm8, %v2909_v32, 0.0  ;;  %v4430_v32 = vmov 1  }
 0x3fa   : > { %v2912_v37 = vadd.f32 %v2911_v11, %v2910_v20 }
 0x3fc   : > { %2913 = vadd.xlane.f32.xlu1 %v2912_v37 }
 0x485   : > { %v2914_v24 = vpop.xlane.xlu1 %2913 }
 0x486   : > { %v2915_v28 = vrot.slane %v2914_v24, 4 }
 0x488   : > { %v2916_v16 = vadd.f32 %v2915_v28, %v2914_v24  ;;  %v3880_v28 = vld [vmem:[%s6241_s5 + $0x18] sm:$0xff] }
 0x48a   : > { %v2917_v41 = vrot.slane %v2916_v16, 2 }
 0x48c   : > { %v2918_v4 = vadd.f32 %v2917_v41, %v2916_v16 }
 0x48e   : > { %v2919_v54 = vrot.slane %v2918_v4, 1 }
 0x490   : > { %v2920_v30 = vadd.f32 %v2919_v54, %v2918_v4 }
 0x492   : > { %4358 = vpush %v2920_v30 }
 0x4c3   : > { %s4359_s29 = spop %4358 }
 0x4c4   : > { %v2922_v31 = vstv %s4359_s29 }
 0x4c5   : > { %v2924_v14 = vmul.f32 0.0009775171, %v2922_v31 }
 0x4c7   : > { %v2925_v33 = vadd.f32 1e-08, %v2924_v14 }
 0x4c9   : > { %4402 = vrsqrt.f32 %v2925_v33 }
 0x4d6   : > { %v4403_v35 = vpop.eup %4402 }
 0x4d7   : > { %v2928_v55 = vmul.f32 %v4403_v35, %v2907_v8  ;;  %v2927_v47 = vmul.f32 %v4403_v35, %v2906_v63 }
 0x4d9   : > { %4266 = vmatprep.subr.mxu0 %v2928_v55 }
 0x4da   : > { %4267 = vmatpush3.msra.mxu0 %v2928_v55 }
 0x4db   : > { %4268 = vmatprep.subr.mxu0 %v2927_v47 }
 0x4dc   : > { %4269 = vmatpush3.msra.mxu0 %v2927_v47 }
 0x4dd   : > { %4271 = vmatmul.mubr.msk.f32.vlgmr.msra.gmra.mxu0 %vm2933_vm9, %v2930_v5 }
 0x4de   : > { %4300 = vmatprep.mubr.msk.f32.mxu0 %vm3062_vm11, %v3879_v17 }
 0x59d   : > { %v4272_v39 = vpop.f32.mrf.mxu0 }
 0x59e   : > { %v3012_v56 = vadd.f32 %v4272_v39, %v2932_v36 }
 0x59f   : > { %v3006_v26 = vpop.f32.mrf.mxu0 }
 0x5a0   : > { %v3007_v3 = vadd.f32 %v3006_v26, %v2931_v40  ;;  %3020 = vrot.lane.b32.xlu0 %v3012_v56, %s4425_s17 }
 0x5a2   : > { %3017 = vrot.lane.b32.xlu1 %v3007_v3, %s4425_s17 }
 0x612   : > { %v3021_v2 = vpop.permute.xlu0 %3020 }
 0x613   : > { %v3022_v25 = vsel %vm3016_vm10, %v3021_v2, %v3012_v56  ;;  %v3887_v2 = vld [vmem:[%s6241_s5 + $0x20] sm:$0xff] }
 0x614   : > { %3025 = vrot.lane.b32.xlu0 %v3022_v25, %s4425_s17  ;;  %v3018_v15 = vpop.permute.xlu1 %3017 }
 0x615   : > { %v3019_v43 = vsel %vm3016_vm10, %v3018_v15, %v3007_v3  ;;  %v4433_v15 = vmov 2  }
 0x616   : > { %3023 = vrot.lane.b32.xlu1 %v3019_v43, %s4425_s17 }
 0x686   : > { %v3026_v23 = vpop.permute.xlu0 %3025 }
 0x687   : > { %v3028_v44 = vsel %vm3016_vm10, %v3026_v23, %v3012_v56 }
 0x688   : > { %3042 = vrot.lane.b32.xlu0 %v3028_v44, %s4426_s20  ;;  %v3024_v45 = vpop.permute.xlu1 %3023 }
 0x689   : > { %v3027_v61 = vsel %vm3016_vm10, %v3024_v45, %v3007_v3 }
 0x68a   : > { %3040 = vrot.lane.b32.xlu1 %v3027_v61, %s4426_s20 }
 0x68c   : > { %3033 = vrot.lane.b32.xlu0 %v3028_v44, %s4428_s21 }
 0x68e   : > { %3031 = vrot.lane.b32.xlu1 %v3027_v61, %s4428_s21 }
 0x690   : > { %3059 = vperm.xlu0 %4392, %v6083_v48  }
 0x692   : > { %3054 = vperm.xlu1 %4393, %v6089_v38  }
 0x694   : > { %4395 = vset.pattern.permute.xlu0 %v4430_v32 }
 0x696   : > { %4394 = vset.pattern.permute.xlu1 %v4430_v32  ;;  %v3896_v32 = vld [vmem:[%s6241_s5 + $0x38] sm:$0xff] }
 0x6fa   : > { %v3043_v1 = vpop.permute.xlu0 %3042 }
 0x6fb   : > { %4273 = vmatprep.subr.msk.mxu1 %vm3039_vm12, %v3043_v1 }
 0x6fc   : > { %4274 = vmatpush3.msk.msra.mxu1 %vm3039_vm12, %v3043_v1  ;;  %v3041_v51 = vpop.permute.xlu1 %3040 }
 0x6fd   : > { %4275 = vmatprep.subr.msk.mxu1 %vm3039_vm12, %v3041_v51 }
 0x6fe   : > { %4276 = vmatpush3.msk.msra.mxu1 %vm3039_vm12, %v3041_v51  ;;  %v3034_v52 = vpop.permute.xlu0 %3033 }
 0x6ff   : > { %4277 = vmatprep.subr.mxu1 %v3012_v56 }
 0x700   : > { %4278 = vmatpush3.msra.mxu1 %v3012_v56  ;;  %v3032_v34 = vpop.permute.xlu1 %3031 }
 0x701   : > { %4279 = vmatprep.subr.mxu1 %v3007_v3 }
 0x702   : > { %4280 = vmatpush3.msra.mxu1 %v3007_v3 }
 0x703   : > { %4281 = vmatprep.subr.msk.mxu1 %vm3015_vm13, %v3034_v52 }
 0x704   : > { %4282 = vmatpush3.msk.msra.mxu1 %vm3015_vm13, %v3034_v52 }
 0x705   : > { %4283 = vmatprep.subr.msk.mxu1 %vm3015_vm13, %v3032_v34 }
 0x706   : > { %4284 = vmatpush3.msk.msra.mxu1 %vm3015_vm13, %v3032_v34 }
 0x707   : > { %4286 = vmatmul.mubr.msk.f32.vlgmr.msra.gmra.mxu1 %vm3062_vm11, %v3049_v18 }
 0x708   : > { %4315 = vmatprep.mubr.msk.f32.mxu1 %vm3062_vm11, %v3887_v2  ;;  %v3904_v2 = vld [vmem:[%s6241_s5 + $0x48] sm:$0xff] }
 0x70b   : > { %v3060_v29 = vpop.permute.xlu0 %3059 }
 0x70d   : > { %v3055_v46 = vpop.permute.xlu1 %3054 }
 0x7c7   : > { %v4287_v53 = vpop.f32.mrf.mxu1 }
 0x7c8   : > { %v3141_v59 = vadd.f32 %v4287_v53, %v3060_v29 }
 0x7c9   : > { %v3135_v60 = vpop.f32.mrf.mxu1 }
 0x7ca   : > { %v3145_v0 = vadd.f32 %v3141_v59, %v3012_v56  ;;  %v3136_v50 = vadd.f32 %v3135_v60, %v3055_v46 }
 0x7cc   : > { %vm3147_vm14 = vcmp.gt.f32.partialorder %v3145_v0, 0.0  ;;  %v3149_v42 = vmul.f32 0.2, %v3145_v0  ;;  %v3144_v49 = vadd.f32 %v3136_v50, %v3007_v3 }
 0x7ce   : > { %v3151_v6 = vsel %vm3147_vm14, %v3145_v0, %v3149_v42  ;;  %vm3146_vm15 = vcmp.gt.f32.partialorder %v3144_v49, 0.0  ;;  %v3148_v62 = vmul.f32 0.2, %v3144_v49  ;;  %vm3439_vm14 = vcmp.lt.s32.totalorder %v4630_v22, 37 }
 0x7cf   : > { %3156 = vrot.lane.b32.xlu1 %v3151_v6, %s4425_s17 }
 0x7d0   : > { %v3150_v27 = vsel %vm3146_vm15, %v3144_v49, %v3148_v62  ;;  %v3895_v62 = vld [vmem:[%s6241_s5 + $0x30] sm:$0xff]  ;;  %vm3416_vm15 = vcmp.ge.s32.totalorder %v4630_v22, 27 }
 0x7d1   : > { %3153 = vrot.lane.b32.xlu0 %v3150_v27, %s4425_s17 }
 0x841   : > { %v3157_v7 = vpop.permute.xlu1 %3156 }
 0x842   : > { %v3158_v58 = vsel %vm3016_vm10, %v3157_v7, %v3151_v6 }
 0x843   : > { %v3154_v9 = vpop.permute.xlu0 %3153  ;;  %3161 = vrot.lane.b32.xlu1 %v3158_v58, %s4425_s17 }
 0x844   : > { %v3155_v12 = vsel %vm3016_vm10, %v3154_v9, %v3150_v27  ;;  %v4436_v9 = vmov 3  }
 0x845   : > { %3159 = vrot.lane.b32.xlu0 %v3155_v12, %s4425_s17 }
 0x8b5   : > { %v3162_v63 = vpop.permute.xlu1 %3161 }
 0x8b6   : > { %v3164_v8 = vsel %vm3016_vm10, %v3162_v63, %v3151_v6 }
 0x8b7   : > { %v3160_v57 = vpop.permute.xlu0 %3159  ;;  %3178 = vrot.lane.b32.xlu1 %v3164_v8, %s4429_s11 }
 0x8b8   : > { %v3163_v20 = vsel %vm3016_vm10, %v3160_v57, %v3150_v27 }
 0x8b9   : > { %3176 = vrot.lane.b32.xlu0 %v3163_v20, %s4429_s11 }
 0x8bb   : > { %3169 = vrot.lane.b32.xlu1 %v3164_v8, %s4431_s12 }
 0x8bd   : > { %3167 = vrot.lane.b32.xlu0 %v3163_v20, %s4431_s12 }
 0x8bf   : > { %3192 = vperm.xlu1 %4394, %v6083_v48  }
 0x8c1   : > { %3188 = vperm.xlu0 %4395, %v6089_v38  }
 0x8c3   : > { %4397 = vset.pattern.permute.xlu1 %v4433_v15 }
 0x8c5   : > { %4396 = vset.pattern.permute.xlu0 %v4433_v15 }
 0x929   : > { %v3179_v11 = vpop.permute.xlu1 %3178 }
 0x92a   : > { %4288 = vmatprep.subr.msk.mxu0 %vm3175_vm0, %v3179_v11 }
 0x92b   : > { %v3177_v37 = vpop.permute.xlu0 %3176  ;;  %4289 = vmatpush3.msk.msra.mxu0 %vm3175_vm0, %v3179_v11 }
 0x92c   : > { %4290 = vmatprep.subr.msk.mxu0 %vm3175_vm0, %v3177_v37 }
 0x92d   : > { %4291 = vmatpush3.msk.msra.mxu0 %vm3175_vm0, %v3177_v37  ;;  %v3170_v21 = vpop.permute.xlu1 %3169 }
 0x92e   : > { %4292 = vmatprep.subr.mxu0 %v3151_v6 }
 0x92f   : > { %4293 = vmatpush3.msra.mxu0 %v3151_v6  ;;  %v3168_v24 = vpop.permute.xlu0 %3167 }
 0x930   : > { %4294 = vmatprep.subr.mxu0 %v3150_v27 }
 0x931   : > { %4295 = vmatpush3.msra.mxu0 %v3150_v27 }
 0x932   : > { %4296 = vmatprep.subr.msk.mxu0 %vm3152_vm1, %v3170_v21 }
 0x933   : > { %4297 = vmatpush3.msk.msra.mxu0 %vm3152_vm1, %v3170_v21 }
 0x934   : > { %4298 = vmatprep.subr.msk.mxu0 %vm3152_vm1, %v3168_v24 }
 0x935   : > { %4299 = vmatpush3.msk.msra.mxu0 %vm3152_vm1, %v3168_v24 }
 0x936   : > { %4301 = vmatmul.mubr.msk.f32.vlgmr.msra.gmra.mxu0 %vm3062_vm11, %v3880_v28 }
 0x937   : > { %4330 = vmatprep.mubr.msk.f32.mxu0 %vm3062_vm11, %v3895_v62 }
 0x93a   : > { %v3193_v16 = vpop.permute.xlu1 %3192 }
 0x93c   : > { %v3189_v4 = vpop.permute.xlu0 %3188 }
 0x9f6   : > { %v4302_v41 = vpop.f32.mrf.mxu0 }
 0x9f7   : > { %v3273_v54 = vadd.f32 %v4302_v41, %v3193_v16 }
 0x9f8   : > { %v3267_v30 = vpop.f32.mrf.mxu0 }
 0x9f9   : > { %v3277_v31 = vadd.f32 %v3273_v54, %v3151_v6  ;;  %v3268_v14 = vadd.f32 %v3267_v30, %v3189_v4 }
 0x9fb   : > { %vm3279_vm2 = vcmp.gt.f32.partialorder %v3277_v31, 0.0  ;;  %v3281_v33 = vmul.f32 0.2, %v3277_v31  ;;  %v3276_v35 = vadd.f32 %v3268_v14, %v3150_v27 }
 0x9fd   : > { %v3283_v55 = vsel %vm3279_vm2, %v3277_v31, %v3281_v33  ;;  %v3280_v47 = vmul.f32 0.2, %v3276_v35  ;;  %vm3278_vm3 = vcmp.gt.f32.partialorder %v3276_v35, 0.0 }
 0x9fe   : > { %3288 = vrot.lane.b32.xlu1 %v3283_v55, %s4425_s17 }
 0x9ff   : > { %v3282_v5 = vsel %vm3278_vm3, %v3276_v35, %v3280_v47 }
 0xa02   : > { %3285 = vrot.lane.b32.xlu1 %v3282_v5, %s4425_s17 }
 0xa70   : > { %v3289_v36 = vpop.permute.xlu1 %3288 }
 0xa71   : > { %v3290_v39 = vsel %vm3016_vm10, %v3289_v36, %v3283_v55  ;;  %v3903_v36 = vld [vmem:[%s6241_s5 + $0x40] sm:$0xff] }
 0xa72   : > { %3293 = vrot.lane.b32.xlu0 %v3290_v39, %s4425_s17 }
 0xa74   : > { %v3286_v40 = vpop.permute.xlu1 %3285 }
 0xa75   : > { %v3287_v56 = vsel %vm3016_vm10, %v3286_v40, %v3282_v5  ;;  %v4438_v40 = vmov 4  }
 0xa76   : > { %3291 = vrot.lane.b32.xlu1 %v3287_v56, %s4425_s17 }
 0xae4   : > { %v3294_v26 = vpop.permute.xlu0 %3293 }
 0xae5   : > { %v3296_v3 = vsel %vm3016_vm10, %v3294_v26, %v3283_v55 }
 0xae6   : > { %3310 = vrot.lane.b32.xlu0 %v3296_v3, %s4432_s18 }
 0xae8   : > { %v3292_v25 = vpop.permute.xlu1 %3291 }
 0xae9   : > { %v3295_v43 = vsel %vm3016_vm10, %v3292_v25, %v3282_v5 }
 0xaea   : > { %3301 = vrot.lane.b32.xlu0 %v3296_v3, %s4434_s19  ;;  %3308 = vrot.lane.b32.xlu1 %v3295_v43, %s4432_s18 }
 0xaee   : > { %3299 = vrot.lane.b32.xlu1 %v3295_v43, %s4434_s19  ;;  %3324 = vperm.xlu0 %4396, %v6083_v48  }
 0xaf2   : > { %3320 = vperm.xlu1 %4397, %v6089_v38   ;;  %4399 = vset.pattern.permute.xlu0 %v4436_v9 }
 0xaf6   : > { %4398 = vset.pattern.permute.xlu1 %v4436_v9 }
 0xb58   : > { %v3311_v10 = vpop.permute.xlu0 %3310 }
 0xb59   : > { %4303 = vmatprep.subr.msk.mxu1 %vm3307_vm4, %v3311_v10 }
 0xb5a   : > { %4304 = vmatpush3.msk.msra.mxu1 %vm3307_vm4, %v3311_v10 }
 0xb5c   : > { %v3309_v23 = vpop.permute.xlu1 %3308  ;;  %v3302_v44 = vpop.permute.xlu0 %3301 }
 0xb5d   : > { %4305 = vmatprep.subr.msk.mxu1 %vm3307_vm4, %v3309_v23 }
 0xb5e   : > { %4306 = vmatpush3.msk.msra.mxu1 %vm3307_vm4, %v3309_v23 }
 0xb5f   : > { %4307 = vmatprep.subr.mxu1 %v3283_v55 }
 0xb60   : > { %4308 = vmatpush3.msra.mxu1 %v3283_v55  ;;  %v3300_v45 = vpop.permute.xlu1 %3299 }
 0xb61   : > { %4309 = vmatprep.subr.mxu1 %v3282_v5 }
 0xb62   : > { %4310 = vmatpush3.msra.mxu1 %v3282_v5 }
 0xb63   : > { %4311 = vmatprep.subr.msk.mxu1 %vm3284_vm5, %v3302_v44 }
 0xb64   : > { %4312 = vmatpush3.msk.msra.mxu1 %vm3284_vm5, %v3302_v44 }
 0xb65   : > { %4313 = vmatprep.subr.msk.mxu1 %vm3284_vm5, %v3300_v45 }
 0xb66   : > { %4314 = vmatpush3.msk.msra.mxu1 %vm3284_vm5, %v3300_v45 }
 0xb67   : > { %4316 = vmatmul.mubr.msk.f32.vlgmr.msra.gmra.mxu1 %vm3062_vm11, %v3888_v19 }
 0xb68   : > { %4345 = vmatprep.mubr.msk.f32.mxu1 %vm3062_vm11, %v3903_v36 }
 0xb69   : > { %v3325_v61 = vpop.permute.xlu0 %3324 }
 0xb6d   : > { %v3321_v51 = vpop.permute.xlu1 %3320 }
 0xc27   : > { %v4317_v1 = vpop.f32.mrf.mxu1 }
 0xc28   : > { %v3405_v52 = vadd.f32 %v4317_v1, %v3325_v61 }
 0xc29   : > { %v3399_v34 = vpop.f32.mrf.mxu1 }
 0xc2a   : > { %v3409_v18 = vadd.f32 %v3405_v52, %v3283_v55  ;;  %v3400_v29 = vadd.f32 %v3399_v34, %v3321_v51  ;;  %v3680_v51 = vld [vmem:[%s6243_s7] sm:$0x1] }
 0xc2c   : > { %vm3411_vm6 = vcmp.gt.f32.partialorder %v3409_v18, 0.0  ;;  %v3413_v53 = vmul.f32 0.2, %v3409_v18  ;;  %v3408_v46 = vadd.f32 %v3400_v29, %v3282_v5 }
 0xc2e   : > { %v3415_v59 = vsel %vm3411_vm6, %v3409_v18, %v3413_v53  ;;  %vm3410_vm7 = vcmp.gt.f32.partialorder %v3408_v46, 0.0  ;;  %v3412_v60 = vmul.f32 0.2, %v3408_v46 }
 0xc2f   : > { %3420 = vrot.lane.b32.xlu1 %v3415_v59, %s4425_s17 }
 0xc30   : > { %v3414_v0 = vsel %vm3410_vm7, %v3408_v46, %v3412_v60 }
 0xc31   : > { %3417 = vrot.lane.b32.xlu0 %v3414_v0, %s4425_s17 }
 0xca1   : > { %v3421_v50 = vpop.permute.xlu1 %3420 }
 0xca2   : > { %v3422_v42 = vsel %vm3016_vm10, %v3421_v50, %v3415_v59 }
 0xca3   : > { %v3418_v49 = vpop.permute.xlu0 %3417  ;;  %3425 = vrot.lane.b32.xlu1 %v3422_v42, %s4425_s17 }
 0xca4   : > { %v3419_v6 = vsel %vm3016_vm10, %v3418_v49, %v3414_v0 }
 0xca5   : > { %3423 = vrot.lane.b32.xlu0 %v3419_v6, %s4425_s17 }
 0xd15   : > { %v3426_v27 = vpop.permute.xlu1 %3425 }
 0xd16   : > { %v3428_v7 = vsel %vm3016_vm10, %v3426_v27, %v3415_v59 }
 0xd17   : > { %v3424_v58 = vpop.permute.xlu0 %3423  ;;  %3442 = vrot.lane.b32.xlu1 %v3428_v7, %s4435_s26 }
 0xd18   : > { %v3427_v12 = vsel %vm3016_vm10, %v3424_v58, %v3414_v0 }
 0xd19   : > { %3440 = vrot.lane.b32.xlu0 %v3427_v12, %s4435_s26 }
 0xd1b   : > { %3433 = vrot.lane.b32.xlu1 %v3428_v7, %s4437_s27 }
 0xd1d   : > { %3431 = vrot.lane.b32.xlu0 %v3427_v12, %s4437_s27 }
 0xd1f   : > { %3456 = vperm.xlu1 %4398, %v6083_v48  }
 0xd21   : > { %3452 = vperm.xlu0 %4399, %v6089_v38  }
 0xd23   : > { %4401 = vset.pattern.permute.xlu1 %v4438_v40 }
 0xd25   : > { %4400 = vset.pattern.permute.xlu0 %v4438_v40 }
 0xd89   : > { %v3443_v17 = vpop.permute.xlu1 %3442 }
 0xd8a   : > { %4318 = vmatprep.subr.msk.mxu0 %vm3439_vm14, %v3443_v17 }
 0xd8b   : > { %v3441_v63 = vpop.permute.xlu0 %3440  ;;  %4319 = vmatpush3.msk.msra.mxu0 %vm3439_vm14, %v3443_v17 }
 0xd8c   : > { %4320 = vmatprep.subr.msk.mxu0 %vm3439_vm14, %v3441_v63 }
 0xd8d   : > { %4321 = vmatpush3.msk.msra.mxu0 %vm3439_vm14, %v3441_v63  ;;  %v3434_v8 = vpop.permute.xlu1 %3433 }
 0xd8e   : > { %4322 = vmatprep.subr.mxu0 %v3415_v59 }
 0xd8f   : > { %4323 = vmatpush3.msra.mxu0 %v3415_v59  ;;  %v3432_v57 = vpop.permute.xlu0 %3431 }
 0xd90   : > { %4324 = vmatprep.subr.mxu0 %v3414_v0 }
 0xd91   : > { %4325 = vmatpush3.msra.mxu0 %v3414_v0 }
 0xd92   : > { %4326 = vmatprep.subr.msk.mxu0 %vm3416_vm15, %v3434_v8 }
 0xd93   : > { %4327 = vmatpush3.msk.msra.mxu0 %vm3416_vm15, %v3434_v8 }
 0xd94   : > { %4328 = vmatprep.subr.msk.mxu0 %vm3416_vm15, %v3432_v57 }
 0xd95   : > { %4329 = vmatpush3.msk.msra.mxu0 %vm3416_vm15, %v3432_v57 }
 0xd96   : > { %4331 = vmatmul.mubr.msk.f32.vlgmr.msra.gmra.mxu0 %vm3062_vm11, %v3896_v32  ;;  %4348 = vmatprep.subr.mxu0 %v4424_v13 }
 0xd9a   : > { %v3457_v20 = vpop.permute.xlu1 %3456 }
 0xd9c   : > { %v3453_v37 = vpop.permute.xlu0 %3452 }
 0xe56   : > { %v4332_v11 = vpop.f32.mrf.mxu0 }
 0xe57   : > { %v3537_v21 = vadd.f32 %v4332_v11, %v3457_v20 }
 0xe58   : > { %v3531_v24 = vpop.f32.mrf.mxu0 }
 0xe59   : > { %v3541_v28 = vadd.f32 %v3537_v21, %v3415_v59  ;;  %v3532_v16 = vadd.f32 %v3531_v24, %v3453_v37 }
 0xe5b   : > { %vm3543_vm0 = vcmp.gt.f32.partialorder %v3541_v28, 0.0  ;;  %v3545_v41 = vmul.f32 0.2, %v3541_v28  ;;  %v3540_v4 = vadd.f32 %v3532_v16, %v3414_v0 }
 0xe5d   : > { %v3547_v54 = vsel %vm3543_vm0, %v3541_v28, %v3545_v41  ;;  %v3544_v30 = vmul.f32 0.2, %v3540_v4  ;;  %vm3542_vm1 = vcmp.gt.f32.partialorder %v3540_v4, 0.0 }
 0xe5e   : > { %3551 = vrot.lane.b32.xlu1 %v3547_v54, %s4425_s17 }
 0xe5f   : > { %v3546_v31 = vsel %vm3542_vm1, %v3540_v4, %v3544_v30 }
 0xe62   : > { %3548 = vrot.lane.b32.xlu1 %v3546_v31, %s4425_s17 }
 0xed0   : > { %v3552_v14 = vpop.permute.xlu1 %3551 }
 0xed1   : > { %v3553_v33 = vsel %vm3016_vm10, %v3552_v14, %v3547_v54 }
 0xed2   : > { %3556 = vrot.lane.b32.xlu0 %v3553_v33, %s4425_s17 }
 0xed4   : > { %v3549_v35 = vpop.permute.xlu1 %3548 }
 0xed5   : > { %v3550_v55 = vsel %vm3016_vm10, %v3549_v35, %v3546_v31 }
 0xed6   : > { %3554 = vrot.lane.b32.xlu1 %v3550_v55, %s4425_s17 }
 0xf44   : > { %v3557_v47 = vpop.permute.xlu0 %3556 }
 0xf45   : > { %v3559_v5 = vsel %vm3016_vm10, %v3557_v47, %v3547_v54 }
 0xf46   : > { %3572 = vrot.lane.b32.xlu0 %v3559_v5, %s4426_s20 }
 0xf48   : > { %v3555_v39 = vpop.permute.xlu1 %3554 }
 0xf49   : > { %v3558_v56 = vsel %vm3016_vm10, %v3555_v39, %v3546_v31  ;;  %vm4439_vm10 = vmmov 0  }
 0xf4a   : > { %3564 = vrot.lane.b32.xlu0 %v3559_v5, %s4428_s21  ;;  %3570 = vrot.lane.b32.xlu1 %v3558_v56, %s4426_s20 }
 0xf4b   : > { %4352 = vmatprep.mubr.msk.f32.mxu0 %vm4439_vm10, %v4424_v13 }
 0xf4e   : > { %3562 = vrot.lane.b32.xlu1 %v3558_v56, %s4428_s21  ;;  %3586 = vperm.xlu0 %4400, %v6083_v48   ;;  %s3914_s21 = sshll.u32 %s6263_s10, 4 }
 0xf4f   : > { %s335_s15 = scalar_lea.vmem %s6244_s8, %s3914_s21 }
 0xf52   : > { %3582 = vperm.xlu1 %4401, %v6089_v38  }
 0xfb8   : > { %v3573_v26 = vpop.permute.xlu0 %3572 }
 0xfb9   : > { %4333 = vmatprep.subr.msk.mxu1 %vm3039_vm12, %v3573_v26 }
 0xfba   : > { %4334 = vmatpush3.msk.msra.mxu1 %vm3039_vm12, %v3573_v26 }
 0xfbc   : > { %v3571_v3 = vpop.permute.xlu1 %3570  ;;  %v3565_v48 = vpop.permute.xlu0 %3564 }
 0xfbd   : > { %4335 = vmatprep.subr.msk.mxu1 %vm3039_vm12, %v3571_v3 }
 0xfbe   : > { %4336 = vmatpush3.msk.msra.mxu1 %vm3039_vm12, %v3571_v3 }
 0xfbf   : > { %4337 = vmatprep.subr.mxu1 %v3547_v54 }
 0xfc0   : > { %4338 = vmatpush3.msra.mxu1 %v3547_v54  ;;  %v3563_v38 = vpop.permute.xlu1 %3562 }
 0xfc1   : > { %4339 = vmatprep.subr.mxu1 %v3546_v31 }
 0xfc2   : > { %4340 = vmatpush3.msra.mxu1 %v3546_v31 }
 0xfc3   : > { %4341 = vmatprep.subr.msk.mxu1 %vm3015_vm13, %v3565_v48 }
 0xfc4   : > { %4342 = vmatpush3.msk.msra.mxu1 %vm3015_vm13, %v3565_v48 }
 0xfc5   : > { %4343 = vmatprep.subr.msk.mxu1 %vm3015_vm13, %v3563_v38 }
 0xfc6   : > { %4344 = vmatpush3.msk.msra.mxu1 %vm3015_vm13, %v3563_v38  ;;  %vm3754_vm13 = vcmask 516096  }
 0xfc7   : > { %4346 = vmatmul.mubr.msk.f32.vlgmr.msra.gmra.mxu1 %vm3062_vm11, %v3904_v2 }
 0xfc9   : > { %v3587_v25 = vpop.permute.xlu0 %3586 }
 0xfcd   : > { %v3583_v43 = vpop.permute.xlu1 %3582 }
0x1087   : > { %v4347_v15 = vpop.f32.mrf.mxu1 }
0x1088   : > { %v3667_v10 = vadd.f32 %v4347_v15, %v3587_v25 }
0x1089   : > { %v3661_v23 = vpop.f32.mrf.mxu1 }
0x108a   : > { %v3671_v44 = vadd.f32 %v3667_v10, %v3547_v54  ;;  %v3662_v45 = vadd.f32 %v3661_v23, %v3583_v43 }
0x108c   : > { %v3675_v19 = vmul.f32 0.2, %v3671_v44  ;;  %v3670_v61 = vadd.f32 %v3662_v45, %v3546_v31  ;;  %vm3673_vm12 = vcmp.gt.f32.partialorder %v3671_v44, 0.0 }
0x108e   : > { %v3674_v22 = vmul.f32 0.2, %v3670_v61  ;;  %v3677_v1 = vsel %vm3673_vm12, %v3671_v44, %v3675_v19  ;;  %vm3672_vm11 = vcmp.gt.f32.partialorder %v3670_v61, 0.0 }
0x108f   : > { %3679 = vst.msk [vmem:[%s335_s15 + $0x8] sm:$0xff] %vm1380_vm8, %v3677_v1  ;;  %4349 = vmatpush3.msra.mxu0 %v3677_v1 }
0x1090   : > { %4350 = vmatprep.subr.mxu0 %v4424_v13  ;;  %v3676_v52 = vsel %vm3672_vm11, %v3670_v61, %v3674_v22 }
0x1091   : > { %3678 = vst.msk [vmem:[%s335_s15] sm:$0xff] %vm1380_vm8, %v3676_v52  ;;  %4351 = vmatpush3.msra.mxu0 %v3676_v52 }
0x1092   : > { %4353 = vmatmul.mubr.msk.f32.vlgmr.msra.gmra.mxu0 %vm2933_vm9, %v3680_v51 }
0x1152   : > { %v3750_v34 = vpop.f32.mrf.mxu0 }
0x1153   : > { %v3755_v18 = vsel %vm3754_vm13, %v3750_v34, -inf }
0x1154   : > { %3756 = vmax.xlane.f32.xlu1 %v3755_v18  ;;  %v4354_v29 = vpop.f32.mrf.mxu0 }
0x11dd   : > { %v3757_v53 = vpop.xlane.xlu1 %3756 }
0x11de   : > { %v3758_v46 = vsub.f32 %v3750_v34, %v3757_v53 }
0x11e0   : > { %v3759_v59 = vmul.f32 1.442695, %v3758_v46 }
0x11e2   : > { %4404 = vpow2.f32 %v3759_v59 }
0x11ef   : > { %v4405_v60 = vpop.eup %4404 }
0x11f0   : > { %v3761_v13 = vsel %vm3754_vm13, %v4405_v60, 0.0 }
0x11f1   : > { %3762 = vadd.xlane.f32.xlu0 %v3761_v13 }
0x127a   : > { %v3763_v0 = vpop.xlane.xlu0 %3762 }
0x127b   : > { %4406 = vrcp.f32 %v3763_v0 }
0x1288   : > { %v4407_v50 = vpop.eup %4406 }
0x1289   : > { %v3765_v42 = vmul.f32 %v4407_v50, %v4405_v60 }
0x128b   : > { %3766 = vst.msk [vmem:[%s338_s23] sm:$0x1] %vm3754_vm13, %v3765_v42 }
0x128c PF: > { %s20_s30 = sadd.s32 1, %s4414_s30  }
0x128d   : > { %p17_p4 = scmp.ge.s32.totalorder %s20_s30, 4  }
0x128f   :  { %19 = sbr.rel (!%p17_p4) target bundleno = 1 (0x1), region = 98 }

</bundles_post_ra>
